<compile_context>
chip_gen: v7x
topology: tpu7x:2x2x1
jax: 0.10.0
libtpu: 0.0.40
codegen_flags: <defaults>
</compile_context>

<pallas_src>
import functools

import jax
import jax.numpy as jnp
from jax.experimental import pallas as pl
from jax.experimental.pallas import tpu as pltpu


# ------------------------------ fused kernel --------------------------------

def _fused_kernel(xpad_ref, pw1_ref, pb1_ref, pw2_ref, pb2_ref,
                  cw1_ref, cb1_ref, fcw_ref, fcb_ref,
                  y_ref, *rest, H, W, compute_aux):
    """One image per grid step (grid = (B,), batch-parallel).

    xpad_ref : (1, H+2, W+2, C) f32 zero-padded NHWC input image
    p*/c*    : conv weights (9*Cin, Cout) bf16 / biases (1, Cout) f32
    fcw/fcb  : head weight (Hid, NC) bf16 (pre-scaled by 1/(H*W)) / bias (1, NC) f32
    y_ref    : (1, 1, NC) f32 logits
    rest     : [xt_ref (1,HW,C), sse_ref (1,1,1)] if compute_aux, then scratch:
               hpad (H+2,W+2,Hid) f32, xtpad (H+2,W+2,C) f32, taps (HW, 9*max(C,Hid)) bf16
    """
    if compute_aux:
        xt_ref, sse_ref, hpad_ref, xtpad_ref, taps_ref = rest
    else:
        hpad_ref, xtpad_ref, taps_ref = rest

    HW = H * W
    C = xpad_ref.shape[3]
    Hid = hpad_ref.shape[2]
    bf16 = jnp.bfloat16

    def conv(cin, w_ref, b_ref, relu):
        # single merged matmul: (HW, 9*cin) bf16 @ (9*cin, cout) bf16, f32 acc
        out = jnp.dot(taps_ref[:, :9 * cin], w_ref[...],
                      preferred_element_type=jnp.float32)
        out = out + b_ref[...]
        if relu:
            out = jnp.maximum(out, 0.0)
        return out

    def stage_halo(val_2d, pad_ref, cf):
        # interior once + zero only the 1-pixel border strips (every step:
        # scratch is per-core and never zero-initialized).
        pad_ref[1:H + 1, 1:W + 1, :] = val_2d.reshape(H, W, cf)
        z_row = jnp.zeros((1, W + 2, cf), jnp.float32)
        z_col = jnp.zeros((H + 2, 1, cf), jnp.float32)
        pad_ref[0:1, :, :] = z_row
        pad_ref[H + 1:H + 2, :, :] = z_row
        pad_ref[:, 0:1, :] = z_col
        pad_ref[:, W + 1:W + 2, :] = z_col

    def im2col_from_halo(pad_ref, cf):
        # 9 shifted slices of the halo buffer -> taps_ref[:, :9*cf] (bf16)
        for t in range(9):
            di, dj = divmod(t, 3)
            taps_ref[:, t * cf:(t + 1) * cf] = (
                pad_ref[di:di + H, dj:dj + W, :].reshape(HW, cf).astype(bf16))

    # ---- purifier conv1 + ReLU : x -> h ------------------------------------
    for t in range(9):
        di, dj = divmod(t, 3)
        taps_ref[:, t * C:(t + 1) * C] = (
            xpad_ref[0, di:di + H, dj:dj + W, :].reshape(HW, C).astype(bf16))
    h = conv(C, pw1_ref, pb1_ref, relu=True)                 # (HW, Hid) f32

    # ---- purifier conv2 : h -> x_tilde -------------------------------------
    stage_halo(h, hpad_ref, Hid)
    im2col_from_halo(hpad_ref, Hid)
    x_tilde = conv(Hid, pw2_ref, pb2_ref, relu=False)        # (HW, C) f32

    if compute_aux:
        xt_ref[...] = x_tilde.reshape(1, HW, C)
        x_in = xpad_ref[0, 1:H + 1, 1:W + 1, :].reshape(HW, C)
        d = x_tilde - x_in
        sse_ref[0, 0, 0] = jnp.sum(d * d)    # per-image SSE; mean taken outside

    # ---- classifier conv + ReLU -> (pool folded into fc_w) -> head ---------
    stage_halo(x_tilde, xtpad_ref, C)
    im2col_from_halo(xtpad_ref, C)
    f = conv(C, cw1_ref, cb1_ref, relu=True)                 # (HW, Hid) f32

    pooled = jnp.sum(f, axis=0, keepdims=True)               # (1, Hid) f32
    y = jnp.dot(pooled.astype(bf16), fcw_ref[...],
                preferred_element_type=jnp.float32) + fcb_ref[...]
    y_ref[...] = y.reshape(1, 1, -1)


# ------------------------------- JAX wrapper ---------------------------------

def _conv_w(w_oihw):
    """PyTorch conv weight (Cout, Cin, 3, 3) -> (9*Cin, Cout) bf16,
    row index = (kh*3 + kw)*Cin + cin (matches in-kernel tap ordering)."""
    Cout, Cin, KH, KW = w_oihw.shape
    return (jnp.transpose(w_oihw, (2, 3, 1, 0))
            .reshape(KH * KW * Cin, Cout).astype(jnp.bfloat16))


def _rep_spec(shape):
    # whole (tiny) array resident in VMEM; constant index map => fetched once
    return pl.BlockSpec(shape, lambda b: (0,) * len(shape))


def purifier_classifier_forward(x_nchw, params, return_image=False):
    """Mirrors Purifier_Classifier.forward."""
    x = jnp.transpose(x_nchw, (0, 2, 3, 1)).astype(jnp.float32)   # NCHW -> NHWC
    B, H, W, C = x.shape
    Hid = params["p_w1"].shape[0]
    NC = params["fc_w"].shape[1]
    HW = H * W

    xpad = jnp.pad(x, ((0, 0), (1, 1), (1, 1), (0, 0)))           # zero halo

    pw1 = _conv_w(params["p_w1"]); pb1 = params["p_b1"].reshape(1, Hid).astype(jnp.float32)
    pw2 = _conv_w(params["p_w2"]); pb2 = params["p_b2"].reshape(1, C).astype(jnp.float32)
    cw1 = _conv_w(params["c_w1"]); cb1 = params["c_b1"].reshape(1, Hid).astype(jnp.float32)
    fcw = (params["fc_w"] / float(HW)).astype(jnp.bfloat16)       # pool mean folded in
    fcb = params["fc_b"].reshape(1, NC).astype(jnp.float32)

    in_specs = [
        pl.BlockSpec((1, H + 2, W + 2, C), lambda b: (b, 0, 0, 0)),
        _rep_spec(pw1.shape), _rep_spec(pb1.shape),
        _rep_spec(pw2.shape), _rep_spec(pb2.shape),
        _rep_spec(cw1.shape), _rep_spec(cb1.shape),
        _rep_spec(fcw.shape), _rep_spec(fcb.shape),
    ]
    y_spec = pl.BlockSpec((1, 1, NC), lambda b: (b, 0, 0))
    y_shape = jax.ShapeDtypeStruct((B, 1, NC), jnp.float32)

    compute_aux = bool(return_image)
    if compute_aux:
        out_specs = [
            y_spec,
            pl.BlockSpec((1, HW, C), lambda b: (b, 0, 0)),
            pl.BlockSpec((1, 1, 1), lambda b: (b, 0, 0)),
        ]
        out_shape = (
            y_shape,
            jax.ShapeDtypeStruct((B, HW, C), jnp.float32),
            jax.ShapeDtypeStruct((B, 1, 1), jnp.float32),
        )
    else:
        out_specs = y_spec
        out_shape = y_shape

    grid_spec = pltpu.PrefetchScalarGridSpec(
        num_scalar_prefetch=0,
        grid=(B,),                      # one image per step; batch-parallel
        in_specs=in_specs,
        out_specs=out_specs,
        scratch_shapes=[
            pltpu.VMEM((H + 2, W + 2, Hid), jnp.float32),        # halo: h
            pltpu.VMEM((H + 2, W + 2, C), jnp.float32),          # halo: x_tilde
            pltpu.VMEM((HW, 9 * max(C, Hid)), jnp.bfloat16),     # im2col taps
        ],
    )

    out = pl.pallas_call(
        functools.partial(_fused_kernel, H=H, W=W, compute_aux=compute_aux),
        out_shape=out_shape,
        grid_spec=grid_spec,
        compiler_params=pltpu.CompilerParams(
            dimension_semantics=("parallel",),
            vmem_limit_bytes=32 * 1024 * 1024,   # explicit budget (v7x-safe)
        ),
    )(xpad, pw1, pb1, pw2, pb2, cw1, cb1, fcw, fcb)

    if compute_aux:
        y, xt, sse = out
        y_pred = y.reshape(B, NC)
        x_tilde = jnp.transpose(xt.reshape(B, H, W, C), (0, 3, 1, 2))  # -> NCHW
        loss = jnp.sum(sse) / (B * H * W * C)
        return y_pred, x_tilde, loss
    return out.reshape(B, NC)


# --------------------------- pure-JAX f32 reference --------------------------

def _reference_forward(x_nchw, params, return_image=False):
    x = jnp.transpose(x_nchw, (0, 2, 3, 1))
    B, H, W, C = x.shape

    def conv3x3(x_nhwc, w_oihw, bias, relu):
        Cout, Cin = w_oihw.shape[:2]
        xp = jnp.pad(x_nhwc, ((0, 0), (1, 1), (1, 1), (0, 0)))
        cols = jnp.concatenate(
            [xp[:, di:di + H, dj:dj + W, :] for di in range(3) for dj in range(3)],
            axis=-1).reshape(B * H * W, 9 * Cin)
        wmat = jnp.transpose(w_oihw, (2, 3, 1, 0)).reshape(9 * Cin, Cout)
        y = cols @ wmat + bias.reshape(1, Cout)
        if relu:
            y = jnp.maximum(y, 0.0)
        return y.reshape(B, H, W, Cout)

    h = conv3x3(x, params["p_w1"], params["p_b1"], True)
    x_tilde = conv3x3(h, params["p_w2"], params["p_b2"], False)
    loss = jnp.mean((x_tilde - x) ** 2)
    f = conv3x3(x_tilde, params["c_w1"], params["c_b1"], True)
    pooled = jnp.mean(f.reshape(B, H * W, -1), axis=1)
    y_pred = pooled @ params["fc_w"] + params["fc_b"].reshape(1, -1)
    if return_image:
        return y_pred, jnp.transpose(x_tilde, (0, 3, 1, 2)), loss
    return y_pred


def init_params(key, C=4, hidden=8, num_classes=10):
    ks = jax.random.split(key, 8)
    s = 0.1
    return {
        "p_w1": s * jax.random.normal(ks[0], (hidden, C, 3, 3), jnp.float32),
        "p_b1": s * jax.random.normal(ks[1], (hidden,), jnp.float32),
        "p_w2": s * jax.random.normal(ks[2], (C, hidden, 3, 3), jnp.float32),
        "p_b2": s * jax.random.normal(ks[3], (C,), jnp.float32),
        "c_w1": s * jax.random.normal(ks[4], (hidden, C, 3, 3), jnp.float32),
        "c_b1": s * jax.random.normal(ks[5], (hidden,), jnp.float32),
        "fc_w": s * jax.random.normal(ks[6], (hidden, num_classes), jnp.float32),
        "fc_b": s * jax.random.normal(ks[7], (1, num_classes), jnp.float32),
    }


if __name__ == "__main__":
    key = jax.random.PRNGKey(0)
    k_x, k_p = jax.random.split(key)

    B, C, H, W = 2, 4, 16, 16
    x = jax.random.normal(k_x, (B, C, H, W), jnp.float32)   # NCHW like PyTorch
    params = init_params(k_p, C=C, hidden=8, num_classes=10)

    # default path (return_image=False) -> logits only, no aux outputs written
    y_pred = purifier_classifier_forward(x, params, return_image=False)
    y_pred = jax.block_until_ready(y_pred)
    assert y_pred.shape == (B, 10)

    # return_image=True path -> (y_pred, x_tilde, loss)
    y2, x_tilde, loss = purifier_classifier_forward(x, params, return_image=True)
    jax.block_until_ready((y2, x_tilde, loss))
    assert x_tilde.shape == (B, C, H, W)
    assert loss.shape == ()

    # loose numerical check against a pure-JAX f32 reference
    # (kernel uses bf16 MXU operands with f32 accumulation)
    ry, rxt, rloss = _reference_forward(x, params, return_image=True)
    assert jnp.allclose(y2, ry, atol=1e-1, rtol=1e-1)
    assert jnp.allclose(y_pred, ry, atol=1e-1, rtol=1e-1)
    assert jnp.allclose(x_tilde, rxt, atol=1e-1, rtol=1e-1)
    assert jnp.allclose(loss, rloss, atol=1e-1, rtol=1e-1)

    print("KERNEL_OK")
</pallas_src>

<mosaic_0001>
module attributes {stable_mosaic.version = 11 : i64} {
  func.func @_fused_kernel(%arg0: i32, %arg1: memref<1x18x18x4xf32, #tpu.memory_space<vmem>>, %arg2: memref<36x8xbf16, #tpu.memory_space<vmem>>, %arg3: memref<1x8xf32, #tpu.memory_space<vmem>>, %arg4: memref<72x4xbf16, #tpu.memory_space<vmem>>, %arg5: memref<1x4xf32, #tpu.memory_space<vmem>>, %arg6: memref<36x8xbf16, #tpu.memory_space<vmem>>, %arg7: memref<1x8xf32, #tpu.memory_space<vmem>>, %arg8: memref<8x10xbf16, #tpu.memory_space<vmem>>, %arg9: memref<1x10xf32, #tpu.memory_space<vmem>>, %arg10: memref<1x1x10xf32, #tpu.memory_space<vmem>>, %arg11: memref<18x18x8xf32, #tpu.memory_space<vmem>>, %arg12: memref<18x18x4xf32, #tpu.memory_space<vmem>>, %arg13: memref<256x72xbf16, #tpu.memory_space<vmem>>) attributes {dimension_semantics = [#tpu.dimension_semantics<parallel>], iteration_bounds = array<i64: 2>, scalar_prefetch = 0 : i64, scratch_operands = 3 : i64, tpu.core_type = #tpu.core_type<tc>, window_params = [{transform_indices = @transform_0, window_bounds = array<i64: 1, 18, 18, 4>}, {pipeline_mode = #tpu.pipeline_mode<synchronous>, transform_indices = @transform_1, window_bounds = array<i64: 36, 8>}, {pipeline_mode = #tpu.pipeline_mode<synchronous>, transform_indices = @transform_2, window_bounds = array<i64: 1, 8>}, {pipeline_mode = #tpu.pipeline_mode<synchronous>, transform_indices = @transform_3, window_bounds = array<i64: 72, 4>}, {pipeline_mode = #tpu.pipeline_mode<synchronous>, transform_indices = @transform_4, window_bounds = array<i64: 1, 4>}, {pipeline_mode = #tpu.pipeline_mode<synchronous>, transform_indices = @transform_5, window_bounds = array<i64: 36, 8>}, {pipeline_mode = #tpu.pipeline_mode<synchronous>, transform_indices = @transform_6, window_bounds = array<i64: 1, 8>}, {pipeline_mode = #tpu.pipeline_mode<synchronous>, transform_indices = @transform_7, window_bounds = array<i64: 8, 10>}, {pipeline_mode = #tpu.pipeline_mode<synchronous>, transform_indices = @transform_8, window_bounds = array<i64: 1, 10>}, {transform_indices = @transform_9, window_bounds = array<i64: 1, 1, 10>}]} {
    %c0 = arith.constant 0 : index
    %c0_0 = arith.constant 0 : index
    %c0_1 = arith.constant 0 : index
    %c0_2 = arith.constant 0 : index
    %0 = vector.load %arg1[%c0, %c0_0, %c0_1, %c0_2] : memref<1x18x18x4xf32, #tpu.memory_space<vmem>>, vector<1x16x16x4xf32>
    %1 = vector.shape_cast %0 : vector<1x16x16x4xf32> to vector<16x16x4xf32>
    %2 = vector.shape_cast %1 : vector<16x16x4xf32> to vector<256x4xf32>
    %3 = arith.truncf %2 : vector<256x4xf32> to vector<256x4xbf16>
    %c0_3 = arith.constant 0 : index
    %c0_4 = arith.constant 0 : index
    %4 = vector.load %arg13[%c0_3, %c0_4] : memref<256x72xbf16, #tpu.memory_space<vmem>>, vector<256x4xbf16>
    tpu.vector_store %arg13[%c0_3, %c0_4], %3 {strides = array<i32>} : memref<256x72xbf16, #tpu.memory_space<vmem>>, vector<256x4xbf16>,
    %c0_5 = arith.constant 0 : index
    %c0_6 = arith.constant 0 : index
    %c1 = arith.constant 1 : index
    %c0_7 = arith.constant 0 : index
    %5 = vector.load %arg1[%c0_5, %c0_6, %c1, %c0_7] : memref<1x18x18x4xf32, #tpu.memory_space<vmem>>, vector<1x16x16x4xf32>
    %6 = vector.shape_cast %5 : vector<1x16x16x4xf32> to vector<16x16x4xf32>
    %7 = vector.shape_cast %6 : vector<16x16x4xf32> to vector<256x4xf32>
    %8 = arith.truncf %7 : vector<256x4xf32> to vector<256x4xbf16>
    %c0_8 = arith.constant 0 : index
    %c4 = arith.constant 4 : index
    %9 = vector.load %arg13[%c0_8, %c4] : memref<256x72xbf16, #tpu.memory_space<vmem>>, vector<256x4xbf16>
    tpu.vector_store %arg13[%c0_8, %c4], %8 {strides = array<i32>} : memref<256x72xbf16, #tpu.memory_space<vmem>>, vector<256x4xbf16>,
    %c0_9 = arith.constant 0 : index
    %c0_10 = arith.constant 0 : index
    %c2 = arith.constant 2 : index
    %c0_11 = arith.constant 0 : index
    %10 = vector.load %arg1[%c0_9, %c0_10, %c2, %c0_11] : memref<1x18x18x4xf32, #tpu.memory_space<vmem>>, vector<1x16x16x4xf32>
    %11 = vector.shape_cast %10 : vector<1x16x16x4xf32> to vector<16x16x4xf32>
    %12 = vector.shape_cast %11 : vector<16x16x4xf32> to vector<256x4xf32>
    %13 = arith.truncf %12 : vector<256x4xf32> to vector<256x4xbf16>
    %c0_12 = arith.constant 0 : index
    %c8 = arith.constant 8 : index
    %14 = vector.load %arg13[%c0_12, %c8] : memref<256x72xbf16, #tpu.memory_space<vmem>>, vector<256x4xbf16>
    tpu.vector_store %arg13[%c0_12, %c8], %13 {strides = array<i32>} : memref<256x72xbf16, #tpu.memory_space<vmem>>, vector<256x4xbf16>,
    %c0_13 = arith.constant 0 : index
    %c1_14 = arith.constant 1 : index
    %c0_15 = arith.constant 0 : index
    %c0_16 = arith.constant 0 : index
    %15 = vector.load %arg1[%c0_13, %c1_14, %c0_15, %c0_16] : memref<1x18x18x4xf32, #tpu.memory_space<vmem>>, vector<1x16x16x4xf32>
    %16 = vector.shape_cast %15 : vector<1x16x16x4xf32> to vector<16x16x4xf32>
    %17 = vector.shape_cast %16 : vector<16x16x4xf32> to vector<256x4xf32>
    %18 = arith.truncf %17 : vector<256x4xf32> to vector<256x4xbf16>
    %c0_17 = arith.constant 0 : index
    %c12 = arith.constant 12 : index
    %19 = vector.load %arg13[%c0_17, %c12] : memref<256x72xbf16, #tpu.memory_space<vmem>>, vector<256x4xbf16>
    tpu.vector_store %arg13[%c0_17, %c12], %18 {strides = array<i32>} : memref<256x72xbf16, #tpu.memory_space<vmem>>, vector<256x4xbf16>,
    %c0_18 = arith.constant 0 : index
    %c1_19 = arith.constant 1 : index
    %c1_20 = arith.constant 1 : index
    %c0_21 = arith.constant 0 : index
    %20 = vector.load %arg1[%c0_18, %c1_19, %c1_20, %c0_21] : memref<1x18x18x4xf32, #tpu.memory_space<vmem>>, vector<1x16x16x4xf32>
    %21 = vector.shape_cast %20 : vector<1x16x16x4xf32> to vector<16x16x4xf32>
    %22 = vector.shape_cast %21 : vector<16x16x4xf32> to vector<256x4xf32>
    %23 = arith.truncf %22 : vector<256x4xf32> to vector<256x4xbf16>
    %c0_22 = arith.constant 0 : index
    %c16 = arith.constant 16 : index
    %24 = vector.load %arg13[%c0_22, %c16] : memref<256x72xbf16, #tpu.memory_space<vmem>>, vector<256x4xbf16>
    tpu.vector_store %arg13[%c0_22, %c16], %23 {strides = array<i32>} : memref<256x72xbf16, #tpu.memory_space<vmem>>, vector<256x4xbf16>,
    %c0_23 = arith.constant 0 : index
    %c1_24 = arith.constant 1 : index
    %c2_25 = arith.constant 2 : index
    %c0_26 = arith.constant 0 : index
    %25 = vector.load %arg1[%c0_23, %c1_24, %c2_25, %c0_26] : memref<1x18x18x4xf32, #tpu.memory_space<vmem>>, vector<1x16x16x4xf32>
    %26 = vector.shape_cast %25 : vector<1x16x16x4xf32> to vector<16x16x4xf32>
    %27 = vector.shape_cast %26 : vector<16x16x4xf32> to vector<256x4xf32>
    %28 = arith.truncf %27 : vector<256x4xf32> to vector<256x4xbf16>
    %c0_27 = arith.constant 0 : index
    %c20 = arith.constant 20 : index
    %29 = vector.load %arg13[%c0_27, %c20] : memref<256x72xbf16, #tpu.memory_space<vmem>>, vector<256x4xbf16>
    tpu.vector_store %arg13[%c0_27, %c20], %28 {strides = array<i32>} : memref<256x72xbf16, #tpu.memory_space<vmem>>, vector<256x4xbf16>,
    %c0_28 = arith.constant 0 : index
    %c2_29 = arith.constant 2 : index
    %c0_30 = arith.constant 0 : index
    %c0_31 = arith.constant 0 : index
    %30 = vector.load %arg1[%c0_28, %c2_29, %c0_30, %c0_31] : memref<1x18x18x4xf32, #tpu.memory_space<vmem>>, vector<1x16x16x4xf32>
    %31 = vector.shape_cast %30 : vector<1x16x16x4xf32> to vector<16x16x4xf32>
    %32 = vector.shape_cast %31 : vector<16x16x4xf32> to vector<256x4xf32>
    %33 = arith.truncf %32 : vector<256x4xf32> to vector<256x4xbf16>
    %c0_32 = arith.constant 0 : index
    %c24 = arith.constant 24 : index
    %34 = vector.load %arg13[%c0_32, %c24] : memref<256x72xbf16, #tpu.memory_space<vmem>>, vector<256x4xbf16>
    tpu.vector_store %arg13[%c0_32, %c24], %33 {strides = array<i32>} : memref<256x72xbf16, #tpu.memory_space<vmem>>, vector<256x4xbf16>,
    %c0_33 = arith.constant 0 : index
    %c2_34 = arith.constant 2 : index
    %c1_35 = arith.constant 1 : index
    %c0_36 = arith.constant 0 : index
    %35 = vector.load %arg1[%c0_33, %c2_34, %c1_35, %c0_36] : memref<1x18x18x4xf32, #tpu.memory_space<vmem>>, vector<1x16x16x4xf32>
    %36 = vector.shape_cast %35 : vector<1x16x16x4xf32> to vector<16x16x4xf32>
    %37 = vector.shape_cast %36 : vector<16x16x4xf32> to vector<256x4xf32>
    %38 = arith.truncf %37 : vector<256x4xf32> to vector<256x4xbf16>
    %c0_37 = arith.constant 0 : index
    %c28 = arith.constant 28 : index
    %39 = vector.load %arg13[%c0_37, %c28] : memref<256x72xbf16, #tpu.memory_space<vmem>>, vector<256x4xbf16>
    tpu.vector_store %arg13[%c0_37, %c28], %38 {strides = array<i32>} : memref<256x72xbf16, #tpu.memory_space<vmem>>, vector<256x4xbf16>,
    %c0_38 = arith.constant 0 : index
    %c2_39 = arith.constant 2 : index
    %c2_40 = arith.constant 2 : index
    %c0_41 = arith.constant 0 : index
    %40 = vector.load %arg1[%c0_38, %c2_39, %c2_40, %c0_41] : memref<1x18x18x4xf32, #tpu.memory_space<vmem>>, vector<1x16x16x4xf32>
    %41 = vector.shape_cast %40 : vector<1x16x16x4xf32> to vector<16x16x4xf32>
    %42 = vector.shape_cast %41 : vector<16x16x4xf32> to vector<256x4xf32>
    %43 = arith.truncf %42 : vector<256x4xf32> to vector<256x4xbf16>
    %c0_42 = arith.constant 0 : index
    %c32 = arith.constant 32 : index
    %44 = vector.load %arg13[%c0_42, %c32] : memref<256x72xbf16, #tpu.memory_space<vmem>>, vector<256x4xbf16>
    tpu.vector_store %arg13[%c0_42, %c32], %43 {strides = array<i32>} : memref<256x72xbf16, #tpu.memory_space<vmem>>, vector<256x4xbf16>,
    %c0_43 = arith.constant 0 : index
    %c0_44 = arith.constant 0 : index
    %45 = vector.load %arg13[%c0_43, %c0_44] : memref<256x72xbf16, #tpu.memory_space<vmem>>, vector<256x36xbf16>
    %c0_45 = arith.constant 0 : index
    %c0_46 = arith.constant 0 : index
    %46 = vector.load %arg2[%c0_45, %c0_46] : memref<36x8xbf16, #tpu.memory_space<vmem>>, vector<36x8xbf16>
    %cst = arith.constant dense<0.000000e+00> : vector<256x8xf32>
    %47 = tpu.matmul %45, %46, %cst {dimension_numbers = #tpu.dot_dimension_numbers<[1], [0], [0], [1], [0, 0, 1, 1], [], []>} : vector<256x36xbf16>, vector<36x8xbf16>, vector<256x8xf32> -> vector<256x8xf32>
    %c0_47 = arith.constant 0 : index
    %c0_48 = arith.constant 0 : index
    %48 = vector.load %arg3[%c0_47, %c0_48] : memref<1x8xf32, #tpu.memory_space<vmem>>, vector<1x8xf32>
    %49 = vector.broadcast %48 : vector<1x8xf32> to vector<256x8xf32>
    %50 = arith.addf %47, %49 : vector<256x8xf32>
    %cst_49 = arith.constant 0.000000e+00 : f32
    %51 = vector.broadcast %cst_49 : f32 to vector<256x8xf32>
    %52 = arith.maximumf %50, %51 : vector<256x8xf32>
    %53 = vector.shape_cast %52 : vector<256x8xf32> to vector<16x16x8xf32>
    %c1_50 = arith.constant 1 : index
    %c1_51 = arith.constant 1 : index
    %c0_52 = arith.constant 0 : index
    %54 = vector.load %arg11[%c1_50, %c1_51, %c0_52] : memref<18x18x8xf32, #tpu.memory_space<vmem>>, vector<16x16x8xf32>
    tpu.vector_store %arg11[%c1_50, %c1_51, %c0_52], %53 {strides = array<i32>} : memref<18x18x8xf32, #tpu.memory_space<vmem>>, vector<16x16x8xf32>,
    %cst_53 = arith.constant 0.000000e+00 : f32
    %55 = vector.broadcast %cst_53 : f32 to vector<1x18x8xf32>
    %cst_54 = arith.constant 0.000000e+00 : f32
    %56 = vector.broadcast %cst_54 : f32 to vector<18x1x8xf32>
    %c0_55 = arith.constant 0 : index
    %c0_56 = arith.constant 0 : index
    %c0_57 = arith.constant 0 : index
    %57 = vector.load %arg11[%c0_55, %c0_56, %c0_57] : memref<18x18x8xf32, #tpu.memory_space<vmem>>, vector<1x18x8xf32>
    tpu.vector_store %arg11[%c0_55, %c0_56, %c0_57], %55 {strides = array<i32>} : memref<18x18x8xf32, #tpu.memory_space<vmem>>, vector<1x18x8xf32>,
    %c17 = arith.constant 17 : index
    %c0_58 = arith.constant 0 : index
    %c0_59 = arith.constant 0 : index
    %58 = vector.load %arg11[%c17, %c0_58, %c0_59] : memref<18x18x8xf32, #tpu.memory_space<vmem>>, vector<1x18x8xf32>
    tpu.vector_store %arg11[%c17, %c0_58, %c0_59], %55 {strides = array<i32>} : memref<18x18x8xf32, #tpu.memory_space<vmem>>, vector<1x18x8xf32>,
    %c0_60 = arith.constant 0 : index
    %c0_61 = arith.constant 0 : index
    %c0_62 = arith.constant 0 : index
    %59 = vector.load %arg11[%c0_60, %c0_61, %c0_62] : memref<18x18x8xf32, #tpu.memory_space<vmem>>, vector<18x1x8xf32>
    tpu.vector_store %arg11[%c0_60, %c0_61, %c0_62], %56 {strides = array<i32>} : memref<18x18x8xf32, #tpu.memory_space<vmem>>, vector<18x1x8xf32>,
    %c0_63 = arith.constant 0 : index
    %c17_64 = arith.constant 17 : index
    %c0_65 = arith.constant 0 : index
    %60 = vector.load %arg11[%c0_63, %c17_64, %c0_65] : memref<18x18x8xf32, #tpu.memory_space<vmem>>, vector<18x1x8xf32>
    tpu.vector_store %arg11[%c0_63, %c17_64, %c0_65], %56 {strides = array<i32>} : memref<18x18x8xf32, #tpu.memory_space<vmem>>, vector<18x1x8xf32>,
    %c0_66 = arith.constant 0 : index
    %c0_67 = arith.constant 0 : index
    %c0_68 = arith.constant 0 : index
    %61 = vector.load %arg11[%c0_66, %c0_67, %c0_68] : memref<18x18x8xf32, #tpu.memory_space<vmem>>, vector<16x16x8xf32>
    %62 = vector.shape_cast %61 : vector<16x16x8xf32> to vector<256x8xf32>
    %63 = arith.truncf %62 : vector<256x8xf32> to vector<256x8xbf16>
    %c0_69 = arith.constant 0 : index
    %c0_70 = arith.constant 0 : index
    %64 = vector.load %arg13[%c0_69, %c0_70] : memref<256x72xbf16, #tpu.memory_space<vmem>>, vector<256x8xbf16>
    tpu.vector_store %arg13[%c0_69, %c0_70], %63 {strides = array<i32>} : memref<256x72xbf16, #tpu.memory_space<vmem>>, vector<256x8xbf16>,
    %c0_71 = arith.constant 0 : index
    %c1_72 = arith.constant 1 : index
    %c0_73 = arith.constant 0 : index
    %65 = vector.load %arg11[%c0_71, %c1_72, %c0_73] : memref<18x18x8xf32, #tpu.memory_space<vmem>>, vector<16x16x8xf32>
    %66 = vector.shape_cast %65 : vector<16x16x8xf32> to vector<256x8xf32>
    %67 = arith.truncf %66 : vector<256x8xf32> to vector<256x8xbf16>
    %c0_74 = arith.constant 0 : index
    %c8_75 = arith.constant 8 : index
    %68 = vector.load %arg13[%c0_74, %c8_75] : memref<256x72xbf16, #tpu.memory_space<vmem>>, vector<256x8xbf16>
    tpu.vector_store %arg13[%c0_74, %c8_75], %67 {strides = array<i32>} : memref<256x72xbf16, #tpu.memory_space<vmem>>, vector<256x8xbf16>,
    %c0_76 = arith.constant 0 : index
    %c2_77 = arith.constant 2 : index
    %c0_78 = arith.constant 0 : index
    %69 = vector.load %arg11[%c0_76, %c2_77, %c0_78] : memref<18x18x8xf32, #tpu.memory_space<vmem>>, vector<16x16x8xf32>
    %70 = vector.shape_cast %69 : vector<16x16x8xf32> to vector<256x8xf32>
    %71 = arith.truncf %70 : vector<256x8xf32> to vector<256x8xbf16>
    %c0_79 = arith.constant 0 : index
    %c16_80 = arith.constant 16 : index
    %72 = vector.load %arg13[%c0_79, %c16_80] : memref<256x72xbf16, #tpu.memory_space<vmem>>, vector<256x8xbf16>
    tpu.vector_store %arg13[%c0_79, %c16_80], %71 {strides = array<i32>} : memref<256x72xbf16, #tpu.memory_space<vmem>>, vector<256x8xbf16>,
    %c1_81 = arith.constant 1 : index
    %c0_82 = arith.constant 0 : index
    %c0_83 = arith.constant 0 : index
    %73 = vector.load %arg11[%c1_81, %c0_82, %c0_83] : memref<18x18x8xf32, #tpu.memory_space<vmem>>, vector<16x16x8xf32>
    %74 = vector.shape_cast %73 : vector<16x16x8xf32> to vector<256x8xf32>
    %75 = arith.truncf %74 : vector<256x8xf32> to vector<256x8xbf16>
    %c0_84 = arith.constant 0 : index
    %c24_85 = arith.constant 24 : index
    %76 = vector.load %arg13[%c0_84, %c24_85] : memref<256x72xbf16, #tpu.memory_space<vmem>>, vector<256x8xbf16>
    tpu.vector_store %arg13[%c0_84, %c24_85], %75 {strides = array<i32>} : memref<256x72xbf16, #tpu.memory_space<vmem>>, vector<256x8xbf16>,
    %c1_86 = arith.constant 1 : index
    %c1_87 = arith.constant 1 : index
    %c0_88 = arith.constant 0 : index
    %77 = vector.load %arg11[%c1_86, %c1_87, %c0_88] : memref<18x18x8xf32, #tpu.memory_space<vmem>>, vector<16x16x8xf32>
    %78 = vector.shape_cast %77 : vector<16x16x8xf32> to vector<256x8xf32>
    %79 = arith.truncf %78 : vector<256x8xf32> to vector<256x8xbf16>
    %c0_89 = arith.constant 0 : index
    %c32_90 = arith.constant 32 : index
    %80 = vector.load %arg13[%c0_89, %c32_90] : memref<256x72xbf16, #tpu.memory_space<vmem>>, vector<256x8xbf16>
    tpu.vector_store %arg13[%c0_89, %c32_90], %79 {strides = array<i32>} : memref<256x72xbf16, #tpu.memory_space<vmem>>, vector<256x8xbf16>,
    %c1_91 = arith.constant 1 : index
    %c2_92 = arith.constant 2 : index
    %c0_93 = arith.constant 0 : index
    %81 = vector.load %arg11[%c1_91, %c2_92, %c0_93] : memref<18x18x8xf32, #tpu.memory_space<vmem>>, vector<16x16x8xf32>
    %82 = vector.shape_cast %81 : vector<16x16x8xf32> to vector<256x8xf32>
    %83 = arith.truncf %82 : vector<256x8xf32> to vector<256x8xbf16>
    %c0_94 = arith.constant 0 : index
    %c40 = arith.constant 40 : index
    %84 = vector.load %arg13[%c0_94, %c40] : memref<256x72xbf16, #tpu.memory_space<vmem>>, vector<256x8xbf16>
    tpu.vector_store %arg13[%c0_94, %c40], %83 {strides = array<i32>} : memref<256x72xbf16, #tpu.memory_space<vmem>>, vector<256x8xbf16>,
    %c2_95 = arith.constant 2 : index
    %c0_96 = arith.constant 0 : index
    %c0_97 = arith.constant 0 : index
    %85 = vector.load %arg11[%c2_95, %c0_96, %c0_97] : memref<18x18x8xf32, #tpu.memory_space<vmem>>, vector<16x16x8xf32>
    %86 = vector.shape_cast %85 : vector<16x16x8xf32> to vector<256x8xf32>
    %87 = arith.truncf %86 : vector<256x8xf32> to vector<256x8xbf16>
    %c0_98 = arith.constant 0 : index
    %c48 = arith.constant 48 : index
    %88 = vector.load %arg13[%c0_98, %c48] : memref<256x72xbf16, #tpu.memory_space<vmem>>, vector<256x8xbf16>
    tpu.vector_store %arg13[%c0_98, %c48], %87 {strides = array<i32>} : memref<256x72xbf16, #tpu.memory_space<vmem>>, vector<256x8xbf16>,
    %c2_99 = arith.constant 2 : index
    %c1_100 = arith.constant 1 : index
    %c0_101 = arith.constant 0 : index
    %89 = vector.load %arg11[%c2_99, %c1_100, %c0_101] : memref<18x18x8xf32, #tpu.memory_space<vmem>>, vector<16x16x8xf32>
    %90 = vector.shape_cast %89 : vector<16x16x8xf32> to vector<256x8xf32>
    %91 = arith.truncf %90 : vector<256x8xf32> to vector<256x8xbf16>
    %c0_102 = arith.constant 0 : index
    %c56 = arith.constant 56 : index
    %92 = vector.load %arg13[%c0_102, %c56] : memref<256x72xbf16, #tpu.memory_space<vmem>>, vector<256x8xbf16>
    tpu.vector_store %arg13[%c0_102, %c56], %91 {strides = array<i32>} : memref<256x72xbf16, #tpu.memory_space<vmem>>, vector<256x8xbf16>,
    %c2_103 = arith.constant 2 : index
    %c2_104 = arith.constant 2 : index
    %c0_105 = arith.constant 0 : index
    %93 = vector.load %arg11[%c2_103, %c2_104, %c0_105] : memref<18x18x8xf32, #tpu.memory_space<vmem>>, vector<16x16x8xf32>
    %94 = vector.shape_cast %93 : vector<16x16x8xf32> to vector<256x8xf32>
    %95 = arith.truncf %94 : vector<256x8xf32> to vector<256x8xbf16>
    %c0_106 = arith.constant 0 : index
    %c64 = arith.constant 64 : index
    %96 = vector.load %arg13[%c0_106, %c64] : memref<256x72xbf16, #tpu.memory_space<vmem>>, vector<256x8xbf16>
    tpu.vector_store %arg13[%c0_106, %c64], %95 {strides = array<i32>} : memref<256x72xbf16, #tpu.memory_space<vmem>>, vector<256x8xbf16>,
    %c0_107 = arith.constant 0 : index
    %c0_108 = arith.constant 0 : index
    %97 = vector.load %arg13[%c0_107, %c0_108] : memref<256x72xbf16, #tpu.memory_space<vmem>>, vector<256x72xbf16>
    %c0_109 = arith.constant 0 : index
    %c0_110 = arith.constant 0 : index
    %98 = vector.load %arg4[%c0_109, %c0_110] : memref<72x4xbf16, #tpu.memory_space<vmem>>, vector<72x4xbf16>
    %cst_111 = arith.constant dense<0.000000e+00> : vector<256x4xf32>
    %99 = tpu.matmul %97, %98, %cst_111 {dimension_numbers = #tpu.dot_dimension_numbers<[1], [0], [0], [1], [0, 0, 1, 1], [], []>} : vector<256x72xbf16>, vector<72x4xbf16>, vector<256x4xf32> -> vector<256x4xf32>
    %c0_112 = arith.constant 0 : index
    %c0_113 = arith.constant 0 : index
    %100 = vector.load %arg5[%c0_112, %c0_113] : memref<1x4xf32, #tpu.memory_space<vmem>>, vector<1x4xf32>
    %101 = vector.broadcast %100 : vector<1x4xf32> to vector<256x4xf32>
    %102 = arith.addf %99, %101 : vector<256x4xf32>
    %103 = vector.shape_cast %102 : vector<256x4xf32> to vector<16x16x4xf32>
    %c1_114 = arith.constant 1 : index
    %c1_115 = arith.constant 1 : index
    %c0_116 = arith.constant 0 : index
    %104 = vector.load %arg12[%c1_114, %c1_115, %c0_116] : memref<18x18x4xf32, #tpu.memory_space<vmem>>, vector<16x16x4xf32>
    tpu.vector_store %arg12[%c1_114, %c1_115, %c0_116], %103 {strides = array<i32>} : memref<18x18x4xf32, #tpu.memory_space<vmem>>, vector<16x16x4xf32>,
    %cst_117 = arith.constant 0.000000e+00 : f32
    %105 = vector.broadcast %cst_117 : f32 to vector<1x18x4xf32>
    %cst_118 = arith.constant 0.000000e+00 : f32
    %106 = vector.broadcast %cst_118 : f32 to vector<18x1x4xf32>
    %c0_119 = arith.constant 0 : index
    %c0_120 = arith.constant 0 : index
    %c0_121 = arith.constant 0 : index
    %107 = vector.load %arg12[%c0_119, %c0_120, %c0_121] : memref<18x18x4xf32, #tpu.memory_space<vmem>>, vector<1x18x4xf32>
    tpu.vector_store %arg12[%c0_119, %c0_120, %c0_121], %105 {strides = array<i32>} : memref<18x18x4xf32, #tpu.memory_space<vmem>>, vector<1x18x4xf32>,
    %c17_122 = arith.constant 17 : index
    %c0_123 = arith.constant 0 : index
    %c0_124 = arith.constant 0 : index
    %108 = vector.load %arg12[%c17_122, %c0_123, %c0_124] : memref<18x18x4xf32, #tpu.memory_space<vmem>>, vector<1x18x4xf32>
    tpu.vector_store %arg12[%c17_122, %c0_123, %c0_124], %105 {strides = array<i32>} : memref<18x18x4xf32, #tpu.memory_space<vmem>>, vector<1x18x4xf32>,
    %c0_125 = arith.constant 0 : index
    %c0_126 = arith.constant 0 : index
    %c0_127 = arith.constant 0 : index
    %109 = vector.load %arg12[%c0_125, %c0_126, %c0_127] : memref<18x18x4xf32, #tpu.memory_space<vmem>>, vector<18x1x4xf32>
    tpu.vector_store %arg12[%c0_125, %c0_126, %c0_127], %106 {strides = array<i32>} : memref<18x18x4xf32, #tpu.memory_space<vmem>>, vector<18x1x4xf32>,
    %c0_128 = arith.constant 0 : index
    %c17_129 = arith.constant 17 : index
    %c0_130 = arith.constant 0 : index
    %110 = vector.load %arg12[%c0_128, %c17_129, %c0_130] : memref<18x18x4xf32, #tpu.memory_space<vmem>>, vector<18x1x4xf32>
    tpu.vector_store %arg12[%c0_128, %c17_129, %c0_130], %106 {strides = array<i32>} : memref<18x18x4xf32, #tpu.memory_space<vmem>>, vector<18x1x4xf32>,
    %c0_131 = arith.constant 0 : index
    %c0_132 = arith.constant 0 : index
    %c0_133 = arith.constant 0 : index
    %111 = vector.load %arg12[%c0_131, %c0_132, %c0_133] : memref<18x18x4xf32, #tpu.memory_space<vmem>>, vector<16x16x4xf32>
    %112 = vector.shape_cast %111 : vector<16x16x4xf32> to vector<256x4xf32>
    %113 = arith.truncf %112 : vector<256x4xf32> to vector<256x4xbf16>
    %c0_134 = arith.constant 0 : index
    %c0_135 = arith.constant 0 : index
    %114 = vector.load %arg13[%c0_134, %c0_135] : memref<256x72xbf16, #tpu.memory_space<vmem>>, vector<256x4xbf16>
    tpu.vector_store %arg13[%c0_134, %c0_135], %113 {strides = array<i32>} : memref<256x72xbf16, #tpu.memory_space<vmem>>, vector<256x4xbf16>,
    %c0_136 = arith.constant 0 : index
    %c1_137 = arith.constant 1 : index
    %c0_138 = arith.constant 0 : index
    %115 = vector.load %arg12[%c0_136, %c1_137, %c0_138] : memref<18x18x4xf32, #tpu.memory_space<vmem>>, vector<16x16x4xf32>
    %116 = vector.shape_cast %115 : vector<16x16x4xf32> to vector<256x4xf32>
    %117 = arith.truncf %116 : vector<256x4xf32> to vector<256x4xbf16>
    %c0_139 = arith.constant 0 : index
    %c4_140 = arith.constant 4 : index
    %118 = vector.load %arg13[%c0_139, %c4_140] : memref<256x72xbf16, #tpu.memory_space<vmem>>, vector<256x4xbf16>
    tpu.vector_store %arg13[%c0_139, %c4_140], %117 {strides = array<i32>} : memref<256x72xbf16, #tpu.memory_space<vmem>>, vector<256x4xbf16>,
    %c0_141 = arith.constant 0 : index
    %c2_142 = arith.constant 2 : index
    %c0_143 = arith.constant 0 : index
    %119 = vector.load %arg12[%c0_141, %c2_142, %c0_143] : memref<18x18x4xf32, #tpu.memory_space<vmem>>, vector<16x16x4xf32>
    %120 = vector.shape_cast %119 : vector<16x16x4xf32> to vector<256x4xf32>
    %121 = arith.truncf %120 : vector<256x4xf32> to vector<256x4xbf16>
    %c0_144 = arith.constant 0 : index
    %c8_145 = arith.constant 8 : index
    %122 = vector.load %arg13[%c0_144, %c8_145] : memref<256x72xbf16, #tpu.memory_space<vmem>>, vector<256x4xbf16>
    tpu.vector_store %arg13[%c0_144, %c8_145], %121 {strides = array<i32>} : memref<256x72xbf16, #tpu.memory_space<vmem>>, vector<256x4xbf16>,
    %c1_146 = arith.constant 1 : index
    %c0_147 = arith.constant 0 : index
    %c0_148 = arith.constant 0 : index
    %123 = vector.load %arg12[%c1_146, %c0_147, %c0_148] : memref<18x18x4xf32, #tpu.memory_space<vmem>>, vector<16x16x4xf32>
    %124 = vector.shape_cast %123 : vector<16x16x4xf32> to vector<256x4xf32>
    %125 = arith.truncf %124 : vector<256x4xf32> to vector<256x4xbf16>
    %c0_149 = arith.constant 0 : index
    %c12_150 = arith.constant 12 : index
    %126 = vector.load %arg13[%c0_149, %c12_150] : memref<256x72xbf16, #tpu.memory_space<vmem>>, vector<256x4xbf16>
    tpu.vector_store %arg13[%c0_149, %c12_150], %125 {strides = array<i32>} : memref<256x72xbf16, #tpu.memory_space<vmem>>, vector<256x4xbf16>,
    %c1_151 = arith.constant 1 : index
    %c1_152 = arith.constant 1 : index
    %c0_153 = arith.constant 0 : index
    %127 = vector.load %arg12[%c1_151, %c1_152, %c0_153] : memref<18x18x4xf32, #tpu.memory_space<vmem>>, vector<16x16x4xf32>
    %128 = vector.shape_cast %127 : vector<16x16x4xf32> to vector<256x4xf32>
    %129 = arith.truncf %128 : vector<256x4xf32> to vector<256x4xbf16>
    %c0_154 = arith.constant 0 : index
    %c16_155 = arith.constant 16 : index
    %130 = vector.load %arg13[%c0_154, %c16_155] : memref<256x72xbf16, #tpu.memory_space<vmem>>, vector<256x4xbf16>
    tpu.vector_store %arg13[%c0_154, %c16_155], %129 {strides = array<i32>} : memref<256x72xbf16, #tpu.memory_space<vmem>>, vector<256x4xbf16>,
    %c1_156 = arith.constant 1 : index
    %c2_157 = arith.constant 2 : index
    %c0_158 = arith.constant 0 : index
    %131 = vector.load %arg12[%c1_156, %c2_157, %c0_158] : memref<18x18x4xf32, #tpu.memory_space<vmem>>, vector<16x16x4xf32>
    %132 = vector.shape_cast %131 : vector<16x16x4xf32> to vector<256x4xf32>
    %133 = arith.truncf %132 : vector<256x4xf32> to vector<256x4xbf16>
    %c0_159 = arith.constant 0 : index
    %c20_160 = arith.constant 20 : index
    %134 = vector.load %arg13[%c0_159, %c20_160] : memref<256x72xbf16, #tpu.memory_space<vmem>>, vector<256x4xbf16>
    tpu.vector_store %arg13[%c0_159, %c20_160], %133 {strides = array<i32>} : memref<256x72xbf16, #tpu.memory_space<vmem>>, vector<256x4xbf16>,
    %c2_161 = arith.constant 2 : index
    %c0_162 = arith.constant 0 : index
    %c0_163 = arith.constant 0 : index
    %135 = vector.load %arg12[%c2_161, %c0_162, %c0_163] : memref<18x18x4xf32, #tpu.memory_space<vmem>>, vector<16x16x4xf32>
    %136 = vector.shape_cast %135 : vector<16x16x4xf32> to vector<256x4xf32>
    %137 = arith.truncf %136 : vector<256x4xf32> to vector<256x4xbf16>
    %c0_164 = arith.constant 0 : index
    %c24_165 = arith.constant 24 : index
    %138 = vector.load %arg13[%c0_164, %c24_165] : memref<256x72xbf16, #tpu.memory_space<vmem>>, vector<256x4xbf16>
    tpu.vector_store %arg13[%c0_164, %c24_165], %137 {strides = array<i32>} : memref<256x72xbf16, #tpu.memory_space<vmem>>, vector<256x4xbf16>,
    %c2_166 = arith.constant 2 : index
    %c1_167 = arith.constant 1 : index
    %c0_168 = arith.constant 0 : index
    %139 = vector.load %arg12[%c2_166, %c1_167, %c0_168] : memref<18x18x4xf32, #tpu.memory_space<vmem>>, vector<16x16x4xf32>
    %140 = vector.shape_cast %139 : vector<16x16x4xf32> to vector<256x4xf32>
    %141 = arith.truncf %140 : vector<256x4xf32> to vector<256x4xbf16>
    %c0_169 = arith.constant 0 : index
    %c28_170 = arith.constant 28 : index
    %142 = vector.load %arg13[%c0_169, %c28_170] : memref<256x72xbf16, #tpu.memory_space<vmem>>, vector<256x4xbf16>
    tpu.vector_store %arg13[%c0_169, %c28_170], %141 {strides = array<i32>} : memref<256x72xbf16, #tpu.memory_space<vmem>>, vector<256x4xbf16>,
    %c2_171 = arith.constant 2 : index
    %c2_172 = arith.constant 2 : index
    %c0_173 = arith.constant 0 : index
    %143 = vector.load %arg12[%c2_171, %c2_172, %c0_173] : memref<18x18x4xf32, #tpu.memory_space<vmem>>, vector<16x16x4xf32>
    %144 = vector.shape_cast %143 : vector<16x16x4xf32> to vector<256x4xf32>
    %145 = arith.truncf %144 : vector<256x4xf32> to vector<256x4xbf16>
    %c0_174 = arith.constant 0 : index
    %c32_175 = arith.constant 32 : index
    %146 = vector.load %arg13[%c0_174, %c32_175] : memref<256x72xbf16, #tpu.memory_space<vmem>>, vector<256x4xbf16>
    tpu.vector_store %arg13[%c0_174, %c32_175], %145 {strides = array<i32>} : memref<256x72xbf16, #tpu.memory_space<vmem>>, vector<256x4xbf16>,
    %c0_176 = arith.constant 0 : index
    %c0_177 = arith.constant 0 : index
    %147 = vector.load %arg13[%c0_176, %c0_177] : memref<256x72xbf16, #tpu.memory_space<vmem>>, vector<256x36xbf16>
    %c0_178 = arith.constant 0 : index
    %c0_179 = arith.constant 0 : index
    %148 = vector.load %arg6[%c0_178, %c0_179] : memref<36x8xbf16, #tpu.memory_space<vmem>>, vector<36x8xbf16>
    %cst_180 = arith.constant dense<0.000000e+00> : vector<256x8xf32>
    %149 = tpu.matmul %147, %148, %cst_180 {dimension_numbers = #tpu.dot_dimension_numbers<[1], [0], [0], [1], [0, 0, 1, 1], [], []>} : vector<256x36xbf16>, vector<36x8xbf16>, vector<256x8xf32> -> vector<256x8xf32>
    %c0_181 = arith.constant 0 : index
    %c0_182 = arith.constant 0 : index
    %150 = vector.load %arg7[%c0_181, %c0_182] : memref<1x8xf32, #tpu.memory_space<vmem>>, vector<1x8xf32>
    %151 = vector.broadcast %150 : vector<1x8xf32> to vector<256x8xf32>
    %152 = arith.addf %149, %151 : vector<256x8xf32>
    %cst_183 = arith.constant 0.000000e+00 : f32
    %153 = vector.broadcast %cst_183 : f32 to vector<256x8xf32>
    %154 = arith.maximumf %152, %153 : vector<256x8xf32>
    %cst_184 = arith.constant dense<0.000000e+00> : vector<8xf32>
    %155 = vector.multi_reduction <add>, %154, %cst_184 [0] : vector<256x8xf32> to vector<8xf32>
    %156 = vector.shape_cast %155 : vector<8xf32> to vector<1x8xf32>
    %157 = arith.truncf %156 : vector<1x8xf32> to vector<1x8xbf16>
    %c0_185 = arith.constant 0 : index
    %c0_186 = arith.constant 0 : index
    %158 = vector.load %arg8[%c0_185, %c0_186] : memref<8x10xbf16, #tpu.memory_space<vmem>>, vector<8x10xbf16>
    %cst_187 = arith.constant dense<0.000000e+00> : vector<1x10xf32>
    %159 = tpu.matmul %157, %158, %cst_187 {dimension_numbers = #tpu.dot_dimension_numbers<[1], [0], [0], [1], [0, 0, 1, 1], [], []>} : vector<1x8xbf16>, vector<8x10xbf16>, vector<1x10xf32> -> vector<1x10xf32>
    %c0_188 = arith.constant 0 : index
    %c0_189 = arith.constant 0 : index
    %160 = vector.load %arg9[%c0_188, %c0_189] : memref<1x10xf32, #tpu.memory_space<vmem>>, vector<1x10xf32>
    %161 = arith.addf %159, %160 : vector<1x10xf32>
    %162 = vector.shape_cast %161 : vector<1x10xf32> to vector<1x1x10xf32>
    %c0_190 = arith.constant 0 : index
    %c0_191 = arith.constant 0 : index
    %c0_192 = arith.constant 0 : index
    %163 = vector.load %arg10[%c0_190, %c0_191, %c0_192] : memref<1x1x10xf32, #tpu.memory_space<vmem>>, vector<1x1x10xf32>
    tpu.vector_store %arg10[%c0_190, %c0_191, %c0_192], %162 {strides = array<i32>} : memref<1x1x10xf32, #tpu.memory_space<vmem>>, vector<1x1x10xf32>,
    return
  }
  func.func @transform_0(%arg0: i32) -> (i32, i32, i32, i32) {
    %c0_i32 = arith.constant 0 : i32
    %c0_i32_0 = arith.constant 0 : i32
    %c0_i32_1 = arith.constant 0 : i32
    %c0_i32_2 = arith.constant 0 : i32
    return %arg0, %c0_i32, %c0_i32_0, %c0_i32_1 : i32, i32, i32, i32
  }
  func.func @transform_1(%arg0: i32) -> (i32, i32) {
    %c0_i32 = arith.constant 0 : i32
    %c0_i32_0 = arith.constant 0 : i32
    %c0_i32_1 = arith.constant 0 : i32
    return %c0_i32, %c0_i32_0 : i32, i32
  }
  func.func @transform_2(%arg0: i32) -> (i32, i32) {
    %c0_i32 = arith.constant 0 : i32
    %c0_i32_0 = arith.constant 0 : i32
    %c0_i32_1 = arith.constant 0 : i32
    return %c0_i32, %c0_i32_0 : i32, i32
  }
  func.func @transform_3(%arg0: i32) -> (i32, i32) {
    %c0_i32 = arith.constant 0 : i32
    %c0_i32_0 = arith.constant 0 : i32
    %c0_i32_1 = arith.constant 0 : i32
    return %c0_i32, %c0_i32_0 : i32, i32
  }
  func.func @transform_4(%arg0: i32) -> (i32, i32) {
    %c0_i32 = arith.constant 0 : i32
    %c0_i32_0 = arith.constant 0 : i32
    %c0_i32_1 = arith.constant 0 : i32
    return %c0_i32, %c0_i32_0 : i32, i32
  }
  func.func @transform_5(%arg0: i32) -> (i32, i32) {
    %c0_i32 = arith.constant 0 : i32
    %c0_i32_0 = arith.constant 0 : i32
    %c0_i32_1 = arith.constant 0 : i32
    return %c0_i32, %c0_i32_0 : i32, i32
  }
  func.func @transform_6(%arg0: i32) -> (i32, i32) {
    %c0_i32 = arith.constant 0 : i32
    %c0_i32_0 = arith.constant 0 : i32
    %c0_i32_1 = arith.constant 0 : i32
    return %c0_i32, %c0_i32_0 : i32, i32
  }
  func.func @transform_7(%arg0: i32) -> (i32, i32) {
    %c0_i32 = arith.constant 0 : i32
    %c0_i32_0 = arith.constant 0 : i32
    %c0_i32_1 = arith.constant 0 : i32
    return %c0_i32, %c0_i32_0 : i32, i32
  }
  func.func @transform_8(%arg0: i32) -> (i32, i32) {
    %c0_i32 = arith.constant 0 : i32
    %c0_i32_0 = arith.constant 0 : i32
    %c0_i32_1 = arith.constant 0 : i32
    return %c0_i32, %c0_i32_0 : i32, i32
  }
  func.func @transform_9(%arg0: i32) -> (i32, i32, i32) {
    %c0_i32 = arith.constant 0 : i32
    %c0_i32_0 = arith.constant 0 : i32
    %c0_i32_1 = arith.constant 0 : i32
    return %arg0, %c0_i32, %c0_i32_0 : i32, i32, i32
  }
}

</mosaic_0001>

<bundles_post_ra>
// kernel: tpu_custom_call.1
= control target key start
LH: loop header
LB: loop body
LE: loop exit
PB: predicated region body
PF: predicated region fallthrough
CT: control target
= control target key end

     0   :  { %14 = vsyncpa [#allocation6], 0  ;;  %s7163_s0 = inlined_call_operand.vmem [shape: f32[2,18,18,4], index: 0, kind: input, shape index: {}]   ;;  %s7164_s1 = inlined_call_operand.vmem [shape: bf16[36,8], index: 1, kind: input, shape index: {}]   ;;  %s7165_s2 = inlined_call_operand.vmem [shape: f32[1,8], index: 2, kind: input, shape index: {}]   ;;  %s7166_s3 = inlined_call_operand.vmem [shape: bf16[72,4], index: 3, kind: input, shape index: {}]   ;;  %s7167_s4 = inlined_call_operand.vmem [shape: f32[1,4], index: 4, kind: input, shape index: {}]   ;;  %s7168_s5 = inlined_call_operand.vmem [shape: bf16[36,8], index: 5, kind: input, shape index: {}]   ;;  %s7169_s6 = inlined_call_operand.vmem [shape: f32[1,8], index: 6, kind: input, shape index: {}]   ;;  %s7170_s7 = inlined_call_operand.vmem [shape: bf16[8,10], index: 7, kind: input, shape index: {}]   ;;  %s7171_s8 = inlined_call_operand.vmem [shape: f32[1,10], index: 8, kind: input, shape index: {}]   ;;  %s7172_s9 = inlined_call_operand.hbm [shape: f32[2,1,10], index: 9, kind: output, shape index: {}]  }
   0x1   :  { %16 = vsyncpa [#allocation6 + $0x1], 0  ;;  %s5462_s30 = smov 0   ;;  %s5464_s10 = smov 0  }
   0x2   :  { %s5466_s11 = smov 0   ;;  %s5468_s12 = smov 0  }
   0x3 LB: > { %s5483_s13 = sadd.s32 4294967295, %s5395_s12   ;;  %s4810_s14 = sadd.s32 4294967294, %s5395_s12   ;;  %s5395_s12 = sphi %s5468_s12, %s7319_s12   ;;  %s5391_s11 = sphi %s5466_s11, %s7318_s11   ;;  %s5387_s10 = sphi %s5464_s10, %s7317_s10   ;;  %s5383_s30 = sphi %s5462_s30, %s7316_s30  }
   0x4   : > { %s5487_s15 = sadd.s32 1, %s5395_s12   ;;  %s223_s16 = sadd.s32 1, %s5391_s11 }
   0x5   : > { %s220_s17 = ssub.s32 %s5395_s12, %s5487_s15  ;;  %p233_p0 = scmp.ne.s32.totalorder %s5391_s11, %s5387_s10 }
   0x6   : > { %p221_p1 = scmp.eq.s32.totalorder %s220_s17, 0  ;;  %p234_p2 = scmp.eq.s32.totalorder %s5483_s13, 1 }
   0x7   : > { %p239_p3 = scmp.ne.s32.totalorder %s5387_s10, %s5383_s30  ;;  %p240_p4 = scmp.eq.s32.totalorder %s4810_s14, 1 }
   0x8   : > { %s5498_s18 = scalar_select %p221_p1, %s5391_s11, %s223_s16  }
   0x9   : > { %p5500_p5 = por %p234_p2, %p233_p0  ;;  %p5504_p6 = por %p240_p4, %p239_p3 }
   0xa   : > { %p4813_p7 = scmp.ge.s32.totalorder %s5395_s12, 1  ;;  %p290_p8 = scmp.lt.s32.totalorder %s5395_s12, 3 }
   0xc   : > { %p291_p9 = pnand %p4813_p7, %p290_p8 }
   0xd   : > { %p325_p10 = scmp.lt.s32.totalorder (!%p291_p9), %s5483_s13, 1  ;;  %s7179_s26 = smov (!%p291_p9), 4   ;;  %vm379_vm0 = vcmask (!%p291_p9), 31744   ;;  %v5322_v50 = vld [vmem:[%s7164_s1] sm:$0xff] (!%p291_p9)   ;;  %v5323_v54 = vld [vmem:[%s7164_s1 + $0x8] sm:$0xff] (!%p291_p9)   ;;  %vm1522_vm1 = vcmask (!%p291_p9), 1041408  }
   0xe   : > { %294 = sbr.rel (%p291_p9) target bundleno = 1663 (0x67f), region = 56  ;;  %s5398_s27 = smov (!%p291_p9), 8   ;;  %5134 = vmatprep.subr.bf16.mxu0 (!%p291_p9), %v5322_v50  ;;  %5258 = vmatprep.subr.bf16.mxu1 (!%p291_p9), %v5322_v50  ;;  %v5324_v56 = vld [vmem:[%s7164_s1 + $0x10] ss:$0 sps:$4 sm:$0x33] (!%p291_p9)   ;;  %vm508_vm2 = vcmask (!%p291_p9), 64544  }
   0xf   : > { %s7177_s28 = smov (!%p291_p9), 12   ;;  %s5400_s29 = smov (!%p291_p9), 16   ;;  %5135 = vmatpush3.bf16.msra.mxu0 (!%p291_p9), %v5322_v50  ;;  %5261 = vmatpush3.bf16.msra.mxu1 (!%p291_p9), %v5322_v50  ;;  %v1524_v62 = vsel (!%p291_p9), %vm1522_vm1, %v5324_v56, 0  ;;  %vm637_vm3 = vcmask (!%p291_p9), 97344   ;;  %vm767_vm4 = vcmask (!%p291_p9), 130144   ;;  %vm7188_vm5 = vcmask (!%p291_p9), 162944  }
  0x10   : > { %s7173_s14 = smov (!%p291_p9), 20   ;;  %s5402_s23 = smov (!%p291_p9), 24   ;;  %5136 = vmatprep.subr.bf16.mxu0 (!%p291_p9), %v5323_v54  ;;  %5259 = vmatprep.subr.bf16.mxu1 (!%p291_p9), %v5323_v54  ;;  %vm7186_vm6 = vcmask (!%p291_p9), 195744   ;;  %vm7185_vm7 = vcmask (!%p291_p9), 228544   ;;  %vm7184_vm8 = vcmask (!%p291_p9), 261344   ;;  %vm7183_vm9 = vcmask (!%p291_p9), 294144  }
  0x11   : > { %s7175_s17 = smov (!%p291_p9), 28   ;;  %vm7182_vm10 = vcmask (!%p291_p9), 293888   ;;  %vm7187_vm11 = vcmask (!%p291_p9), 64512   ;;  %vm1755_vm12 = vcmask (!%p291_p9), 58368   ;;  %vm1761_vm13 = vcmask (!%p291_p9), 57344   ;;  %s5406_s24 = smov (!%p291_p9), 48  }
  0x12   : > { %vm1974_vm14 = vcmask (!%p291_p9), 130112   ;;  %vm2103_vm15 = vcmask (!%p291_p9), 195712   ;;  %s5407_s16 = smov (!%p291_p9), 56  }
  0x13   : > { %5137 = vmatpush3.bf16.msra.mxu0 (!%p291_p9), %v5323_v54  ;;  %5262 = vmatpush3.bf16.msra.mxu1 (!%p291_p9), %v5323_v54 }
  0x14   : > { %5264 = vmatprep.subr.msk.bf16.mxu0 (!%p291_p9), %vm1522_vm1, %v5324_v56  ;;  %5265 = vmatprep.subr.msk.bf16.mxu1 (!%p291_p9), %vm1522_vm1, %v5324_v56 }
  0x15   : > { %s326_s21 = scalar_select %p325_p10, %s5483_s13, 1 }
  0x17   : > { %s5268_s22 = smul.u32 432, %s326_s21  ;;  %s5404_s21 = smov 32   ;;  %5139 = vmatpush3.bf16.msra.mxu0 %v1524_v62  ;;  %5263 = vmatpush3.bf16.msra.mxu1 %v1524_v62 }
  0x19   : > { %s5515_s25 = scalar_lea.vmem %s7163_s0, %s5268_s22  ;;  %s5409_s22 = smov 40  }
  0x1a   : > { %v396_v0 = vld [vmem:[%s5515_s25 + $0x1] sm:$0xff]  ;;  %v397_v1 = vld [vmem:[%s5515_s25 + $0x9] sm:$0xff]  ;;  %v398_v5 = vld [vmem:[%s5515_s25 + $0x19] sm:$0xff] }
  0x1b   : > { %v525_v2 = vld [vmem:[%s5515_s25 + $0x2] sm:$0xff]  ;;  %v428_v3 = vpack.c.bf16 %v397_v1, %v396_v0  ;;  %v526_v4 = vld [vmem:[%s5515_s25 + $0xa] sm:$0xff]  ;;  %v527_v8 = vld [vmem:[%s5515_s25 + $0x1a] sm:$0xff] }
  0x1c   : > { %v399_v6 = vld [vmem:[%s5515_s25 + $0x21] sm:$0xff]  ;;  %v557_v7 = vpack.c.bf16 %v526_v4, %v525_v2  ;;  %v4815_v10 = vld [vmem:[%s5515_s25 + $0x18] sm:$0xff]  ;;  %v4817_v13 = vld [vmem:[%s5515_s25 + $0x30] sm:$0xff] }
  0x1d   : > { %v528_v9 = vld [vmem:[%s5515_s25 + $0x22] sm:$0xff]  ;;  %460 = vrot.lane.b32.xlu0 %v428_v3, %s7179_s26  ;;  %v429_v11 = vpack.c.bf16 %v399_v6, %v398_v5  ;;  %v4818_v14 = vld [vmem:[%s5515_s25 + $0x38] sm:$0xff]  ;;  %v4914_v19 = vld [vmem:[%s5515_s25 + $0x50] sm:$0xff] }
  0x1e   : > { %v4816_v12 = vld [vmem:[%s5515_s25 + $0x20] sm:$0xff]  ;;  %589 = vrot.lane.b32.xlu1 %v557_v7, %s5398_s27  ;;  %v558_v15 = vpack.c.bf16 %v528_v9, %v527_v8  ;;  %v688_v17 = vpack.c.bf16 %v4818_v14, %v4817_v13  ;;  %v4913_v18 = vld [vmem:[%s5515_s25 + $0x48] sm:$0xff]  ;;  %v4849_v23 = vld [vmem:[%s5515_s25 + $0x31] sm:$0xff] }
  0x1f   : > { %v687_v16 = vpack.c.bf16 %v4816_v12, %v4815_v10  ;;  %v5533_v20 = vpack.c.bf16 %v4914_v19, %v4913_v18  ;;  %v4821_v21 = vld [vmem:[%s5515_s25 + $0x60] sm:$0xff]  ;;  %v4822_v22 = vld [vmem:[%s5515_s25 + $0x68] sm:$0xff]  ;;  %v4917_v26 = vld [vmem:[%s5515_s25 + $0x78] sm:$0xff] }
  0x20   : > { %382 = vst.msk [vmem:[#allocation4 + $0x10] sm:$0xff] %vm379_vm0, %v688_v17  ;;  %v5542_v24 = vpack.c.bf16 %v4822_v22, %v4821_v21  ;;  %v4850_v25 = vld [vmem:[%s5515_s25 + $0x39] sm:$0xff]  ;;  %v4825_v29 = vld [vmem:[%s5515_s25 + $0x90] sm:$0xff]  ;;  %v4921_v35 = vld [vmem:[%s5515_s25 + $0xa8] sm:$0xff] }
  0x21   : > { %381 = vst.msk [vmem:[#allocation4 + $0x8] sm:$0xff] %vm379_vm0, %v687_v16  ;;  %462 = vrot.lane.b32.xlu0 %v429_v11, %s7179_s26  ;;  %383 = vst.msk [vmem:[#allocation4 + $0x18] sm:$0xff] %vm379_vm0, %v5533_v20  ;;  %v4918_v27 = vld [vmem:[%s5515_s25 + $0x80] sm:$0xff]  ;;  %v4826_v30 = vld [vmem:[%s5515_s25 + $0x98] sm:$0xff]  ;;  %v5557_v31 = vpack.c.bf16 %v4850_v25, %v4849_v23 }
  0x22   : > { %591 = vrot.lane.b32.xlu1 %v558_v15, %s5398_s27  ;;  %v5549_v28 = vpack.c.bf16 %v4918_v27, %v4917_v26  ;;  %384 = vst.msk [vmem:[#allocation4 + $0x20] sm:$0xff] %vm379_vm0, %v5542_v24  ;;  %v4881_v32 = vld [vmem:[%s5515_s25 + $0x32] sm:$0xff]  ;;  %v5560_v33 = vpack.c.bf16 %v4826_v30, %v4825_v29  ;;  %v4882_v34 = vld [vmem:[%s5515_s25 + $0x3a] sm:$0xff]  ;;  %v4830_v39 = vld [vmem:[%s5515_s25 + $0xc8] sm:$0xff] }
  0x23   : > { %v4922_v36 = vld [vmem:[%s5515_s25 + $0xb0] sm:$0xff]  ;;  %v4829_v38 = vld [vmem:[%s5515_s25 + $0xc0] sm:$0xff]  ;;  %v946_v40 = vpack.c.bf16 %v4882_v34, %v4881_v32  ;;  %v332_v43 = vld [vmem:[%s5515_s25 + $0x8] sm:$0xff] }
  0x24   : > { %385 = vst.msk [vmem:[#allocation4 + $0x28] sm:$0xff] %vm379_vm0, %v5549_v28  ;;  %v5567_v37 = vpack.c.bf16 %v4922_v36, %v4921_v35  ;;  %386 = vst.msk [vmem:[#allocation4 + $0x30] sm:$0xff] %vm379_vm0, %v5560_v33  ;;  %v5576_v41 = vpack.c.bf16 %v4830_v39, %v4829_v38  ;;  %v331_v42 = vld [vmem:[%s5515_s25] sm:$0xff]  ;;  %v4925_v45 = vld [vmem:[%s5515_s25 + $0xd8] sm:$0xff] }
  0x25   : > { %719 = vrot.lane.b32.xlu0 %v687_v16, %s7177_s28  ;;  %v363_v44 = vpack.c.bf16 %v332_v43, %v331_v42  ;;  %v4926_v46 = vld [vmem:[%s5515_s25 + $0xe0] sm:$0xff]  ;;  %v4833_v48 = vld [vmem:[%s5515_s25 + $0xf0] sm:$0xff]  ;;  %v4834_v49 = vld [vmem:[%s5515_s25 + $0xf8] sm:$0xff] }
  0x26   : > { %721 = vrot.lane.b32.xlu1 %v688_v17, %s7177_s28  ;;  %387 = vst.msk [vmem:[#allocation4 + $0x38] sm:$0xff] %vm379_vm0, %v5567_v37  ;;  %388 = vst.msk [vmem:[#allocation4 + $0x40] sm:$0xff] %vm379_vm0, %v5576_v41  ;;  %v5587_v47 = vpack.c.bf16 %v4926_v46, %v4925_v45  ;;  %v4945_v51 = vld [vmem:[%s5515_s25 + $0x49] sm:$0xff]  ;;  %v4946_v52 = vld [vmem:[%s5515_s25 + $0x51] sm:$0xff]  ;;  %v5598_v53 = vpack.c.bf16 %v4834_v49, %v4833_v48 }
  0x27   : > { %380 = vst.msk [vmem:[#allocation4] sm:$0xff] %vm379_vm0, %v363_v44  ;;  %v1205_v55 = vpack.c.bf16 %v4946_v52, %v4945_v51  ;;  %v4929_v57 = vld [vmem:[%s5515_s25 + $0x108] sm:$0xff]  ;;  %v4930_v58 = vld [vmem:[%s5515_s25 + $0x110] sm:$0xff]  ;;  %v4837_v3 = vld [vmem:[%s5515_s25 + $0x120] sm:$0xff] }
  0x28   : > { %389 = vst.msk [vmem:[#allocation4 + $0x48] sm:$0xff] %vm379_vm0, %v5587_v47  ;;  %390 = vst.msk [vmem:[#allocation4 + $0x50] sm:$0xff] %vm379_vm0, %v5598_v53  ;;  %v5615_v59 = vpack.c.bf16 %v4930_v58, %v4929_v57  ;;  %v4977_v60 = vld [vmem:[%s5515_s25 + $0x4a] sm:$0xff]  ;;  %v4978_v61 = vld [vmem:[%s5515_s25 + $0x52] sm:$0xff] }
  0x29   : > { %848 = vrot.lane.b32.xlu0 %v429_v11, %s5400_s29  ;;  %v1334_v63 = vpack.c.bf16 %v4978_v61, %v4977_v60  ;;  %v4853_v0 = vld [vmem:[%s5515_s25 + $0x61] sm:$0xff]  ;;  %v4854_v1 = vld [vmem:[%s5515_s25 + $0x69] sm:$0xff]  ;;  %v4949_v9 = vld [vmem:[%s5515_s25 + $0x79] sm:$0xff] }
  0x2a   : > { %850 = vrot.lane.b32.xlu1 %v5557_v31, %s5400_s29  ;;  %391 = vst.msk [vmem:[#allocation4 + $0x58] sm:$0xff] %vm379_vm0, %v5615_v59  ;;  %v819_v2 = vpack.c.bf16 %v4854_v1, %v4853_v0  ;;  %v4838_v4 = vld [vmem:[%s5515_s25 + $0x128] sm:$0xff]  ;;  %v4933_v12 = vld [vmem:[%s5515_s25 + $0x138] sm:$0xff]  ;;  %v4934_v13 = vld [vmem:[%s5515_s25 + $0x140] sm:$0xff] }
  0x2b   : > { %v4885_v5 = vld [vmem:[%s5515_s25 + $0x62] sm:$0xff]  ;;  %v4886_v6 = vld [vmem:[%s5515_s25 + $0x6a] sm:$0xff]  ;;  %v5644_v7 = vpack.c.bf16 %v4838_v4, %v4837_v3  ;;  %v5660_v14 = vpack.c.bf16 %v4934_v13, %v4933_v12  ;;  %v4858_v19 = vld [vmem:[%s5515_s25 + $0x99] sm:$0xff] }
  0x2c   : > { %v948_v8 = vpack.c.bf16 %v4886_v6, %v4885_v5  ;;  %v4950_v10 = vld [vmem:[%s5515_s25 + $0x81] sm:$0xff]  ;;  %v4857_v18 = vld [vmem:[%s5515_s25 + $0x91] sm:$0xff]  ;;  %v4953_v27 = vld [vmem:[%s5515_s25 + $0xa9] sm:$0xff] }
  0x2d   : > { %977 = vrot.lane.b32.xlu0 %v558_v15, %s7173_s14  ;;  %392 = vst.msk [vmem:[#allocation4 + $0x60] sm:$0xff] %vm379_vm0, %v5644_v7  ;;  %v1207_v11 = vpack.c.bf16 %v4950_v10, %v4949_v9  ;;  %393 = vst.msk [vmem:[#allocation4 + $0x68] sm:$0xff] %vm379_vm0, %v5660_v14  ;;  %v4981_v15 = vld [vmem:[%s5515_s25 + $0x7a] sm:$0xff]  ;;  %v4982_v16 = vld [vmem:[%s5515_s25 + $0x82] sm:$0xff] }
  0x2e   : > { %979 = vrot.lane.b32.xlu1 %v946_v40, %s7173_s14  ;;  %v4841_v21 = vld [vmem:[%s5515_s25 + $0x150] sm:$0xff]  ;;  %v4842_v22 = vld [vmem:[%s5515_s25 + $0x158] sm:$0xff]  ;;  %v4937_v30 = vld [vmem:[%s5515_s25 + $0x168] sm:$0xff] }
  0x2f   : > { %v4889_v23 = vld [vmem:[%s5515_s25 + $0x92] sm:$0xff]  ;;  %v5684_v25 = vpack.c.bf16 %v4842_v22, %v4841_v21  ;;  %v4861_v36 = vld [vmem:[%s5515_s25 + $0xc1] sm:$0xff]  ;;  %v4862_v38 = vld [vmem:[%s5515_s25 + $0xc9] sm:$0xff] }
  0x30   : > { %v4986_v34 = vld [vmem:[%s5515_s25 + $0xb2] sm:$0xff]  ;;  %v823_v39 = vpack.c.bf16 %v4862_v38, %v4861_v36  ;;  %v4894_v42 = vld [vmem:[%s5515_s25 + $0xca] sm:$0xff]  ;;  %v4958_v45 = vld [vmem:[%s5515_s25 + $0xe1] sm:$0xff] }
  0x31   : > { %1107 = vrot.lane.b32.xlu0 %v688_v17, %s5402_s23  ;;  %v1336_v17 = vpack.c.bf16 %v4982_v16, %v4981_v15  ;;  %394 = vst.msk [vmem:[#allocation4 + $0x70] sm:$0xff] %vm379_vm0, %v5684_v25  ;;  %v4989_v51 = vld [vmem:[%s5515_s25 + $0xda] sm:$0xff]  ;;  %v4990_v52 = vld [vmem:[%s5515_s25 + $0xe2] sm:$0xff]  ;;  %v4865_v62 = vld [vmem:[%s5515_s25 + $0xf1] sm:$0xff] }
  0x32   : > { %1109 = vrot.lane.b32.xlu1 %v5533_v20, %s5402_s23  ;;  %v4897_v3 = vld [vmem:[%s5515_s25 + $0xf2] sm:$0xff]  ;;  %v4898_v4 = vld [vmem:[%s5515_s25 + $0xfa] sm:$0xff]  ;;  %v4961_v10 = vld [vmem:[%s5515_s25 + $0x109] sm:$0xff] }
  0x33   : > { %v4902_v36 = vld [vmem:[%s5515_s25 + $0x12a] sm:$0xff] }
  0x35   : > { %1236 = vrot.lane.b32.xlu0 %v5557_v31, %s7175_s17 }
  0x36   : > { %1238 = vrot.lane.b32.xlu1 %v1205_v55, %s7175_s17 }
  0x39   : > { %1365 = vrot.lane.b32.xlu0 %v946_v40, %s5404_s21 }
  0x3a   : > { %464 = vrot.lane.b32.xlu1 %v5557_v31, %s7179_s26  ;;  %v4938_v31 = vld [vmem:[%s5515_s25 + $0x170] sm:$0xff] }
  0x3b   : > { %v5700_v32 = vpack.c.bf16 %v4938_v31, %v4937_v30  ;;  %v4870_v30 = vld [vmem:[%s5515_s25 + $0x129] sm:$0xff] }
  0x3d   : > { %1367 = vrot.lane.b32.xlu0 %v1334_v63, %s5404_s21  ;;  %395 = vst.msk [vmem:[#allocation4 + $0x78] sm:$0xff] %vm379_vm0, %v5700_v32 }
  0x3e   : > { %466 = vrot.lane.b32.xlu1 %v1205_v55, %s7179_s26 }
  0x41   : > { %593 = vrot.lane.b32.xlu0 %v946_v40, %s5398_s27  ;;  %v4893_v40 = vld [vmem:[%s5515_s25 + $0xc2] sm:$0xff] }
  0x42   : > { %595 = vrot.lane.b32.xlu1 %v1334_v63, %s5398_s27  ;;  %v952_v43 = vpack.c.bf16 %v4894_v42, %v4893_v40 }
  0x45   : > { %723 = vrot.lane.b32.xlu0 %v5533_v20, %s7177_s28  ;;  %v821_v20 = vpack.c.bf16 %v4858_v19, %v4857_v18  ;;  %v4994_v18 = vld [vmem:[%s5515_s25 + $0x112] sm:$0xff] }
  0x46   : > { %725 = vrot.lane.b32.xlu1 %v5542_v24, %s7177_s28 }
  0x49   : > { %852 = vrot.lane.b32.xlu0 %v1205_v55, %s5400_s29  ;;  %v1340_v55 = vpack.c.bf16 %v4990_v52, %v4989_v51 }
  0x4a   : > { %854 = vrot.lane.b32.xlu1 %v819_v2, %s5400_s29 }
  0x4d   : > { %981 = vrot.lane.b32.xlu0 %v1334_v63, %s7173_s14  ;;  %v4866_v63 = vld [vmem:[%s5515_s25 + $0xf9] sm:$0xff] }
  0x4e   : > { %983 = vrot.lane.b32.xlu1 %v948_v8, %s7173_s14  ;;  %v825_v1 = vpack.c.bf16 %v4866_v63, %v4865_v62  ;;  %v4874_v62 = vld [vmem:[%s5515_s25 + $0x159] sm:$0xff] }
  0x51   : > { %1111 = vrot.lane.b32.xlu0 %v5542_v24, %s5402_s23  ;;  %v4890_v24 = vld [vmem:[%s5515_s25 + $0x9a] sm:$0xff] }
  0x52   : > { %1113 = vrot.lane.b32.xlu1 %v5549_v28, %s5402_s23  ;;  %v950_v26 = vpack.c.bf16 %v4890_v24, %v4889_v23 }
  0x55   : > { %1240 = vrot.lane.b32.xlu0 %v819_v2, %s7175_s17 }
  0x56   : > { %1242 = vrot.lane.b32.xlu1 %v1207_v11, %s7175_s17 }
  0x59   : > { %1369 = vrot.lane.b32.xlu0 %v948_v8, %s5404_s21 }
  0x5a   : > { %468 = vrot.lane.b32.xlu1 %v819_v2, %s7179_s26 }
  0x5d   : > { %1371 = vrot.lane.b32.xlu0 %v1336_v17, %s5404_s21 }
  0x5e   : > { %470 = vrot.lane.b32.xlu1 %v1207_v11, %s7179_s26 }
  0x61   : > { %597 = vrot.lane.b32.xlu0 %v948_v8, %s5398_s27 }
  0x62   : > { %599 = vrot.lane.b32.xlu1 %v1336_v17, %s5398_s27 }
  0x65   : > { %727 = vrot.lane.b32.xlu0 %v5549_v28, %s7177_s28  ;;  %v4954_v28 = vld [vmem:[%s5515_s25 + $0xb1] sm:$0xff] }
  0x66   : > { %729 = vrot.lane.b32.xlu1 %v5560_v33, %s7177_s28  ;;  %v1209_v29 = vpack.c.bf16 %v4954_v28, %v4953_v27 }
  0x69   : > { %856 = vrot.lane.b32.xlu0 %v1207_v11, %s5400_s29  ;;  %v4962_v11 = vld [vmem:[%s5515_s25 + $0x111] sm:$0xff] }
  0x6a   : > { %858 = vrot.lane.b32.xlu1 %v821_v20, %s5400_s29  ;;  %v1213_v13 = vpack.c.bf16 %v4962_v11, %v4961_v10 }
  0x6d   : > { %985 = vrot.lane.b32.xlu0 %v1336_v17, %s7173_s14 }
  0x6e   : > { %987 = vrot.lane.b32.xlu1 %v950_v26, %s7173_s14 }
  0x71   : > { %1115 = vrot.lane.b32.xlu0 %v5560_v33, %s5402_s23  ;;  %v4985_v33 = vld [vmem:[%s5515_s25 + $0xaa] sm:$0xff] }
  0x72   : > { %1117 = vrot.lane.b32.xlu1 %v5567_v37, %s5402_s23  ;;  %v1338_v35 = vpack.c.bf16 %v4986_v34, %v4985_v33 }
  0x75   : > { %1244 = vrot.lane.b32.xlu0 %v821_v20, %s7175_s17 }
  0x76   : > { %1246 = vrot.lane.b32.xlu1 %v1209_v29, %s7175_s17 }
  0x79   : > { %1373 = vrot.lane.b32.xlu0 %v950_v26, %s5404_s21 }
  0x7a   : > { %472 = vrot.lane.b32.xlu1 %v821_v20, %s7179_s26 }
  0x7d   : > { %1375 = vrot.lane.b32.xlu0 %v1338_v35, %s5404_s21 }
  0x7e   : > { %474 = vrot.lane.b32.xlu1 %v1209_v29, %s7179_s26 }
  0x81   : > { %601 = vrot.lane.b32.xlu0 %v950_v26, %s5398_s27 }
  0x82   : > { %603 = vrot.lane.b32.xlu1 %v1338_v35, %s5398_s27 }
  0x85   : > { %731 = vrot.lane.b32.xlu0 %v5567_v37, %s7177_s28  ;;  %v4957_v37 = vld [vmem:[%s5515_s25 + $0xd9] sm:$0xff] }
  0x86   : > { %733 = vrot.lane.b32.xlu1 %v5576_v41, %s7177_s28  ;;  %v1211_v48 = vpack.c.bf16 %v4958_v45, %v4957_v37 }
  0x89   : > { %860 = vrot.lane.b32.xlu0 %v1209_v29, %s5400_s29  ;;  %v4869_v29 = vld [vmem:[%s5515_s25 + $0x121] sm:$0xff] }
  0x8a   : > { %862 = vrot.lane.b32.xlu1 %v823_v39, %s5400_s29  ;;  %v827_v33 = vpack.c.bf16 %v4870_v30, %v4869_v29  ;;  %v4877_v29 = vld [vmem:[%s5515_s25 + $0x181] sm:$0xff]  ;;  %v4878_v30 = vld [vmem:[%s5515_s25 + $0x189] sm:$0xff] }
  0x8d   : > { %989 = vrot.lane.b32.xlu0 %v1338_v35, %s7173_s14  ;;  %v4901_v35 = vld [vmem:[%s5515_s25 + $0x122] sm:$0xff] }
  0x8e   : > { %991 = vrot.lane.b32.xlu1 %v952_v43, %s7173_s14 }
  0x8f   : > { %v461_v44 = vpop.permute.xlu0 %460 }
  0x90   : > { %509 = vst.msk [vmem:[#allocation4] sm:$0xff] %vm508_vm2, %v461_v44  ;;  %v590_v46 = vpop.permute.xlu1 %589  ;;  %v4966_v44 = vld [vmem:[%s5515_s25 + $0x141] sm:$0xff] }
  0x91   : > { %1119 = vrot.lane.b32.xlu0 %v5576_v41, %s5402_s23  ;;  %638 = vst.msk [vmem:[#allocation4] sm:$0xff] %vm637_vm3, %v590_v46 }
  0x92   : > { %1121 = vrot.lane.b32.xlu1 %v5587_v47, %s5402_s23 }
  0x93   : > { %v463_v49 = vpop.permute.xlu0 %462 }
  0x94   : > { %510 = vst.msk [vmem:[#allocation4 + $0x8] sm:$0xff] %vm508_vm2, %v463_v49  ;;  %v592_v50 = vpop.permute.xlu1 %591 }
  0x95   : > { %1248 = vrot.lane.b32.xlu0 %v823_v39, %s7175_s17  ;;  %639 = vst.msk [vmem:[#allocation4 + $0x8] sm:$0xff] %vm637_vm3, %v592_v50  ;;  %v4998_v50 = vld [vmem:[%s5515_s25 + $0x142] sm:$0xff] }
  0x96   : > { %1250 = vrot.lane.b32.xlu1 %v1211_v48, %s7175_s17 }
  0x97   : > { %v720_v41 = vpop.permute.xlu0 %719 }
  0x98   : > { %768 = vst.msk [vmem:[#allocation4] sm:$0xff] %vm767_vm4, %v720_v41  ;;  %v722_v54 = vpop.permute.xlu1 %721 }
  0x99   : > { %1377 = vrot.lane.b32.xlu0 %v952_v43, %s5404_s21  ;;  %769 = vst.msk [vmem:[#allocation4 + $0x8] sm:$0xff] %vm767_vm4, %v722_v54 }
  0x9a   : > { %476 = vrot.lane.b32.xlu1 %v823_v39, %s7179_s26 }
  0x9b   : > { %v849_v56 = vpop.permute.xlu0 %848 }
  0x9c   : > { %897 = vst.msk [vmem:[#allocation4] sm:$0xff] %vm7188_vm5, %v849_v56  ;;  %v851_v57 = vpop.permute.xlu1 %850 }
  0x9d   : > { %1379 = vrot.lane.b32.xlu0 %v1340_v55, %s5404_s21  ;;  %898 = vst.msk [vmem:[#allocation4 + $0x8] sm:$0xff] %vm7188_vm5, %v851_v57 }
  0x9e   : > { %478 = vrot.lane.b32.xlu1 %v1211_v48, %s7179_s26 }
  0x9f   : > { %v978_v58 = vpop.permute.xlu0 %977 }
  0xa0   : > { %1026 = vst.msk [vmem:[#allocation4] sm:$0xff] %vm7186_vm6, %v978_v58  ;;  %v980_v60 = vpop.permute.xlu1 %979 }
  0xa1   : > { %605 = vrot.lane.b32.xlu0 %v952_v43, %s5398_s27  ;;  %1027 = vst.msk [vmem:[#allocation4 + $0x8] sm:$0xff] %vm7186_vm6, %v980_v60  ;;  %v4965_v43 = vld [vmem:[%s5515_s25 + $0x139] sm:$0xff] }
  0xa2   : > { %607 = vrot.lane.b32.xlu1 %v1340_v55, %s5398_s27  ;;  %v1215_v45 = vpack.c.bf16 %v4966_v44, %v4965_v43 }
  0xa3   : > { %v1108_v61 = vpop.permute.xlu0 %1107 }
  0xa4   : > { %1156 = vst.msk [vmem:[#allocation4] sm:$0xff] %vm7185_vm7, %v1108_v61  ;;  %v1110_v0 = vpop.permute.xlu1 %1109  ;;  %v4873_v61 = vld [vmem:[%s5515_s25 + $0x151] sm:$0xff] }
  0xa5   : > { %735 = vrot.lane.b32.xlu0 %v5587_v47, %s7177_s28  ;;  %1157 = vst.msk [vmem:[#allocation4 + $0x8] sm:$0xff] %vm7185_vm7, %v1110_v0  ;;  %v954_v47 = vpack.c.bf16 %v4898_v4, %v4897_v3  ;;  %v829_v0 = vpack.c.bf16 %v4874_v62, %v4873_v61  ;;  %v4906_v3 = vld [vmem:[%s5515_s25 + $0x15a] sm:$0xff] }
  0xa6   : > { %737 = vrot.lane.b32.xlu1 %v5598_v53, %s7177_s28 }
  0xa7   : > { %v1237_v2 = vpop.permute.xlu0 %1236 }
  0xa8   : > { %1285 = vst.msk [vmem:[#allocation4] sm:$0xff] %vm7184_vm8, %v1237_v2  ;;  %v1239_v5 = vpop.permute.xlu1 %1238  ;;  %v4905_v2 = vld [vmem:[%s5515_s25 + $0x152] sm:$0xff] }
  0xa9   : > { %864 = vrot.lane.b32.xlu0 %v1211_v48, %s5400_s29  ;;  %1286 = vst.msk [vmem:[#allocation4 + $0x8] sm:$0xff] %vm7184_vm8, %v1239_v5 }
  0xaa   : > { %866 = vrot.lane.b32.xlu1 %v825_v1, %s5400_s29 }
  0xab   : > { %v1366_v6 = vpop.permute.xlu0 %1365 }
  0xac   : > { %1414 = vst.msk [vmem:[#allocation4] sm:$0xff] %vm7183_vm9, %v1366_v6  ;;  %v465_v8 = vpop.permute.xlu1 %464 }
  0xad   : > { %993 = vrot.lane.b32.xlu0 %v1340_v55, %s7173_s14  ;;  %511 = vst.msk [vmem:[#allocation4 + $0x10] sm:$0xff] %vm508_vm2, %v465_v8  ;;  %v4969_v8 = vld [vmem:[%s5515_s25 + $0x169] sm:$0xff] }
  0xae   : > { %995 = vrot.lane.b32.xlu1 %v954_v47, %s7173_s14 }
  0xaf   : > { %v1368_v9 = vpop.permute.xlu0 %1367 }
  0xb0   : > { %1415 = vst.msk [vmem:[#allocation4 + $0x8] sm:$0xff] %vm7183_vm9, %v1368_v9  ;;  %v467_v12 = vpop.permute.xlu1 %466  ;;  %v4970_v9 = vld [vmem:[%s5515_s25 + $0x171] sm:$0xff] }
  0xb1   : > { %1123 = vrot.lane.b32.xlu0 %v5598_v53, %s5402_s23  ;;  %512 = vst.msk [vmem:[#allocation4 + $0x18] sm:$0xff] %vm508_vm2, %v467_v12  ;;  %v4993_v53 = vld [vmem:[%s5515_s25 + $0x10a] sm:$0xff]  ;;  %v1217_v11 = vpack.c.bf16 %v4970_v9, %v4969_v8 }
  0xb2   : > { %1125 = vrot.lane.b32.xlu1 %v5615_v59, %s5402_s23  ;;  %v1342_v22 = vpack.c.bf16 %v4994_v18, %v4993_v53 }
  0xb3   : > { %v594_v15 = vpop.permute.xlu0 %593  ;;  %v1430_v16 = vld [vmem:[#allocation4] sm:$0xff] }
  0xb4   : > { %640 = vst.msk [vmem:[#allocation4 + $0x10] sm:$0xff] %vm637_vm3, %v594_v15  ;;  %5140 = vmatprep.mubr.msk.bf16.mxu0 %vm7182_vm10, %v1430_v16  ;;  %v596_v17 = vpop.permute.xlu1 %595  ;;  %v5002_v16 = vld [vmem:[%s5515_s25 + $0x172] sm:$0xff] }
  0xb5   : > { %1252 = vrot.lane.b32.xlu0 %v825_v1, %s7175_s17  ;;  %641 = vst.msk [vmem:[#allocation4 + $0x18] sm:$0xff] %vm637_vm3, %v596_v17 }
  0xb6   : > { %1254 = vrot.lane.b32.xlu1 %v1213_v13, %s7175_s17 }
  0xb7   : > { %v724_v19 = vpop.permute.xlu0 %723  ;;  %v1431_v20 = vld [vmem:[#allocation4 + $0x8] sm:$0xff] }
  0xb8   : > { %770 = vst.msk [vmem:[#allocation4 + $0x10] sm:$0xff] %vm767_vm4, %v724_v19  ;;  %5141 = vmatmul.mubr.msk.bf16.vlgmr.msra.gmra.mrb[0].mxu0 %vm7182_vm10, %v1431_v20  ;;  %v726_v21 = vpop.permute.xlu1 %725 }
  0xb9   : > { %1381 = vrot.lane.b32.xlu0 %v954_v47, %s5404_s21  ;;  %771 = vst.msk [vmem:[#allocation4 + $0x18] sm:$0xff] %vm767_vm4, %v726_v21 }
  0xba   : > { %480 = vrot.lane.b32.xlu1 %v825_v1, %s7179_s26 }
  0xbb   : > { %v853_v23 = vpop.permute.xlu0 %852 }
  0xbc   : > { %899 = vst.msk [vmem:[#allocation4 + $0x10] sm:$0xff] %vm7188_vm5, %v853_v23  ;;  %v855_v24 = vpop.permute.xlu1 %854  ;;  %v4845_v23 = vld [vmem:[%s5515_s25 + $0x180] sm:$0xff] }
  0xbd   : > { %1383 = vrot.lane.b32.xlu0 %v1342_v22, %s5404_s21  ;;  %900 = vst.msk [vmem:[#allocation4 + $0x18] sm:$0xff] %vm7188_vm5, %v855_v24  ;;  %v4846_v24 = vld [vmem:[%s5515_s25 + $0x188] sm:$0xff] }
  0xbe   : > { %482 = vrot.lane.b32.xlu1 %v1213_v13, %s7179_s26 }
  0xbf   : > { %v982_v26 = vpop.permute.xlu0 %981 }
  0xc0   : > { %1028 = vst.msk [vmem:[#allocation4 + $0x10] sm:$0xff] %vm7186_vm6, %v982_v26  ;;  %v984_v27 = vpop.permute.xlu1 %983 }
  0xc1   : > { %609 = vrot.lane.b32.xlu0 %v954_v47, %s5398_s27  ;;  %1029 = vst.msk [vmem:[#allocation4 + $0x18] sm:$0xff] %vm7186_vm6, %v984_v27  ;;  %v5892_v27 = vpack.c.bf16 %v4846_v24, %v4845_v23 }
  0xc2   : > { %611 = vrot.lane.b32.xlu1 %v1342_v22, %s5398_s27 }
  0xc3   : > { %v1112_v28 = vpop.permute.xlu0 %1111 }
  0xc4   : > { %1158 = vst.msk [vmem:[#allocation4 + $0x10] sm:$0xff] %vm7185_vm7, %v1112_v28  ;;  %v1114_v31 = vpop.permute.xlu1 %1113 }
  0xc5   : > { %739 = vrot.lane.b32.xlu0 %v5615_v59, %s7177_s28  ;;  %1159 = vst.msk [vmem:[#allocation4 + $0x18] sm:$0xff] %vm7185_vm7, %v1114_v31  ;;  %v956_v59 = vpack.c.bf16 %v4902_v36, %v4901_v35  ;;  %v4909_v35 = vld [vmem:[%s5515_s25 + $0x182] sm:$0xff]  ;;  %v4910_v36 = vld [vmem:[%s5515_s25 + $0x18a] sm:$0xff] }
  0xc6   : > { %741 = vrot.lane.b32.xlu1 %v5644_v7, %s7177_s28 }
  0xc7   : > { %v1241_v34 = vpop.permute.xlu0 %1240 }
  0xc8   : > { %1287 = vst.msk [vmem:[#allocation4 + $0x10] sm:$0xff] %vm7184_vm8, %v1241_v34  ;;  %v1243_v38 = vpop.permute.xlu1 %1242 }
  0xc9   : > { %868 = vrot.lane.b32.xlu0 %v1213_v13, %s5400_s29  ;;  %1288 = vst.msk [vmem:[#allocation4 + $0x18] sm:$0xff] %vm7184_vm8, %v1243_v38 }
  0xca   : > { %870 = vrot.lane.b32.xlu1 %v827_v33, %s5400_s29 }
  0xcb   : > { %v1370_v39 = vpop.permute.xlu0 %1369 }
  0xcc   : > { %1416 = vst.msk [vmem:[#allocation4 + $0x10] sm:$0xff] %vm7183_vm9, %v1370_v39  ;;  %v469_v40 = vpop.permute.xlu1 %468 }
  0xcd   : > { %997 = vrot.lane.b32.xlu0 %v1342_v22, %s7173_s14  ;;  %513 = vst.msk [vmem:[#allocation4 + $0x20] sm:$0xff] %vm508_vm2, %v469_v40  ;;  %v4941_v40 = vld [vmem:[%s5515_s25 + $0x198] sm:$0xff] }
  0xce   : > { %999 = vrot.lane.b32.xlu1 %v956_v59, %s7173_s14 }
  0xcf   : > { %v1372_v42 = vpop.permute.xlu0 %1371 }
  0xd0   : > { %1417 = vst.msk [vmem:[#allocation4 + $0x18] sm:$0xff] %vm7183_vm9, %v1372_v42  ;;  %v471_v37 = vpop.permute.xlu1 %470  ;;  %v4942_v42 = vld [vmem:[%s5515_s25 + $0x1a0] sm:$0xff] }
  0xd1   : > { %1127 = vrot.lane.b32.xlu0 %v5644_v7, %s5402_s23  ;;  %514 = vst.msk [vmem:[#allocation4 + $0x28] sm:$0xff] %vm508_vm2, %v471_v37  ;;  %v4997_v7 = vld [vmem:[%s5515_s25 + $0x13a] sm:$0xff]  ;;  %v1090_v44 = vpack.c.bf16 %v4942_v42, %v4941_v40 }
  0xd2   : > { %1129 = vrot.lane.b32.xlu1 %v5660_v14, %s5402_s23  ;;  %v1344_v54 = vpack.c.bf16 %v4998_v50, %v4997_v7 }
  0xd3   : > { %v598_v46 = vpop.permute.xlu0 %597  ;;  %v1432_v48 = vld [vmem:[#allocation4 + $0x10] sm:$0xff] }
  0xd4   : > { %642 = vst.msk [vmem:[#allocation4 + $0x20] sm:$0xff] %vm637_vm3, %v598_v46  ;;  %5144 = vmatprep.mubr.msk.bf16.mxu0 %vm7182_vm10, %v1432_v48  ;;  %v600_v49 = vpop.permute.xlu1 %599  ;;  %v4974_v46 = vld [vmem:[%s5515_s25 + $0x1a1] sm:$0xff] }
  0xd5   : > { %1256 = vrot.lane.b32.xlu0 %v827_v33, %s7175_s17  ;;  %643 = vst.msk [vmem:[#allocation4 + $0x28] sm:$0xff] %vm637_vm3, %v600_v49 }
  0xd6   : > { %1258 = vrot.lane.b32.xlu1 %v1215_v45, %s7175_s17 }
  0xd7   : > { %v728_v51 = vpop.permute.xlu0 %727  ;;  %v1433_v52 = vld [vmem:[#allocation4 + $0x18] sm:$0xff] }
  0xd8   : > { %772 = vst.msk [vmem:[#allocation4 + $0x20] sm:$0xff] %vm767_vm4, %v728_v51  ;;  %5145 = vmatmul.mubr.msk.bf16.gmra.mrb[4].mxu0 %vm7182_vm10, %v1433_v52  ;;  %v730_v41 = vpop.permute.xlu1 %729  ;;  %v5005_v51 = vld [vmem:[%s5515_s25 + $0x19a] sm:$0xff]  ;;  %v5006_v52 = vld [vmem:[%s5515_s25 + $0x1a2] sm:$0xff] }
  0xd9   : > { %1385 = vrot.lane.b32.xlu0 %v956_v59, %s5404_s21  ;;  %773 = vst.msk [vmem:[#allocation4 + $0x28] sm:$0xff] %vm767_vm4, %v730_v41 }
  0xda   : > { %484 = vrot.lane.b32.xlu1 %v827_v33, %s7179_s26  ;;  %v5902_v33 = vpack.c.bf16 %v4878_v30, %v4877_v29 }
  0xdb   : > { %v857_v55 = vpop.permute.xlu0 %856 }
  0xdc   : > { %901 = vst.msk [vmem:[#allocation4 + $0x20] sm:$0xff] %vm7188_vm5, %v857_v55  ;;  %v859_v56 = vpop.permute.xlu1 %858 }
  0xdd   : > { %1387 = vrot.lane.b32.xlu0 %v1344_v54, %s5404_s21  ;;  %902 = vst.msk [vmem:[#allocation4 + $0x28] sm:$0xff] %vm7188_vm5, %v859_v56 }
  0xde   : > { %486 = vrot.lane.b32.xlu1 %v1215_v45, %s7179_s26 }
  0xdf   : > { %v986_v57 = vpop.permute.xlu0 %985 }
  0xe0   : > { %1030 = vst.msk [vmem:[#allocation4 + $0x20] sm:$0xff] %vm7186_vm6, %v986_v57  ;;  %v988_v58 = vpop.permute.xlu1 %987 }
  0xe1   : > { %613 = vrot.lane.b32.xlu0 %v956_v59, %s5398_s27  ;;  %1031 = vst.msk [vmem:[#allocation4 + $0x28] sm:$0xff] %vm7186_vm6, %v988_v58  ;;  %v5405_v59 = vmov 0.0  }
  0xe2   : > { %615 = vrot.lane.b32.xlu1 %v1344_v54, %s5398_s27  ;;  %1753 = vst.msk [vmem:[#allocation2] sm:$0xff] %vm7187_vm11, %v5405_v59  ;;  %1754 = vst.msk [vmem:[#allocation2 + $0x8] sm:$0xff] %vm7187_vm11, %v5405_v59 }
  0xe3   : > { %v1116_v60 = vpop.permute.xlu0 %1115  ;;  %1756 = vst.msk [vmem:[#allocation2 + $0x10] sm:$0x3] %vm1755_vm12, %v5405_v59  ;;  %1760 = vst.msk [vmem:[#allocation2 + $0x1a8] sm:$0x3] %vm1755_vm12, %v5405_v59  ;;  %vm7181_vm12 = vcmask 1043456  }
  0xe4   : > { %1160 = vst.msk [vmem:[#allocation4 + $0x20] sm:$0xff] %vm7185_vm7, %v1116_v60  ;;  %v1118_v63 = vpop.permute.xlu1 %1117 }
  0xe5   : > { %743 = vrot.lane.b32.xlu0 %v5660_v14, %s7177_s28  ;;  %1161 = vst.msk [vmem:[#allocation4 + $0x28] sm:$0xff] %vm7185_vm7, %v1118_v63  ;;  %v958_v14 = vpack.c.bf16 %v4906_v3, %v4905_v2 }
  0xe6   : > { %745 = vrot.lane.b32.xlu1 %v5684_v25, %s7177_s28  ;;  %1758 = vst.msk [vmem:[#allocation2 + $0x198] sm:$0xff] %vm7187_vm11, %v5405_v59  ;;  %1759 = vst.msk [vmem:[#allocation2 + $0x1a0] sm:$0xff] %vm7187_vm11, %v5405_v59 }
  0xe7   : > { %v1245_v1 = vpop.permute.xlu0 %1244  ;;  %3201 = vst.msk [vmem:[#allocation3] sm:$0xff] %vm379_vm0, %v5405_v59  ;;  %3202 = vst.msk [vmem:[#allocation3 + $0x8] sm:$0xff] %vm379_vm0, %v5405_v59 }
  0xe8   : > { %1289 = vst.msk [vmem:[#allocation4 + $0x20] sm:$0xff] %vm7184_vm8, %v1245_v1  ;;  %v1247_v4 = vpop.permute.xlu1 %1246 }
  0xe9   : > { %872 = vrot.lane.b32.xlu0 %v1215_v45, %s5400_s29  ;;  %1290 = vst.msk [vmem:[#allocation4 + $0x28] sm:$0xff] %vm7184_vm8, %v1247_v4  ;;  %v4973_v45 = vld [vmem:[%s5515_s25 + $0x199] sm:$0xff]  ;;  %v1862_v55 = vld [vmem:[#allocation2 + $0x1] sm:$0xff] }
  0xea   : > { %874 = vrot.lane.b32.xlu1 %v829_v0, %s5400_s29  ;;  %3206 = vst.msk [vmem:[#allocation3 + $0x198] sm:$0xff] %vm379_vm0, %v5405_v59  ;;  %3207 = vst.msk [vmem:[#allocation3 + $0x1a0] sm:$0xff] %vm379_vm0, %v5405_v59  ;;  %v1219_v49 = vpack.c.bf16 %v4974_v46, %v4973_v45  ;;  %v1863_v56 = vld [vmem:[#allocation2 + $0x9] sm:$0xff] }
  0xeb   : > { %v1374_v5 = vpop.permute.xlu0 %1373  ;;  %1762 = vst.msk [vmem:[#allocation2] sm:$0x1] %vm1761_vm13, %v5405_v59  ;;  %1763 = vst.msk [vmem:[#allocation2 + $0x18] sm:$0x1] %vm1761_vm13, %v5405_v59  ;;  %v1894_v61 = vpack.c.bf16 %v1863_v56, %v1862_v55  ;;  %v1991_v62 = vld [vmem:[#allocation2 + $0x2] sm:$0xff] }
  0xec   : > { %1418 = vst.msk [vmem:[#allocation4 + $0x20] sm:$0xff] %vm7183_vm9, %v1374_v5  ;;  %v473_v47 = vpop.permute.xlu1 %472 }
  0xed   : > { %1001 = vrot.lane.b32.xlu0 %v1344_v54, %s7173_s14  ;;  %515 = vst.msk [vmem:[#allocation4 + $0x30] sm:$0xff] %vm508_vm2, %v473_v47  ;;  %v1348_v54 = vpack.c.bf16 %v5006_v52, %v5005_v51 }
  0xee   : > { %1003 = vrot.lane.b32.xlu1 %v958_v14, %s7173_s14  ;;  %1764 = vst.msk [vmem:[#allocation2 + $0x30] sm:$0x1] %vm1761_vm13, %v5405_v59  ;;  %1765 = vst.msk [vmem:[#allocation2 + $0x48] sm:$0x1] %vm1761_vm13, %v5405_v59 }
  0xef   : > { %v1376_v6 = vpop.permute.xlu0 %1375  ;;  %1766 = vst.msk [vmem:[#allocation2 + $0x60] sm:$0x1] %vm1761_vm13, %v5405_v59  ;;  %1767 = vst.msk [vmem:[#allocation2 + $0x78] sm:$0x1] %vm1761_vm13, %v5405_v59 }
  0xf0   : > { %1419 = vst.msk [vmem:[#allocation4 + $0x28] sm:$0xff] %vm7183_vm9, %v1376_v6  ;;  %v475_v10 = vpop.permute.xlu1 %474 }
  0xf1   : > { %1131 = vrot.lane.b32.xlu0 %v5684_v25, %s5402_s23  ;;  %516 = vst.msk [vmem:[#allocation4 + $0x38] sm:$0xff] %vm508_vm2, %v475_v10  ;;  %v5001_v25 = vld [vmem:[%s5515_s25 + $0x16a] sm:$0xff]  ;;  %s5408_s25 = smov 64  }
  0xf2   : > { %1133 = vrot.lane.b32.xlu1 %v5700_v32, %s5402_s23  ;;  %v1346_v19 = vpack.c.bf16 %v5002_v16, %v5001_v25  ;;  %1768 = vst.msk [vmem:[#allocation2 + $0x90] sm:$0x1] %vm1761_vm13, %v5405_v59  ;;  %1769 = vst.msk [vmem:[#allocation2 + $0xa8] sm:$0x1] %vm1761_vm13, %v5405_v59 }
  0xf3   : > { %v602_v12 = vpop.permute.xlu0 %601  ;;  %v1434_v13 = vld [vmem:[#allocation4 + $0x20] sm:$0xff]  ;;  %1770 = vst.msk [vmem:[#allocation2 + $0xc0] sm:$0x1] %vm1761_vm13, %v5405_v59  ;;  %1771 = vst.msk [vmem:[#allocation2 + $0xd8] sm:$0x1] %vm1761_vm13, %v5405_v59 }
  0xf4   : > { %644 = vst.msk [vmem:[#allocation4 + $0x30] sm:$0xff] %vm637_vm3, %v602_v12  ;;  %5148 = vmatprep.mubr.msk.bf16.mxu0 %vm7182_vm10, %v1434_v13  ;;  %v604_v15 = vpop.permute.xlu1 %603 }
  0xf5   : > { %1260 = vrot.lane.b32.xlu0 %v829_v0, %s7175_s17  ;;  %645 = vst.msk [vmem:[#allocation4 + $0x38] sm:$0xff] %vm637_vm3, %v604_v15 }
  0xf6   : > { %1262 = vrot.lane.b32.xlu1 %v1217_v11, %s7175_s17  ;;  %1772 = vst.msk [vmem:[#allocation2 + $0xf0] sm:$0x1] %vm1761_vm13, %v5405_v59  ;;  %1773 = vst.msk [vmem:[#allocation2 + $0x108] sm:$0x1] %vm1761_vm13, %v5405_v59 }
  0xf7   : > { %v732_v17 = vpop.permute.xlu0 %731  ;;  %v1435_v53 = vld [vmem:[#allocation4 + $0x28] sm:$0xff]  ;;  %1774 = vst.msk [vmem:[#allocation2 + $0x120] sm:$0x1] %vm1761_vm13, %v5405_v59  ;;  %1775 = vst.msk [vmem:[#allocation2 + $0x138] sm:$0x1] %vm1761_vm13, %v5405_v59 }
  0xf8   : > { %774 = vst.msk [vmem:[#allocation4 + $0x30] sm:$0xff] %vm767_vm4, %v732_v17  ;;  %5149 = vmatmul.mubr.msk.bf16.gmra.mrb[8].mxu0 %vm7182_vm10, %v1435_v53  ;;  %v734_v18 = vpop.permute.xlu1 %733 }
  0xf9   : > { %1389 = vrot.lane.b32.xlu0 %v958_v14, %s5404_s21  ;;  %775 = vst.msk [vmem:[#allocation4 + $0x38] sm:$0xff] %vm767_vm4, %v734_v18 }
  0xfa   : > { %488 = vrot.lane.b32.xlu1 %v829_v0, %s7179_s26  ;;  %1776 = vst.msk [vmem:[#allocation2 + $0x150] sm:$0x1] %vm1761_vm13, %v5405_v59  ;;  %1777 = vst.msk [vmem:[#allocation2 + $0x168] sm:$0x1] %vm1761_vm13, %v5405_v59 }
  0xfb   : > { %v861_v20 = vpop.permute.xlu0 %860  ;;  %1778 = vst.msk [vmem:[#allocation2 + $0x180] sm:$0x1] %vm1761_vm13, %v5405_v59  ;;  %1780 = vst.msk [vmem:[#allocation2 + $0x11] sm:$0x1] %vm1761_vm13, %v5405_v59 }
  0xfc   : > { %903 = vst.msk [vmem:[#allocation4 + $0x30] sm:$0xff] %vm7188_vm5, %v861_v20  ;;  %v863_v21 = vpop.permute.xlu1 %862 }
  0xfd   : > { %1391 = vrot.lane.b32.xlu0 %v1346_v19, %s5404_s21  ;;  %904 = vst.msk [vmem:[#allocation4 + $0x38] sm:$0xff] %vm7188_vm5, %v863_v21 }
  0xfe   : > { %490 = vrot.lane.b32.xlu1 %v1217_v11, %s7179_s26  ;;  %1781 = vst.msk [vmem:[#allocation2 + $0x29] sm:$0x1] %vm1761_vm13, %v5405_v59  ;;  %1782 = vst.msk [vmem:[#allocation2 + $0x41] sm:$0x1] %vm1761_vm13, %v5405_v59  ;;  %s7193_s26 = smov 28  }
  0xff   : > { %v990_v22 = vpop.permute.xlu0 %989  ;;  %1783 = vst.msk [vmem:[#allocation2 + $0x59] sm:$0x1] %vm1761_vm13, %v5405_v59  ;;  %1784 = vst.msk [vmem:[#allocation2 + $0x71] sm:$0x1] %vm1761_vm13, %v5405_v59 }
 0x100   : > { %1032 = vst.msk [vmem:[#allocation4 + $0x30] sm:$0xff] %vm7186_vm6, %v990_v22  ;;  %v992_v26 = vpop.permute.xlu1 %991 }
 0x101   : > { %1033 = vst.msk [vmem:[#allocation4 + $0x38] sm:$0xff] %vm7186_vm6, %v992_v26  ;;  %617 = vrot.lane.b32.xlu0 %v958_v14, %s5398_s27 }
 0x102   : > { %619 = vrot.lane.b32.xlu1 %v1346_v19, %s5398_s27  ;;  %1785 = vst.msk [vmem:[#allocation2 + $0x89] sm:$0x1] %vm1761_vm13, %v5405_v59  ;;  %1786 = vst.msk [vmem:[#allocation2 + $0xa1] sm:$0x1] %vm1761_vm13, %v5405_v59  ;;  %v1992_v63 = vld [vmem:[#allocation2 + $0xa] sm:$0xff] }
 0x103   : > { %v1120_v28 = vpop.permute.xlu0 %1119  ;;  %1787 = vst.msk [vmem:[#allocation2 + $0xb9] sm:$0x1] %vm1761_vm13, %v5405_v59  ;;  %1788 = vst.msk [vmem:[#allocation2 + $0xd1] sm:$0x1] %vm1761_vm13, %v5405_v59  ;;  %v2023_v2 = vpack.c.bf16 %v1992_v63, %v1991_v62  ;;  %v1798_v62 = vld [vmem:[#allocation2] sm:$0xff]  ;;  %v1799_v63 = vld [vmem:[#allocation2 + $0x8] sm:$0xff] }
 0x104   : > { %1162 = vst.msk [vmem:[#allocation4 + $0x30] sm:$0xff] %vm7185_vm7, %v1120_v28  ;;  %v1122_v31 = vpop.permute.xlu1 %1121 }
 0x105   : > { %1163 = vst.msk [vmem:[#allocation4 + $0x38] sm:$0xff] %vm7185_vm7, %v1122_v31  ;;  %747 = vrot.lane.b32.xlu0 %v5700_v32, %s7177_s28  ;;  %v5911_v32 = vpack.c.bf16 %v4910_v36, %v4909_v35 }
 0x106   : > { %749 = vrot.lane.b32.xlu1 %v5892_v27, %s7177_s28  ;;  %1789 = vst.msk [vmem:[#allocation2 + $0xe9] sm:$0x1] %vm1761_vm13, %v5405_v59  ;;  %1790 = vst.msk [vmem:[#allocation2 + $0x101] sm:$0x1] %vm1761_vm13, %v5405_v59  ;;  %s7194_s28 = smov 20  }
 0x107   : > { %v1249_v34 = vpop.permute.xlu0 %1248  ;;  %1791 = vst.msk [vmem:[#allocation2 + $0x119] sm:$0x1] %vm1761_vm13, %v5405_v59  ;;  %1792 = vst.msk [vmem:[#allocation2 + $0x131] sm:$0x1] %vm1761_vm13, %v5405_v59 }
 0x108   : > { %1291 = vst.msk [vmem:[#allocation4 + $0x30] sm:$0xff] %vm7184_vm8, %v1249_v34  ;;  %v1251_v38 = vpop.permute.xlu1 %1250 }
 0x109   : > { %1292 = vst.msk [vmem:[#allocation4 + $0x38] sm:$0xff] %vm7184_vm8, %v1251_v38  ;;  %876 = vrot.lane.b32.xlu0 %v1217_v11, %s5400_s29 }
 0x10a   : > { %878 = vrot.lane.b32.xlu1 %v5902_v33, %s5400_s29  ;;  %1793 = vst.msk [vmem:[#allocation2 + $0x149] sm:$0x1] %vm1761_vm13, %v5405_v59  ;;  %1794 = vst.msk [vmem:[#allocation2 + $0x161] sm:$0x1] %vm1761_vm13, %v5405_v59 }
 0x10b   : > { %v1378_v39 = vpop.permute.xlu0 %1377  ;;  %1795 = vst.msk [vmem:[#allocation2 + $0x179] sm:$0x1] %vm1761_vm13, %v5405_v59  ;;  %1796 = vst.msk [vmem:[#allocation2 + $0x191] sm:$0x1] %vm1761_vm13, %v5405_v59 }
 0x10c   : > { %1420 = vst.msk [vmem:[#allocation4 + $0x30] sm:$0xff] %vm7183_vm9, %v1378_v39  ;;  %v477_v43 = vpop.permute.xlu1 %476 }
 0x10d   : > { %517 = vst.msk [vmem:[#allocation4 + $0x40] sm:$0xff] %vm508_vm2, %v477_v43  ;;  %1005 = vrot.lane.b32.xlu0 %v1346_v19, %s7173_s14 }
 0x10e   : > { %1007 = vrot.lane.b32.xlu1 %v5911_v32, %s7173_s14  ;;  %1779 = vst.msk [vmem:[#allocation2 + $0x198] sm:$0x1] %vm1761_vm13, %v5405_v59  ;;  %1797 = vst.msk [vmem:[#allocation2 + $0x1a9] sm:$0x1] %vm1761_vm13, %v5405_v59  ;;  %vm2232_vm13 = vcmask 261312  }
 0x10f   : > { %v1380_v37 = vpop.permute.xlu0 %1379 }
 0x110   : > { %1421 = vst.msk [vmem:[#allocation4 + $0x38] sm:$0xff] %vm7183_vm9, %v1380_v37  ;;  %v479_v48 = vpop.permute.xlu1 %478 }
 0x111   : > { %518 = vst.msk [vmem:[#allocation4 + $0x48] sm:$0xff] %vm508_vm2, %v479_v48  ;;  %1135 = vrot.lane.b32.xlu0 %v5892_v27, %s5402_s23 }
 0x112   : > { %1137 = vrot.lane.b32.xlu1 %v1090_v44, %s5402_s23 }
 0x113   : > { %v606_v7 = vpop.permute.xlu0 %605  ;;  %v1436_v50 = vld [vmem:[#allocation4 + $0x30] sm:$0xff] }
 0x114   : > { %646 = vst.msk [vmem:[#allocation4 + $0x40] sm:$0xff] %vm637_vm3, %v606_v7  ;;  %5152 = vmatprep.mubr.msk.bf16.mxu0 %vm7182_vm10, %v1436_v50  ;;  %v608_v41 = vpop.permute.xlu1 %607 }
 0x115   : > { %647 = vst.msk [vmem:[#allocation4 + $0x48] sm:$0xff] %vm637_vm3, %v608_v41  ;;  %1264 = vrot.lane.b32.xlu0 %v5902_v33, %s7175_s17 }
 0x116   : > { %1266 = vrot.lane.b32.xlu1 %v1219_v49, %s7175_s17 }
 0x117   : > { %v736_v57 = vpop.permute.xlu0 %735  ;;  %v1437_v58 = vld [vmem:[#allocation4 + $0x38] sm:$0xff] }
 0x118   : > { %776 = vst.msk [vmem:[#allocation4 + $0x40] sm:$0xff] %vm767_vm4, %v736_v57  ;;  %5153 = vmatmul.mubr.msk.bf16.gmra.mrb[12].mxu0 %vm7182_vm10, %v1437_v58  ;;  %v738_v60 = vpop.permute.xlu1 %737 }
 0x119   : > { %777 = vst.msk [vmem:[#allocation4 + $0x48] sm:$0xff] %vm767_vm4, %v738_v60  ;;  %1393 = vrot.lane.b32.xlu0 %v5911_v32, %s5404_s21 }
 0x11a   : > { %1395 = vrot.lane.b32.xlu1 %v1348_v54, %s5404_s21 }
 0x11b   : > { %v865_v0 = vpop.permute.xlu0 %864 }
 0x11c   : > { %905 = vst.msk [vmem:[#allocation4 + $0x40] sm:$0xff] %vm7188_vm5, %v865_v0  ;;  %v867_v1 = vpop.permute.xlu1 %866  ;;  %v1830_v0 = vpack.c.bf16 %v1799_v63, %v1798_v62 }
 0x11d   : > { %906 = vst.msk [vmem:[#allocation4 + $0x48] sm:$0xff] %vm7188_vm5, %v867_v1  ;;  %1926 = vrot.lane.b32.xlu0 %v1894_v61, %s5398_s27 }
 0x11e   : > { %1846 = vst.msk [vmem:[#allocation4] sm:$0xff] %vm7187_vm11, %v1830_v0 }
 0x11f   : > { %v994_v3 = vpop.permute.xlu0 %993 }
 0x120   : > { %1034 = vst.msk [vmem:[#allocation4 + $0x40] sm:$0xff] %vm7186_vm6, %v994_v3  ;;  %v996_v4 = vpop.permute.xlu1 %995  ;;  %v6099_v3 = vld [vmem:[%s7165_s2] ss:$0 sm:$0xff] }
 0x121   : > { %1035 = vst.msk [vmem:[#allocation4 + $0x48] sm:$0xff] %vm7186_vm6, %v996_v4  ;;  %2055 = vrot.lane.b32.xlu0 %v2023_v2, %s5400_s29 }
 0x123   : > { %v1124_v14 = vpop.permute.xlu0 %1123 }
 0x124   : > { %1164 = vst.msk [vmem:[#allocation4 + $0x40] sm:$0xff] %vm7185_vm7, %v1124_v14  ;;  %v1126_v5 = vpop.permute.xlu1 %1125 }
 0x125   : > { %1165 = vst.msk [vmem:[#allocation4 + $0x48] sm:$0xff] %vm7185_vm7, %v1126_v5 }
 0x127   : > { %v1253_v47 = vpop.permute.xlu0 %1252 }
 0x128   : > { %1293 = vst.msk [vmem:[#allocation4 + $0x40] sm:$0xff] %vm7184_vm8, %v1253_v47  ;;  %v1255_v6 = vpop.permute.xlu1 %1254 }
 0x129   : > { %1294 = vst.msk [vmem:[#allocation4 + $0x48] sm:$0xff] %vm7184_vm8, %v1255_v6 }
 0x12b   : > { %v1382_v8 = vpop.permute.xlu0 %1381 }
 0x12c   : > { %1422 = vst.msk [vmem:[#allocation4 + $0x40] sm:$0xff] %vm7183_vm9, %v1382_v8  ;;  %v481_v9 = vpop.permute.xlu1 %480 }
 0x12d   : > { %519 = vst.msk [vmem:[#allocation4 + $0x50] sm:$0xff] %vm508_vm2, %v481_v9 }
 0x12f   : > { %v1384_v10 = vpop.permute.xlu0 %1383 }
 0x130   : > { %1423 = vst.msk [vmem:[#allocation4 + $0x48] sm:$0xff] %vm7183_vm9, %v1384_v10  ;;  %v483_v11 = vpop.permute.xlu1 %482 }
 0x131   : > { %520 = vst.msk [vmem:[#allocation4 + $0x58] sm:$0xff] %vm508_vm2, %v483_v11 }
 0x133   : > { %v610_v12 = vpop.permute.xlu0 %609  ;;  %v1438_v13 = vld [vmem:[#allocation4 + $0x40] sm:$0xff] }
 0x134   : > { %648 = vst.msk [vmem:[#allocation4 + $0x50] sm:$0xff] %vm637_vm3, %v610_v12  ;;  %v612_v15 = vpop.permute.xlu1 %611  ;;  %5156 = vmatprep.mubr.msk.bf16.mxu0 %vm7182_vm10, %v1438_v13 }
 0x135   : > { %649 = vst.msk [vmem:[#allocation4 + $0x58] sm:$0xff] %vm637_vm3, %v612_v15 }
 0x137   : > { %v740_v25 = vpop.permute.xlu0 %739  ;;  %v1439_v16 = vld [vmem:[#allocation4 + $0x48] sm:$0xff] }
 0x138   : > { %778 = vst.msk [vmem:[#allocation4 + $0x50] sm:$0xff] %vm767_vm4, %v740_v25  ;;  %5157 = vmatmul.mubr.msk.bf16.gmra.mrb[16].mxu0 %vm7182_vm10, %v1439_v16  ;;  %v742_v17 = vpop.permute.xlu1 %741 }
 0x139   : > { %779 = vst.msk [vmem:[#allocation4 + $0x58] sm:$0xff] %vm767_vm4, %v742_v17 }
 0x13b   : > { %v869_v53 = vpop.permute.xlu0 %868 }
 0x13c   : > { %907 = vst.msk [vmem:[#allocation4 + $0x50] sm:$0xff] %vm7188_vm5, %v869_v53  ;;  %v871_v18 = vpop.permute.xlu1 %870 }
 0x13d   : > { %908 = vst.msk [vmem:[#allocation4 + $0x58] sm:$0xff] %vm7188_vm5, %v871_v18 }
 0x13f   : > { %v998_v19 = vpop.permute.xlu0 %997 }
 0x140   : > { %1036 = vst.msk [vmem:[#allocation4 + $0x50] sm:$0xff] %vm7186_vm6, %v998_v19  ;;  %v1000_v20 = vpop.permute.xlu1 %999 }
 0x141   : > { %1037 = vst.msk [vmem:[#allocation4 + $0x58] sm:$0xff] %vm7186_vm6, %v1000_v20 }
 0x143   : > { %v1128_v21 = vpop.permute.xlu0 %1127 }
 0x144   : > { %1166 = vst.msk [vmem:[#allocation4 + $0x50] sm:$0xff] %vm7185_vm7, %v1128_v21  ;;  %v1130_v22 = vpop.permute.xlu1 %1129 }
 0x145   : > { %1167 = vst.msk [vmem:[#allocation4 + $0x58] sm:$0xff] %vm7185_vm7, %v1130_v22 }
 0x147   : > { %v1257_v23 = vpop.permute.xlu0 %1256 }
 0x148   : > { %1295 = vst.msk [vmem:[#allocation4 + $0x50] sm:$0xff] %vm7184_vm8, %v1257_v23  ;;  %v1259_v24 = vpop.permute.xlu1 %1258 }
 0x149   : > { %1296 = vst.msk [vmem:[#allocation4 + $0x58] sm:$0xff] %vm7184_vm8, %v1259_v24 }
 0x14b   : > { %v1386_v26 = vpop.permute.xlu0 %1385 }
 0x14c   : > { %1424 = vst.msk [vmem:[#allocation4 + $0x50] sm:$0xff] %vm7183_vm9, %v1386_v26  ;;  %v485_v27 = vpop.permute.xlu1 %484 }
 0x14d   : > { %521 = vst.msk [vmem:[#allocation4 + $0x60] sm:$0xff] %vm508_vm2, %v485_v27 }
 0x14f   : > { %v1388_v28 = vpop.permute.xlu0 %1387 }
 0x150   : > { %1425 = vst.msk [vmem:[#allocation4 + $0x58] sm:$0xff] %vm7183_vm9, %v1388_v28  ;;  %v487_v29 = vpop.permute.xlu1 %486 }
 0x151   : > { %522 = vst.msk [vmem:[#allocation4 + $0x68] sm:$0xff] %vm508_vm2, %v487_v29 }
 0x153   : > { %v614_v30 = vpop.permute.xlu0 %613  ;;  %v1440_v31 = vld [vmem:[#allocation4 + $0x50] sm:$0xff] }
 0x154   : > { %650 = vst.msk [vmem:[#allocation4 + $0x60] sm:$0xff] %vm637_vm3, %v614_v30  ;;  %v616_v33 = vpop.permute.xlu1 %615  ;;  %5160 = vmatprep.mubr.msk.bf16.mxu1 %vm7182_vm10, %v1440_v31 }
 0x155   : > { %651 = vst.msk [vmem:[#allocation4 + $0x68] sm:$0xff] %vm637_vm3, %v616_v33 }
 0x157   : > { %v744_v34 = vpop.permute.xlu0 %743  ;;  %v1441_v35 = vld [vmem:[#allocation4 + $0x58] sm:$0xff] }
 0x158   : > { %780 = vst.msk [vmem:[#allocation4 + $0x60] sm:$0xff] %vm767_vm4, %v744_v34  ;;  %5161 = vmatmul.mubr.msk.bf16.vlgmr.msra.gmra.mrb[0].mxu1 %vm7182_vm10, %v1441_v35  ;;  %v746_v36 = vpop.permute.xlu1 %745 }
 0x159   : > { %781 = vst.msk [vmem:[#allocation4 + $0x68] sm:$0xff] %vm767_vm4, %v746_v36 }
 0x15b   : > { %v873_v38 = vpop.permute.xlu0 %872 }
 0x15c   : > { %909 = vst.msk [vmem:[#allocation4 + $0x60] sm:$0xff] %vm7188_vm5, %v873_v38  ;;  %v875_v32 = vpop.permute.xlu1 %874 }
 0x15d   : > { %910 = vst.msk [vmem:[#allocation4 + $0x68] sm:$0xff] %vm7188_vm5, %v875_v32 }
 0x15f   : > { %v1002_v39 = vpop.permute.xlu0 %1001 }
 0x160   : > { %1038 = vst.msk [vmem:[#allocation4 + $0x60] sm:$0xff] %vm7186_vm6, %v1002_v39  ;;  %v1004_v40 = vpop.permute.xlu1 %1003 }
 0x161   : > { %1039 = vst.msk [vmem:[#allocation4 + $0x68] sm:$0xff] %vm7186_vm6, %v1004_v40 }
 0x163   : > { %v1132_v42 = vpop.permute.xlu0 %1131 }
 0x164   : > { %1168 = vst.msk [vmem:[#allocation4 + $0x60] sm:$0xff] %vm7185_vm7, %v1132_v42  ;;  %v1134_v43 = vpop.permute.xlu1 %1133 }
 0x165   : > { %1169 = vst.msk [vmem:[#allocation4 + $0x68] sm:$0xff] %vm7185_vm7, %v1134_v43 }
 0x167   : > { %v1261_v44 = vpop.permute.xlu0 %1260 }
 0x168   : > { %1297 = vst.msk [vmem:[#allocation4 + $0x60] sm:$0xff] %vm7184_vm8, %v1261_v44  ;;  %v1263_v37 = vpop.permute.xlu1 %1262 }
 0x169   : > { %1298 = vst.msk [vmem:[#allocation4 + $0x68] sm:$0xff] %vm7184_vm8, %v1263_v37 }
 0x16b   : > { %v1390_v45 = vpop.permute.xlu0 %1389 }
 0x16c   : > { %1426 = vst.msk [vmem:[#allocation4 + $0x60] sm:$0xff] %vm7183_vm9, %v1390_v45  ;;  %v489_v46 = vpop.permute.xlu1 %488 }
 0x16d   : > { %523 = vst.msk [vmem:[#allocation4 + $0x70] sm:$0xff] %vm508_vm2, %v489_v46 }
 0x16f   : > { %v1392_v48 = vpop.permute.xlu0 %1391 }
 0x170   : > { %1427 = vst.msk [vmem:[#allocation4 + $0x68] sm:$0xff] %vm7183_vm9, %v1392_v48  ;;  %v491_v49 = vpop.permute.xlu1 %490 }
 0x171   : > { %524 = vst.msk [vmem:[#allocation4 + $0x78] sm:$0xff] %vm508_vm2, %v491_v49 }
 0x173   : > { %v618_v7 = vpop.permute.xlu0 %617  ;;  %v1442_v50 = vld [vmem:[#allocation4 + $0x60] sm:$0xff] }
 0x174   : > { %652 = vst.msk [vmem:[#allocation4 + $0x70] sm:$0xff] %vm637_vm3, %v618_v7  ;;  %v620_v51 = vpop.permute.xlu1 %619  ;;  %5164 = vmatprep.mubr.msk.bf16.mxu1 %vm7182_vm10, %v1442_v50 }
 0x175   : > { %653 = vst.msk [vmem:[#allocation4 + $0x78] sm:$0xff] %vm637_vm3, %v620_v51 }
 0x177   : > { %v1443_v52 = vld [vmem:[#allocation4 + $0x68] sm:$0xff]  ;;  %v748_v41 = vpop.permute.xlu0 %747 }
 0x178   : > { %5165 = vmatmul.mubr.msk.bf16.gmra.mrb[4].mxu1 %vm7182_vm10, %v1443_v52  ;;  %782 = vst.msk [vmem:[#allocation4 + $0x70] sm:$0xff] %vm767_vm4, %v748_v41  ;;  %v750_v54 = vpop.permute.xlu1 %749  ;;  %v5325_v52 = vld [vmem:[%s7166_s3] sm:$0xff]  }
 0x179   : > { %783 = vst.msk [vmem:[#allocation4 + $0x78] sm:$0xff] %vm767_vm4, %v750_v54  ;;  %5172 = vmatprep.subr.bf16.mxu1 %v5325_v52 }
 0x17a   : > { %5173 = vmatpush3.bf16.msra.mxu1 %v5325_v52 }
 0x17b   : > { %v877_v55 = vpop.permute.xlu0 %876 }
 0x17c   : > { %911 = vst.msk [vmem:[#allocation4 + $0x70] sm:$0xff] %vm7188_vm5, %v877_v55  ;;  %v879_v56 = vpop.permute.xlu1 %878 }
 0x17d   : > { %912 = vst.msk [vmem:[#allocation4 + $0x78] sm:$0xff] %vm7188_vm5, %v879_v56  ;;  %vm3209_vm5 = vcmask 24576  }
 0x17e   : > { %3210 = vst.msk [vmem:[#allocation3] sm:$0x1] %vm3209_vm5, %v5405_v59  ;;  %3211 = vst.msk [vmem:[#allocation3 + $0x18] sm:$0x1] %vm3209_vm5, %v5405_v59 }
 0x17f   : > { %v1006_v57 = vpop.permute.xlu0 %1005  ;;  %3212 = vst.msk [vmem:[#allocation3 + $0x30] sm:$0x1] %vm3209_vm5, %v5405_v59  ;;  %3213 = vst.msk [vmem:[#allocation3 + $0x48] sm:$0x1] %vm3209_vm5, %v5405_v59 }
 0x180   : > { %1040 = vst.msk [vmem:[#allocation4 + $0x70] sm:$0xff] %vm7186_vm6, %v1006_v57  ;;  %v1008_v58 = vpop.permute.xlu1 %1007 }
 0x181   : > { %1041 = vst.msk [vmem:[#allocation4 + $0x78] sm:$0xff] %vm7186_vm6, %v1008_v58  ;;  %vm2954_vm6 = vcmask 588800  }
 0x182   : > { %3214 = vst.msk [vmem:[#allocation3 + $0x60] sm:$0x1] %vm3209_vm5, %v5405_v59  ;;  %3215 = vst.msk [vmem:[#allocation3 + $0x78] sm:$0x1] %vm3209_vm5, %v5405_v59 }
 0x183   : > { %v1136_v60 = vpop.permute.xlu0 %1135  ;;  %3216 = vst.msk [vmem:[#allocation3 + $0x90] sm:$0x1] %vm3209_vm5, %v5405_v59  ;;  %3217 = vst.msk [vmem:[#allocation3 + $0xa8] sm:$0x1] %vm3209_vm5, %v5405_v59 }
 0x184   : > { %1170 = vst.msk [vmem:[#allocation4 + $0x70] sm:$0xff] %vm7185_vm7, %v1136_v60  ;;  %v1138_v61 = vpop.permute.xlu1 %1137  ;;  %v5326_v60 = vld [vmem:[%s7166_s3 + $0x8] sm:$0xff]  }
 0x185   : > { %1171 = vst.msk [vmem:[#allocation4 + $0x78] sm:$0xff] %vm7185_vm7, %v1138_v61  ;;  %5174 = vmatprep.subr.bf16.mxu1 %v5326_v60  ;;  %vm2878_vm7 = vcmask 589312  }
 0x186   : > { %5175 = vmatpush3.bf16.msra.mxu1 %v5326_v60  ;;  %3218 = vst.msk [vmem:[#allocation3 + $0xc0] sm:$0x1] %vm3209_vm5, %v5405_v59  ;;  %3219 = vst.msk [vmem:[#allocation3 + $0xd8] sm:$0x1] %vm3209_vm5, %v5405_v59 }
 0x187   : > { %v1265_v1 = vpop.permute.xlu0 %1264  ;;  %3220 = vst.msk [vmem:[#allocation3 + $0xf0] sm:$0x1] %vm3209_vm5, %v5405_v59  ;;  %3221 = vst.msk [vmem:[#allocation3 + $0x108] sm:$0x1] %vm3209_vm5, %v5405_v59 }
 0x188   : > { %1299 = vst.msk [vmem:[#allocation4 + $0x70] sm:$0xff] %vm7184_vm8, %v1265_v1  ;;  %v1267_v2 = vpop.permute.xlu1 %1266 }
 0x189   : > { %1300 = vst.msk [vmem:[#allocation4 + $0x78] sm:$0xff] %vm7184_vm8, %v1267_v2  ;;  %v5327_v2 = vld [vmem:[%s7166_s3 + $0x10] sm:$0xff]   ;;  %vm2749_vm8 = vcmask 523712  }
 0x18a   : > { %5176 = vmatprep.subr.bf16.mxu1 %v5327_v2  ;;  %3222 = vst.msk [vmem:[#allocation3 + $0x120] sm:$0x1] %vm3209_vm5, %v5405_v59  ;;  %3223 = vst.msk [vmem:[#allocation3 + $0x138] sm:$0x1] %vm3209_vm5, %v5405_v59 }
 0x18b   : > { %v5142_v4 = vpop.f32.mrb[0].mxu0  ;;  %v1394_v14 = vpop.permute.xlu0 %1393  ;;  %5177 = vmatpush3.bf16.msra.mxu1 %v5327_v2  ;;  %3224 = vst.msk [vmem:[#allocation3 + $0x150] sm:$0x1] %vm3209_vm5, %v5405_v59  ;;  %3225 = vst.msk [vmem:[#allocation3 + $0x168] sm:$0x1] %vm3209_vm5, %v5405_v59 }
 0x18c   : > { %v1569_v5 = vadd.f32 %v5142_v4, %v6099_v3  ;;  %v1560_v47 = vpop.f32.mrb[1].mxu0  ;;  %1428 = vst.msk [vmem:[#allocation4 + $0x70] sm:$0xff] %vm7183_vm9, %v1394_v14  ;;  %v1396_v6 = vpop.permute.xlu1 %1395  ;;  %v5328_v14 = vld [vmem:[%s7166_s3 + $0x18] sm:$0xff]  }
 0x18d   : > { %v1561_v8 = vadd.f32 %v6099_v3, %v1560_v47  ;;  %v5143_v9 = vpop.f32.mrb[2].mxu0  ;;  %1429 = vst.msk [vmem:[#allocation4 + $0x78] sm:$0xff] %vm7183_vm9, %v1396_v6  ;;  %5178 = vmatprep.subr.bf16.mxu1 %v5328_v14  ;;  %v5329_v6 = vld [vmem:[%s7166_s3 + $0x20] ss:$0 sps:$4 sm:$0xff]   ;;  %vm2620_vm9 = vcmask 458112  }
 0x18e   : > { %v1689_v10 = vmax.f32 %v1569_v5, 0.0  ;;  %v1572_v11 = vadd.f32 %v5143_v9, %v6099_v3  ;;  %v1563_v12 = vpop.f32.mrb[3].mxu0  ;;  %3226 = vst.msk [vmem:[#allocation3 + $0x180] sm:$0x1] %vm3209_vm5, %v5405_v59  ;;  %3227 = vst.msk [vmem:[#allocation3 + $0x198] sm:$0x1] %vm3209_vm5, %v5405_v59 }
 0x18f   : > { %v1687_v13 = vmax.f32 %v1561_v8, 0.0  ;;  %v1564_v15 = vadd.f32 %v6099_v3, %v1563_v12  ;;  %v1927_v25 = vpop.permute.xlu0 %1926  ;;  %5179 = vmatpush3.bf16.msra.mxu1 %v5328_v14  ;;  %v3005_v8 = vsel %vm7181_vm12, %v5329_v6, 0  ;;  %3229 = vst.msk [vmem:[#allocation3 + $0x29] sm:$0x1] %vm3209_vm5, %v5405_v59  ;;  %3230 = vst.msk [vmem:[#allocation3 + $0x41] sm:$0x1] %vm3209_vm5, %v5405_v59 }
 0x190   : > { %1723 = vst.msk [vmem:[#allocation2 + $0x31] sm:$0xff] %vm7187_vm11, %v1689_v10  ;;  %v1690_v16 = vmax.f32 %v1572_v11, 0.0  ;;  %5266 = vmatprep.subr.msk.bf16.mxu1 %vm7181_vm12, %v5329_v6  ;;  %vm2361_vm12 = vcmask 326912  }
 0x191   : > { %1975 = vst.msk [vmem:[#allocation4] sm:$0xff] %vm1974_vm14, %v1927_v25  ;;  %v1688_v17 = vmax.f32 %v1564_v15, 0.0 }
 0x192   : > { %1721 = vst.msk [vmem:[#allocation2 + $0x19] sm:$0xff] %vm7187_vm11, %v1687_v13  ;;  %1724 = vst.msk [vmem:[#allocation2 + $0x39] sm:$0xff] %vm7187_vm11, %v1690_v16 }
 0x193   : > { %1722 = vst.msk [vmem:[#allocation2 + $0x21] sm:$0xff] %vm7187_vm11, %v1688_v17  ;;  %v1444_v53 = vld [vmem:[#allocation4 + $0x70] sm:$0xff]  ;;  %v2056_v18 = vpop.permute.xlu0 %2055  ;;  %5181 = vmatpush3.bf16.msra.mxu1 %v3005_v8 }
 0x194   : > { %5168 = vmatprep.mubr.msk.bf16.mxu1 %vm7182_vm10, %v1444_v53  ;;  %v1445_v19 = vld [vmem:[#allocation4 + $0x78] sm:$0xff]  ;;  %2104 = vst.msk [vmem:[#allocation4] sm:$0xff] %vm2103_vm15, %v2056_v18  ;;  %5252 = vmatprep.subr.bf16.mxu1 %v5405_v59 }
 0x195   : > { %5169 = vmatmul.mubr.msk.bf16.gmra.mrb[8].mxu1 %vm7182_vm10, %v1445_v19  ;;  %vm2490_vm10 = vcmask 392512   ;;  %3231 = vst.msk [vmem:[#allocation3 + $0x59] sm:$0x1] %vm3209_vm5, %v5405_v59  ;;  %3232 = vst.msk [vmem:[#allocation3 + $0x71] sm:$0x1] %vm3209_vm5, %v5405_v59 }
 0x196   : > { %3233 = vst.msk [vmem:[#allocation3 + $0x89] sm:$0x1] %vm3209_vm5, %v5405_v59  ;;  %3234 = vst.msk [vmem:[#allocation3 + $0xa1] sm:$0x1] %vm3209_vm5, %v5405_v59 }
 0x197   : > { %v2508_v20 = vld [vmem:[#allocation2 + $0x30] sm:$0xff]  ;;  %3235 = vst.msk [vmem:[#allocation3 + $0xb9] sm:$0x1] %vm3209_vm5, %v5405_v59  ;;  %3236 = vst.msk [vmem:[#allocation3 + $0xd1] sm:$0x1] %vm3209_vm5, %v5405_v59 }
 0x198   : > { %v2637_v28 = vld [vmem:[#allocation2 + $0x31] sm:$0xff]  ;;  %3237 = vst.msk [vmem:[#allocation3 + $0xe9] sm:$0x1] %vm3209_vm5, %v5405_v59  ;;  %3238 = vst.msk [vmem:[#allocation3 + $0x101] sm:$0x1] %vm3209_vm5, %v5405_v59 }
 0x199   : > { %v2509_v21 = vld [vmem:[#allocation2 + $0x38] sm:$0xff]  ;;  %3239 = vst.msk [vmem:[#allocation3 + $0x119] sm:$0x1] %vm3209_vm5, %v5405_v59  ;;  %3240 = vst.msk [vmem:[#allocation3 + $0x131] sm:$0x1] %vm3209_vm5, %v5405_v59 }
 0x19a   : > { %v2540_v22 = vpack.c.bf16 %v2509_v21, %v2508_v20  ;;  %v2120_v23 = vld [vmem:[#allocation2 + $0x18] sm:$0xff]  ;;  %v2121_v24 = vld [vmem:[#allocation2 + $0x20] sm:$0xff]  ;;  %3241 = vst.msk [vmem:[#allocation3 + $0x149] sm:$0x1] %vm3209_vm5, %v5405_v59  ;;  %3242 = vst.msk [vmem:[#allocation3 + $0x161] sm:$0x1] %vm3209_vm5, %v5405_v59 }
 0x19b   : > { %v2638_v26 = vld [vmem:[#allocation2 + $0x39] sm:$0xff]  ;;  %v2152_v27 = vpack.c.bf16 %v2121_v24, %v2120_v23  ;;  %v1865_v34 = vld [vmem:[#allocation2 + $0x21] sm:$0xff]  ;;  %3243 = vst.msk [vmem:[#allocation3 + $0x179] sm:$0x1] %vm3209_vm5, %v5405_v59  ;;  %3244 = vst.msk [vmem:[#allocation3 + $0x191] sm:$0x1] %vm3209_vm5, %v5405_v59 }
 0x19c   : > { %2572 = vrot.lane.b32.xlu0 %v2540_v22, %s5406_s24  ;;  %2186 = vrot.lane.b32.xlu1 %v2540_v22, %s5402_s23  ;;  %1848 = vst.msk [vmem:[#allocation4 + $0x10] sm:$0xff] %vm7187_vm11, %v2540_v22  ;;  %v2669_v29 = vpack.c.bf16 %v2638_v26, %v2637_v28  ;;  %v2766_v30 = vld [vmem:[#allocation2 + $0x32] sm:$0xff]  ;;  %v2767_v31 = vld [vmem:[#allocation2 + $0x3a] sm:$0xff]  ;;  %v1994_v39 = vld [vmem:[#allocation2 + $0x22] sm:$0xff] }
 0x19d   : > { %1847 = vst.msk [vmem:[#allocation4 + $0x8] sm:$0xff] %vm7187_vm11, %v2152_v27  ;;  %v2798_v33 = vpack.c.bf16 %v2767_v31, %v2766_v30  ;;  %v1864_v35 = vld [vmem:[#allocation2 + $0x19] sm:$0xff] }
 0x19e   : > { %v1895_v36 = vpack.c.bf16 %v1865_v34, %v1864_v35  ;;  %v1993_v32 = vld [vmem:[#allocation2 + $0x1a] sm:$0xff] }
 0x19f   : > { %v2024_v48 = vpack.c.bf16 %v1994_v39, %v1993_v32 }
 0x1a0   : > { %2701 = vrot.lane.b32.xlu0 %v2669_v29, %s5407_s16  ;;  %2315 = vrot.lane.b32.xlu1 %v2669_v29, %s5404_s21 }
 0x1a4   : > { %2830 = vrot.lane.b32.xlu0 %v2798_v33, %s5408_s25  ;;  %2444 = vrot.lane.b32.xlu1 %v2798_v33, %s5409_s22 }
 0x1a8   : > { %2059 = vrot.lane.b32.xlu0 %v2798_v33, %s5400_s29  ;;  %1930 = vrot.lane.b32.xlu1 %v2669_v29, %s5398_s27 }
 0x1ab   : > { %v5146_v38 = vpop.f32.mrb[4].mxu0 }
 0x1ac   : > { %v1585_v40 = vadd.f32 %v5146_v38, %v6099_v3  ;;  %v1576_v42 = vpop.f32.mrb[5].mxu0  ;;  %2184 = vrot.lane.b32.xlu0 %v2152_v27, %s5402_s23  ;;  %1928 = vrot.lane.b32.xlu1 %v1895_v36, %s5398_s27 }
 0x1ad   : > { %v1577_v43 = vadd.f32 %v6099_v3, %v1576_v42  ;;  %v5147_v44 = vpop.f32.mrb[6].mxu0 }
 0x1ae   : > { %v1693_v37 = vmax.f32 %v1585_v40, 0.0  ;;  %v1588_v45 = vadd.f32 %v5147_v44, %v6099_v3  ;;  %v1579_v46 = vpop.f32.mrb[7].mxu0 }
 0x1af   : > { %v1691_v49 = vmax.f32 %v1577_v43, 0.0  ;;  %v1580_v7 = vadd.f32 %v6099_v3, %v1579_v46 }
 0x1b0   : > { %1727 = vst.msk [vmem:[#allocation2 + $0x61] sm:$0xff] %vm7187_vm11, %v1693_v37  ;;  %v1694_v50 = vmax.f32 %v1588_v45, 0.0  ;;  %2313 = vrot.lane.b32.xlu0 %v1895_v36, %s5404_s21  ;;  %2057 = vrot.lane.b32.xlu1 %v2024_v48, %s5400_s29 }
 0x1b1   : > { %1725 = vst.msk [vmem:[#allocation2 + $0x49] sm:$0xff] %vm7187_vm11, %v1691_v49  ;;  %v1692_v51 = vmax.f32 %v1580_v7, 0.0 }
 0x1b2   : > { %1728 = vst.msk [vmem:[#allocation2 + $0x69] sm:$0xff] %vm7187_vm11, %v1694_v50 }
 0x1b3   : > { %1726 = vst.msk [vmem:[#allocation2 + $0x51] sm:$0xff] %vm7187_vm11, %v1692_v51 }
 0x1b4   : > { %2442 = vrot.lane.b32.xlu0 %v2024_v48, %s5409_s22 }
 0x1b7   : > { %v2512_v41 = vld [vmem:[#allocation2 + $0x60] sm:$0xff] }
 0x1b8   : > { %v2510_v56 = vld [vmem:[#allocation2 + $0x48] sm:$0xff] }
 0x1b9   : > { %v2513_v54 = vld [vmem:[#allocation2 + $0x68] sm:$0xff] }
 0x1ba   : > { %v2542_v55 = vpack.c.bf16 %v2513_v54, %v2512_v41  ;;  %v2642_v57 = vld [vmem:[#allocation2 + $0x69] sm:$0xff]  ;;  %v2641_v62 = vld [vmem:[#allocation2 + $0x61] sm:$0xff]  ;;  %v2769_v47 = vld [vmem:[#allocation2 + $0x52] sm:$0xff] }
 0x1bb   : > { %v2511_v58 = vld [vmem:[#allocation2 + $0x50] sm:$0xff]  ;;  %v2671_v63 = vpack.c.bf16 %v2642_v57, %v2641_v62  ;;  %v2770_v0 = vld [vmem:[#allocation2 + $0x62] sm:$0xff] }
 0x1bc   : > { %2576 = vrot.lane.b32.xlu0 %v2542_v55, %s5406_s24  ;;  %2190 = vrot.lane.b32.xlu1 %v2542_v55, %s5402_s23  ;;  %v2541_v61 = vpack.c.bf16 %v2511_v58, %v2510_v56  ;;  %1850 = vst.msk [vmem:[#allocation4 + $0x20] sm:$0xff] %vm7187_vm11, %v2542_v55  ;;  %v2771_v1 = vld [vmem:[#allocation2 + $0x6a] sm:$0xff] }
 0x1bd   : > { %v2800_v4 = vpack.c.bf16 %v2771_v1, %v2770_v0  ;;  %v2768_v5 = vld [vmem:[#allocation2 + $0x4a] sm:$0xff] }
 0x1be   : > { %1849 = vst.msk [vmem:[#allocation4 + $0x18] sm:$0xff] %vm7187_vm11, %v2541_v61  ;;  %v2799_v9 = vpack.c.bf16 %v2769_v47, %v2768_v5  ;;  %v2640_v11 = vld [vmem:[#allocation2 + $0x51] sm:$0xff]  ;;  %v2639_v16 = vld [vmem:[#allocation2 + $0x49] sm:$0xff] }
 0x1bf   : > { %v2670_v19 = vpack.c.bf16 %v2640_v11, %v2639_v16 }
 0x1c0   : > { %2705 = vrot.lane.b32.xlu0 %v2671_v63, %s5407_s16  ;;  %2319 = vrot.lane.b32.xlu1 %v2671_v63, %s5404_s21 }
 0x1c4   : > { %2834 = vrot.lane.b32.xlu0 %v2800_v4, %s5408_s25  ;;  %2448 = vrot.lane.b32.xlu1 %v2800_v4, %s5409_s22 }
 0x1c8   : > { %2063 = vrot.lane.b32.xlu0 %v2800_v4, %s5400_s29  ;;  %1934 = vrot.lane.b32.xlu1 %v2671_v63, %s5398_s27 }
 0x1cb   : > { %v5150_v10 = vpop.f32.mrb[8].mxu0 }
 0x1cc   : > { %v1601_v12 = vadd.f32 %v5150_v10, %v6099_v3  ;;  %v1592_v13 = vpop.f32.mrb[9].mxu0  ;;  %2832 = vrot.lane.b32.xlu0 %v2799_v9, %s5408_s25  ;;  %2574 = vrot.lane.b32.xlu1 %v2541_v61, %s5406_s24 }
 0x1cd   : > { %v1593_v15 = vadd.f32 %v6099_v3, %v1592_v13  ;;  %v5151_v25 = vpop.f32.mrb[10].mxu0 }
 0x1ce   : > { %v1697_v17 = vmax.f32 %v1601_v12, 0.0  ;;  %v1604_v53 = vadd.f32 %v5151_v25, %v6099_v3  ;;  %v1595_v18 = vpop.f32.mrb[11].mxu0 }
 0x1cf   : > { %v1695_v20 = vmax.f32 %v1593_v15, 0.0  ;;  %v1596_v21 = vadd.f32 %v6099_v3, %v1595_v18 }
 0x1d0   : > { %1731 = vst.msk [vmem:[#allocation2 + $0x91] sm:$0xff] %vm7187_vm11, %v1697_v17  ;;  %v1698_v22 = vmax.f32 %v1604_v53, 0.0  ;;  %2188 = vrot.lane.b32.xlu0 %v2541_v61, %s5402_s23  ;;  %2703 = vrot.lane.b32.xlu1 %v2670_v19, %s5407_s16 }
 0x1d1   : > { %1729 = vst.msk [vmem:[#allocation2 + $0x79] sm:$0xff] %vm7187_vm11, %v1695_v20  ;;  %v1696_v23 = vmax.f32 %v1596_v21, 0.0 }
 0x1d2   : > { %1732 = vst.msk [vmem:[#allocation2 + $0x99] sm:$0xff] %vm7187_vm11, %v1698_v22 }
 0x1d3   : > { %1730 = vst.msk [vmem:[#allocation2 + $0x81] sm:$0xff] %vm7187_vm11, %v1696_v23 }
 0x1d4   : > { %2317 = vrot.lane.b32.xlu0 %v2670_v19, %s5404_s21  ;;  %1932 = vrot.lane.b32.xlu1 %v2670_v19, %s5398_s27 }
 0x1d7   : > { %v2516_v24 = vld [vmem:[#allocation2 + $0x90] sm:$0xff] }
 0x1d8   : > { %2446 = vrot.lane.b32.xlu0 %v2799_v9, %s5409_s22  ;;  %2061 = vrot.lane.b32.xlu1 %v2799_v9, %s5400_s29  ;;  %v2514_v29 = vld [vmem:[#allocation2 + $0x78] sm:$0xff] }
 0x1d9   : > { %v2517_v26 = vld [vmem:[#allocation2 + $0x98] sm:$0xff] }
 0x1da   : > { %v2544_v27 = vpack.c.bf16 %v2517_v26, %v2516_v24  ;;  %v2646_v28 = vld [vmem:[#allocation2 + $0x99] sm:$0xff]  ;;  %v2645_v33 = vld [vmem:[#allocation2 + $0x91] sm:$0xff]  ;;  %v2773_v39 = vld [vmem:[#allocation2 + $0x82] sm:$0xff] }
 0x1db   : > { %v2515_v30 = vld [vmem:[#allocation2 + $0x80] sm:$0xff]  ;;  %v2673_v34 = vpack.c.bf16 %v2646_v28, %v2645_v33  ;;  %v2774_v35 = vld [vmem:[#allocation2 + $0x92] sm:$0xff] }
 0x1dc   : > { %2580 = vrot.lane.b32.xlu0 %v2544_v27, %s5406_s24  ;;  %2194 = vrot.lane.b32.xlu1 %v2544_v27, %s5402_s23  ;;  %v2543_v31 = vpack.c.bf16 %v2515_v30, %v2514_v29  ;;  %1852 = vst.msk [vmem:[#allocation4 + $0x30] sm:$0xff] %vm7187_vm11, %v2544_v27  ;;  %v2775_v36 = vld [vmem:[#allocation2 + $0x9a] sm:$0xff] }
 0x1dd   : > { %v2802_v38 = vpack.c.bf16 %v2775_v36, %v2774_v35  ;;  %v2772_v32 = vld [vmem:[#allocation2 + $0x7a] sm:$0xff] }
 0x1de   : > { %1851 = vst.msk [vmem:[#allocation4 + $0x28] sm:$0xff] %vm7187_vm11, %v2543_v31  ;;  %v2801_v40 = vpack.c.bf16 %v2773_v39, %v2772_v32  ;;  %v2644_v43 = vld [vmem:[#allocation2 + $0x81] sm:$0xff]  ;;  %v2643_v48 = vld [vmem:[#allocation2 + $0x79] sm:$0xff] }
 0x1df   : > { %v2672_v51 = vpack.c.bf16 %v2644_v43, %v2643_v48 }
 0x1e0   : > { %2709 = vrot.lane.b32.xlu0 %v2673_v34, %s5407_s16  ;;  %2323 = vrot.lane.b32.xlu1 %v2673_v34, %s5404_s21 }
 0x1e4   : > { %2838 = vrot.lane.b32.xlu0 %v2802_v38, %s5408_s25  ;;  %2452 = vrot.lane.b32.xlu1 %v2802_v38, %s5409_s22 }
 0x1e8   : > { %2067 = vrot.lane.b32.xlu0 %v2802_v38, %s5400_s29  ;;  %1938 = vrot.lane.b32.xlu1 %v2673_v34, %s5398_s27 }
 0x1eb   : > { %v5154_v42 = vpop.f32.mrb[12].mxu0 }
 0x1ec   : > { %v1617_v44 = vadd.f32 %v5154_v42, %v6099_v3  ;;  %v1608_v37 = vpop.f32.mrb[13].mxu0  ;;  %2836 = vrot.lane.b32.xlu0 %v2801_v40, %s5408_s25  ;;  %2578 = vrot.lane.b32.xlu1 %v2543_v31, %s5406_s24 }
 0x1ed   : > { %v1609_v45 = vadd.f32 %v6099_v3, %v1608_v37  ;;  %v5155_v46 = vpop.f32.mrb[14].mxu0 }
 0x1ee   : > { %v1701_v49 = vmax.f32 %v1617_v44, 0.0  ;;  %v1620_v7 = vadd.f32 %v5155_v46, %v6099_v3  ;;  %v1611_v50 = vpop.f32.mrb[15].mxu0 }
 0x1ef   : > { %v1699_v52 = vmax.f32 %v1609_v45, 0.0  ;;  %v1612_v41 = vadd.f32 %v6099_v3, %v1611_v50 }
 0x1f0   : > { %1735 = vst.msk [vmem:[#allocation2 + $0xc1] sm:$0xff] %vm7187_vm11, %v1701_v49  ;;  %v1702_v54 = vmax.f32 %v1620_v7, 0.0  ;;  %2192 = vrot.lane.b32.xlu0 %v2543_v31, %s5402_s23  ;;  %2707 = vrot.lane.b32.xlu1 %v2672_v51, %s5407_s16 }
 0x1f1   : > { %1733 = vst.msk [vmem:[#allocation2 + $0xa9] sm:$0xff] %vm7187_vm11, %v1699_v52  ;;  %v1700_v55 = vmax.f32 %v1612_v41, 0.0 }
 0x1f2   : > { %1736 = vst.msk [vmem:[#allocation2 + $0xc9] sm:$0xff] %vm7187_vm11, %v1702_v54 }
 0x1f3   : > { %1734 = vst.msk [vmem:[#allocation2 + $0xb1] sm:$0xff] %vm7187_vm11, %v1700_v55 }
 0x1f4   : > { %2321 = vrot.lane.b32.xlu0 %v2672_v51, %s5404_s21  ;;  %1936 = vrot.lane.b32.xlu1 %v2672_v51, %s5398_s27 }
 0x1f7   : > { %v2520_v56 = vld [vmem:[#allocation2 + $0xc0] sm:$0xff] }
 0x1f8   : > { %2450 = vrot.lane.b32.xlu0 %v2801_v40, %s5409_s22  ;;  %2065 = vrot.lane.b32.xlu1 %v2801_v40, %s5400_s29  ;;  %v2518_v61 = vld [vmem:[#allocation2 + $0xa8] sm:$0xff] }
 0x1f9   : > { %v2521_v57 = vld [vmem:[#allocation2 + $0xc8] sm:$0xff] }
 0x1fa   : > { %v2546_v58 = vpack.c.bf16 %v2521_v57, %v2520_v56  ;;  %v2650_v60 = vld [vmem:[#allocation2 + $0xc9] sm:$0xff]  ;;  %v2649_v0 = vld [vmem:[#allocation2 + $0xc1] sm:$0xff]  ;;  %v2777_v47 = vld [vmem:[#allocation2 + $0xb2] sm:$0xff] }
 0x1fb   : > { %v2519_v62 = vld [vmem:[#allocation2 + $0xb0] sm:$0xff]  ;;  %v2675_v1 = vpack.c.bf16 %v2650_v60, %v2649_v0  ;;  %v2778_v2 = vld [vmem:[#allocation2 + $0xc2] sm:$0xff] }
 0x1fc   : > { %2584 = vrot.lane.b32.xlu0 %v2546_v58, %s5406_s24  ;;  %2198 = vrot.lane.b32.xlu1 %v2546_v58, %s5402_s23  ;;  %v2545_v63 = vpack.c.bf16 %v2519_v62, %v2518_v61  ;;  %1854 = vst.msk [vmem:[#allocation4 + $0x40] sm:$0xff] %vm7187_vm11, %v2546_v58  ;;  %v2779_v4 = vld [vmem:[#allocation2 + $0xca] sm:$0xff] }
 0x1fd   : > { %v2804_v14 = vpack.c.bf16 %v2779_v4, %v2778_v2  ;;  %v2776_v5 = vld [vmem:[#allocation2 + $0xaa] sm:$0xff] }
 0x1fe   : > { %1853 = vst.msk [vmem:[#allocation4 + $0x38] sm:$0xff] %vm7187_vm11, %v2545_v63  ;;  %v2803_v6 = vpack.c.bf16 %v2777_v47, %v2776_v5  ;;  %v2648_v9 = vld [vmem:[#allocation2 + $0xb1] sm:$0xff]  ;;  %v2647_v15 = vld [vmem:[#allocation2 + $0xa9] sm:$0xff] }
 0x1ff   : > { %v2674_v18 = vpack.c.bf16 %v2648_v9, %v2647_v15 }
 0x200   : > { %2713 = vrot.lane.b32.xlu0 %v2675_v1, %s5407_s16  ;;  %2327 = vrot.lane.b32.xlu1 %v2675_v1, %s5404_s21 }
 0x204   : > { %2842 = vrot.lane.b32.xlu0 %v2804_v14, %s5408_s25  ;;  %2456 = vrot.lane.b32.xlu1 %v2804_v14, %s5409_s22 }
 0x208   : > { %2071 = vrot.lane.b32.xlu0 %v2804_v14, %s5400_s29  ;;  %1942 = vrot.lane.b32.xlu1 %v2675_v1, %s5398_s27 }
 0x20b   : > { %v5158_v8 = vpop.f32.mrb[16].mxu0 }
 0x20c   : > { %v1633_v10 = vadd.f32 %v5158_v8, %v6099_v3  ;;  %v1624_v11 = vpop.f32.mrb[17].mxu0  ;;  %2840 = vrot.lane.b32.xlu0 %v2803_v6, %s5408_s25  ;;  %2582 = vrot.lane.b32.xlu1 %v2545_v63, %s5406_s24 }
 0x20d   : > { %v1625_v12 = vadd.f32 %v6099_v3, %v1624_v11  ;;  %v5159_v13 = vpop.f32.mrb[18].mxu0 }
 0x20e   : > { %v1705_v25 = vmax.f32 %v1633_v10, 0.0  ;;  %v1636_v16 = vadd.f32 %v5159_v13, %v6099_v3  ;;  %v6223_v17 = vpop.permute.xlu0 %2572  ;;  %v2187_v53 = vpop.permute.xlu1 %2186 }
 0x20f   : > { %v1703_v19 = vmax.f32 %v1625_v12, 0.0  ;;  %v1627_v20 = vpop.f32.mrb[19].mxu0 }
 0x210   : > { %1739 = vst.msk [vmem:[#allocation2 + $0xf1] sm:$0xff] %vm7187_vm11, %v1705_v25  ;;  %v1706_v21 = vmax.f32 %v1636_v16, 0.0  ;;  %v1628_v22 = vadd.f32 %v6099_v3, %v1627_v20  ;;  %2196 = vrot.lane.b32.xlu0 %v2545_v63, %s5402_s23  ;;  %2711 = vrot.lane.b32.xlu1 %v2674_v18, %s5407_s16 }
 0x211   : > { %1737 = vst.msk [vmem:[#allocation2 + $0xd9] sm:$0xff] %vm7187_vm11, %v1703_v19 }
 0x212   : > { %1740 = vst.msk [vmem:[#allocation2 + $0xf9] sm:$0xff] %vm7187_vm11, %v1706_v21  ;;  %v1704_v23 = vmax.f32 %v1628_v22, 0.0  ;;  %v6231_v24 = vpop.permute.xlu0 %2701  ;;  %v2316_v26 = vpop.permute.xlu1 %2315 }
 0x214   : > { %1738 = vst.msk [vmem:[#allocation2 + $0xe1] sm:$0xff] %vm7187_vm11, %v1704_v23  ;;  %2325 = vrot.lane.b32.xlu0 %v2674_v18, %s5404_s21  ;;  %1940 = vrot.lane.b32.xlu1 %v2674_v18, %s5398_s27 }
 0x216   : > { %v2831_v27 = vpop.permute.xlu0 %2830  ;;  %v2445_v28 = vpop.permute.xlu1 %2444 }
 0x217   : > { %v2138_v29 = vld [vmem:[#allocation2 + $0xf0] sm:$0xff] }
 0x218   : > { %2454 = vrot.lane.b32.xlu0 %v2803_v6, %s5409_s22  ;;  %2069 = vrot.lane.b32.xlu1 %v2803_v6, %s5400_s29  ;;  %v1818_v30 = vld [vmem:[#allocation2 + $0xf0] sm:$0xff]  ;;  %v2136_v33 = vld [vmem:[#allocation2 + $0xd8] sm:$0xff] }
 0x219   : > { %v2139_v31 = vld [vmem:[#allocation2 + $0xf8] sm:$0xff] }
 0x21a   : > { %v2060_v34 = vpop.permute.xlu0 %2059  ;;  %v1931_v35 = vpop.permute.xlu1 %1930  ;;  %v2161_v36 = vpack.c.bf16 %v2139_v31, %v2138_v29  ;;  %v2267_v38 = vld [vmem:[#allocation2 + $0xf1] sm:$0xff]  ;;  %v2268_v32 = vld [vmem:[#allocation2 + $0xf9] sm:$0xff] }
 0x21b   : > { %v1819_v39 = vld [vmem:[#allocation2 + $0xf8] sm:$0xff]  ;;  %1977 = vst.msk [vmem:[#allocation4 + $0x10] sm:$0xff] %vm1974_vm14, %v1931_v35  ;;  %v2781_v42 = vld [vmem:[#allocation2 + $0xe2] sm:$0xff]  ;;  %v6246_v49 = vpack.c.bf16 %v2268_v32, %v2267_v38 }
 0x21c   : > { %v2780_v40 = vld [vmem:[#allocation2 + $0xda] sm:$0xff]  ;;  %v1840_v44 = vpack.c.bf16 %v1819_v39, %v1818_v30  ;;  %2106 = vst.msk [vmem:[#allocation4 + $0x10] sm:$0xff] %vm2103_vm15, %v2060_v34  ;;  %2202 = vrot.lane.b32.xlu1 %v2161_v36, %s5402_s23  ;;  %v2396_v7 = vld [vmem:[#allocation2 + $0xf2] sm:$0xff] }
 0x21d   : > { %v2137_v43 = vld [vmem:[#allocation2 + $0xe0] sm:$0xff]  ;;  %v6241_v37 = vpack.c.bf16 %v2781_v42, %v2780_v40 }
 0x21e   : > { %v2160_v45 = vpack.c.bf16 %v2137_v43, %v2136_v33  ;;  %1856 = vst.msk [vmem:[#allocation4 + $0x50] sm:$0xff] %vm7187_vm11, %v1840_v44  ;;  %v2185_v46 = vpop.permute.xlu0 %2184  ;;  %v1929_v48 = vpop.permute.xlu1 %1928  ;;  %v2397_v50 = vld [vmem:[#allocation2 + $0xfa] sm:$0xff] }
 0x21f   : > { %2844 = vrot.lane.b32.xlu0 %v6241_v37, %s5408_s25  ;;  %2233 = vst.msk [vmem:[#allocation4] sm:$0xff] %vm2232_vm13, %v2185_v46  ;;  %v2265_v51 = vld [vmem:[#allocation2 + $0xd9] sm:$0xff]  ;;  %v2266_v52 = vld [vmem:[#allocation2 + $0xe1] sm:$0xff]  ;;  %v6254_v55 = vpack.c.bf16 %v2397_v50, %v2396_v7 }
 0x220   : > { %1855 = vst.msk [vmem:[#allocation4 + $0x48] sm:$0xff] %vm7187_vm11, %v2160_v45  ;;  %2331 = vrot.lane.b32.xlu1 %v6246_v49, %s5404_s21  ;;  %v2289_v56 = vpack.c.bf16 %v2266_v52, %v2265_v51 }
 0x221   : > { %1976 = vst.msk [vmem:[#allocation4 + $0x8] sm:$0xff] %vm1974_vm14, %v1929_v48 }
 0x222   : > { %v2314_v41 = vpop.permute.xlu0 %2313  ;;  %v2058_v54 = vpop.permute.xlu1 %2057 }
 0x223   : > { %2200 = vrot.lane.b32.xlu0 %v2160_v45, %s5402_s23  ;;  %2362 = vst.msk [vmem:[#allocation4] sm:$0xff] %vm2361_vm12, %v2314_v41 }
 0x224   : > { %2105 = vst.msk [vmem:[#allocation4 + $0x8] sm:$0xff] %vm2103_vm15, %v2058_v54  ;;  %2460 = vrot.lane.b32.xlu1 %v6254_v55, %s5409_s22 }
 0x225   : > { %2234 = vst.msk [vmem:[#allocation4 + $0x8] sm:$0xff] %vm2232_vm13, %v2187_v53 }
 0x226   : > { %2363 = vst.msk [vmem:[#allocation4 + $0x8] sm:$0xff] %vm2361_vm12, %v2316_v26  ;;  %v2443_v57 = vpop.permute.xlu0 %2442 }
 0x227   : > { %2329 = vrot.lane.b32.xlu0 %v2289_v56, %s5404_s21  ;;  %2492 = vst.msk [vmem:[#allocation4 + $0x8] sm:$0xff] %vm2490_vm10, %v2445_v28  ;;  %2491 = vst.msk [vmem:[#allocation4] sm:$0xff] %vm2490_vm10, %v2443_v57 }
 0x228   : > { %2621 = vst.msk [vmem:[#allocation4] sm:$0xff] %vm2620_vm9, %v6223_v17  ;;  %2586 = vrot.lane.b32.xlu1 %v2160_v45, %s5406_s24 }
 0x229   : > { %2750 = vst.msk [vmem:[#allocation4] sm:$0xff] %vm2749_vm8, %v6231_v24 }
 0x22a   : > { %2879 = vst.msk [vmem:[#allocation4] sm:$0xff] %vm2878_vm7, %v2831_v27 }
 0x22b   : > { %2458 = vrot.lane.b32.xlu0 %v6241_v37, %s5409_s22  ;;  %v5162_v58 = vpop.f32.mrb[0].mxu1 }
 0x22c   : > { %v1649_v60 = vadd.f32 %v5162_v58, %v6099_v3  ;;  %v1640_v61 = vpop.f32.mrb[1].mxu1  ;;  %2715 = vrot.lane.b32.xlu1 %v2289_v56, %s5407_s16 }
 0x22d   : > { %v1641_v62 = vadd.f32 %v6099_v3, %v1640_v61  ;;  %v5163_v63 = vpop.f32.mrb[2].mxu1 }
 0x22e   : > { %v1709_v0 = vmax.f32 %v1649_v60, 0.0  ;;  %v1652_v1 = vadd.f32 %v5163_v63, %v6099_v3  ;;  %v1643_v2 = vpop.f32.mrb[3].mxu1  ;;  %v6278_v4 = vpop.permute.xlu0 %2576 }
 0x22f   : > { %2588 = vrot.lane.b32.xlu0 %v2161_v36, %s5406_s24  ;;  %v1707_v14 = vmax.f32 %v1641_v62, 0.0  ;;  %v1644_v5 = vadd.f32 %v6099_v3, %v1643_v2  ;;  %v6281_v47 = vpop.permute.xlu1 %2190 }
 0x230   : > { %1743 = vst.msk [vmem:[#allocation2 + $0x121] sm:$0xff] %vm7187_vm11, %v1709_v0  ;;  %v1710_v6 = vmax.f32 %v1652_v1, 0.0  ;;  %1944 = vrot.lane.b32.xlu1 %v2289_v56, %s5398_s27 }
 0x231   : > { %1741 = vst.msk [vmem:[#allocation2 + $0x109] sm:$0xff] %vm7187_vm11, %v1707_v14  ;;  %v1708_v8 = vmax.f32 %v1644_v5, 0.0  ;;  %v2895_v9 = vld [vmem:[#allocation4] sm:$0xff] }
 0x232   : > { %1744 = vst.msk [vmem:[#allocation2 + $0x129] sm:$0xff] %vm7187_vm11, %v1710_v6  ;;  %5182 = vmatprep.mubr.msk.bf16.mxu1 %vm2954_vm6, %v2895_v9  ;;  %v2706_v10 = vpop.permute.xlu0 %2705 }
 0x233   : > { %2717 = vrot.lane.b32.xlu0 %v6246_v49, %s5407_s16  ;;  %1742 = vst.msk [vmem:[#allocation2 + $0x111] sm:$0xff] %vm7187_vm11, %v1708_v8  ;;  %v2320_v11 = vpop.permute.xlu1 %2319 }
 0x234   : > { %2073 = vrot.lane.b32.xlu1 %v6241_v37, %s5400_s29 }
 0x236   : > { %v2835_v12 = vpop.permute.xlu0 %2834 }
 0x237   : > { %2846 = vrot.lane.b32.xlu0 %v6254_v55, %s5408_s25  ;;  %v2449_v13 = vpop.permute.xlu1 %2448  ;;  %v2528_v15 = vld [vmem:[#allocation2 + $0x120] sm:$0xff] }
 0x238   : > { %v2526_v25 = vld [vmem:[#allocation2 + $0x108] sm:$0xff] }
 0x239   : > { %v2655_v16 = vld [vmem:[#allocation2 + $0x109] sm:$0xff]  ;;  %v2657_v51 = vld [vmem:[#allocation2 + $0x121] sm:$0xff] }
 0x23a   : > { %v2529_v17 = vld [vmem:[#allocation2 + $0x128] sm:$0xff]  ;;  %v2064_v53 = vpop.permute.xlu0 %2063  ;;  %v2785_v19 = vld [vmem:[#allocation2 + $0x112] sm:$0xff] }
 0x23b   : > { %v2784_v18 = vld [vmem:[#allocation2 + $0x10a] sm:$0xff]  ;;  %v6295_v21 = vpack.c.bf16 %v2529_v17, %v2528_v15  ;;  %v1935_v22 = vpop.permute.xlu1 %1934  ;;  %v2786_v57 = vld [vmem:[#allocation2 + $0x122] sm:$0xff] }
 0x23c   : > { %v2527_v20 = vld [vmem:[#allocation2 + $0x110] sm:$0xff]  ;;  %v2807_v23 = vpack.c.bf16 %v2785_v19, %v2784_v18  ;;  %1979 = vst.msk [vmem:[#allocation4 + $0x20] sm:$0xff] %vm1974_vm14, %v1935_v22 }
 0x23d   : > { %v2549_v24 = vpack.c.bf16 %v2527_v20, %v2526_v25  ;;  %v2656_v26 = vld [vmem:[#allocation2 + $0x111] sm:$0xff]  ;;  %1858 = vst.msk [vmem:[#allocation4 + $0x60] sm:$0xff] %vm7187_vm11, %v6295_v21  ;;  %v2658_v52 = vld [vmem:[#allocation2 + $0x129] sm:$0xff] }
 0x23e   : > { %2108 = vst.msk [vmem:[#allocation4 + $0x20] sm:$0xff] %vm2103_vm15, %v2064_v53  ;;  %2848 = vrot.lane.b32.xlu0 %v2807_v23, %s5408_s25  ;;  %v2678_v27 = vpack.c.bf16 %v2656_v26, %v2655_v16  ;;  %v2833_v28 = vpop.permute.xlu0 %2832  ;;  %v2679_v56 = vpack.c.bf16 %v2658_v52, %v2657_v51  ;;  %v2787_v58 = vld [vmem:[#allocation2 + $0x12a] sm:$0xff] }
 0x23f   : > { %2590 = vrot.lane.b32.xlu1 %v2549_v24, %s5406_s24  ;;  %1857 = vst.msk [vmem:[#allocation4 + $0x58] sm:$0xff] %vm7187_vm11, %v2549_v24  ;;  %v2575_v29 = vpop.permute.xlu1 %2574  ;;  %v2808_v63 = vpack.c.bf16 %v2787_v58, %v2786_v57 }
 0x240   : > { %2622 = vst.msk [vmem:[#allocation4 + $0x8] sm:$0xff] %vm2620_vm9, %v2575_v29 }
 0x242   : > { %2075 = vrot.lane.b32.xlu0 %v6254_v55, %s5400_s29  ;;  %v2189_v30 = vpop.permute.xlu0 %2188 }
 0x243   : > { %2719 = vrot.lane.b32.xlu1 %v2678_v27, %s5407_s16  ;;  %2235 = vst.msk [vmem:[#allocation4 + $0x10] sm:$0xff] %vm2232_vm13, %v2189_v30  ;;  %v2704_v31 = vpop.permute.xlu1 %2703 }
 0x244   : > { %2751 = vst.msk [vmem:[#allocation4 + $0x8] sm:$0xff] %vm2749_vm8, %v2704_v31 }
 0x245   : > { %2880 = vst.msk [vmem:[#allocation4 + $0x8] sm:$0xff] %vm2878_vm7, %v2833_v28 }
 0x246   : > { %2204 = vrot.lane.b32.xlu0 %v2549_v24, %s5402_s23  ;;  %v2318_v33 = vpop.permute.xlu0 %2317 }
 0x247   : > { %1946 = vrot.lane.b32.xlu1 %v6246_v49, %s5398_s27  ;;  %2364 = vst.msk [vmem:[#allocation4 + $0x10] sm:$0xff] %vm2361_vm12, %v2318_v33  ;;  %v1933_v34 = vpop.permute.xlu1 %1932 }
 0x248   : > { %1978 = vst.msk [vmem:[#allocation4 + $0x18] sm:$0xff] %vm1974_vm14, %v1933_v34 }
 0x24a   : > { %2333 = vrot.lane.b32.xlu0 %v2678_v27, %s5404_s21  ;;  %v2447_v35 = vpop.permute.xlu0 %2446 }
 0x24b   : > { %1948 = vrot.lane.b32.xlu1 %v2678_v27, %s5398_s27  ;;  %2493 = vst.msk [vmem:[#allocation4 + $0x10] sm:$0xff] %vm2490_vm10, %v2447_v35  ;;  %v2062_v36 = vpop.permute.xlu1 %2061  ;;  %v5166_v38 = vpop.f32.mrb[4].mxu1 }
 0x24c   : > { %2623 = vst.msk [vmem:[#allocation4 + $0x10] sm:$0xff] %vm2620_vm9, %v6278_v4  ;;  %v1665_v32 = vadd.f32 %v5166_v38, %v6099_v3  ;;  %v1656_v39 = vpop.f32.mrb[5].mxu1  ;;  %v2896_v40 = vld [vmem:[#allocation4 + $0x8] sm:$0xff] }
 0x24d   : > { %2107 = vst.msk [vmem:[#allocation4 + $0x18] sm:$0xff] %vm2103_vm15, %v2062_v36  ;;  %v1657_v42 = vadd.f32 %v6099_v3, %v1656_v39  ;;  %5183 = vmatmul.mubr.msk.bf16.vlgmr.msra.gmra.mrb[12].mxu1 %vm2954_vm6, %v2896_v40  ;;  %v5167_v43 = vpop.f32.mrb[6].mxu1 }
 0x24e   : > { %2752 = vst.msk [vmem:[#allocation4 + $0x10] sm:$0xff] %vm2749_vm8, %v2706_v10  ;;  %2462 = vrot.lane.b32.xlu0 %v2807_v23, %s5409_s22  ;;  %v1713_v44 = vmax.f32 %v1665_v32, 0.0  ;;  %v1668_v37 = vadd.f32 %v5167_v43, %v6099_v3  ;;  %v1659_v45 = vpop.f32.mrb[7].mxu1  ;;  %v6333_v46 = vpop.permute.xlu0 %2580 }
 0x24f   : > { %2236 = vst.msk [vmem:[#allocation4 + $0x18] sm:$0xff] %vm2232_vm13, %v6281_v47  ;;  %2077 = vrot.lane.b32.xlu1 %v2807_v23, %s5400_s29  ;;  %v1711_v48 = vmax.f32 %v1657_v42, 0.0  ;;  %v1660_v49 = vadd.f32 %v6099_v3, %v1659_v45  ;;  %v6337_v7 = vpop.permute.xlu1 %2194 }
 0x250   : > { %2881 = vst.msk [vmem:[#allocation4 + $0x10] sm:$0xff] %vm2878_vm7, %v2835_v12  ;;  %v1714_v50 = vmax.f32 %v1668_v37, 0.0 }
 0x251   : > { %2365 = vst.msk [vmem:[#allocation4 + $0x18] sm:$0xff] %vm2361_vm12, %v2320_v11  ;;  %v1712_v41 = vmax.f32 %v1660_v49, 0.0 }
 0x252   : > { %2494 = vst.msk [vmem:[#allocation4 + $0x18] sm:$0xff] %vm2490_vm10, %v2449_v13  ;;  %2592 = vrot.lane.b32.xlu0 %v6295_v21, %s5406_s24  ;;  %v6346_v54 = vpop.permute.xlu0 %2709 }
 0x253   : > { %1747 = vst.msk [vmem:[#allocation2 + $0x151] sm:$0xff] %vm7187_vm11, %v1713_v44  ;;  %1745 = vst.msk [vmem:[#allocation2 + $0x139] sm:$0xff] %vm7187_vm11, %v1711_v48  ;;  %2206 = vrot.lane.b32.xlu1 %v6295_v21, %s5402_s23  ;;  %v6349_v55 = vpop.permute.xlu1 %2323 }
 0x254   : > { %1748 = vst.msk [vmem:[#allocation2 + $0x159] sm:$0xff] %vm7187_vm11, %v1714_v50  ;;  %1746 = vst.msk [vmem:[#allocation2 + $0x141] sm:$0xff] %vm7187_vm11, %v1712_v41 }
 0x256   : > { %2721 = vrot.lane.b32.xlu0 %v2679_v56, %s5407_s16  ;;  %v6353_v61 = vpop.permute.xlu0 %2838 }
 0x257   : > { %v2897_v60 = vld [vmem:[#allocation4 + $0x10] sm:$0xff]  ;;  %2335 = vrot.lane.b32.xlu1 %v2679_v56, %s5404_s21  ;;  %v6356_v62 = vpop.permute.xlu1 %2452 }
 0x258   : > { %5186 = vmatprep.mubr.msk.bf16.mxu1 %vm2954_vm6, %v2897_v60 }
 0x25a   : > { %v2532_v0 = vld [vmem:[#allocation2 + $0x150] sm:$0xff]  ;;  %v2530_v1 = vld [vmem:[#allocation2 + $0x138] sm:$0xff]  ;;  %2850 = vrot.lane.b32.xlu0 %v2808_v63, %s5408_s25  ;;  %v2068_v4 = vpop.permute.xlu0 %2067 }
 0x25b   : > { %v2533_v2 = vld [vmem:[#allocation2 + $0x158] sm:$0xff]  ;;  %2464 = vrot.lane.b32.xlu1 %v2808_v63, %s5409_s22  ;;  %v2789_v5 = vld [vmem:[#allocation2 + $0x142] sm:$0xff]  ;;  %v1939_v8 = vpop.permute.xlu1 %1938 }
 0x25c   : > { %v2788_v14 = vld [vmem:[#allocation2 + $0x13a] sm:$0xff]  ;;  %v6360_v6 = vpack.c.bf16 %v2533_v2, %v2532_v0  ;;  %1981 = vst.msk [vmem:[#allocation4 + $0x30] sm:$0xff] %vm1974_vm14, %v1939_v8  ;;  %v2661_v38 = vld [vmem:[#allocation2 + $0x151] sm:$0xff] }
 0x25d   : > { %v2531_v47 = vld [vmem:[#allocation2 + $0x140] sm:$0xff]  ;;  %v2809_v9 = vpack.c.bf16 %v2789_v5, %v2788_v14  ;;  %2110 = vst.msk [vmem:[#allocation4 + $0x30] sm:$0xff] %vm2103_vm15, %v2068_v4  ;;  %v2790_v43 = vld [vmem:[#allocation2 + $0x152] sm:$0xff] }
 0x25e   : > { %v2551_v10 = vpack.c.bf16 %v2531_v47, %v2530_v1  ;;  %v2659_v11 = vld [vmem:[#allocation2 + $0x139] sm:$0xff]  ;;  %v2660_v12 = vld [vmem:[#allocation2 + $0x141] sm:$0xff]  ;;  %1860 = vst.msk [vmem:[#allocation4 + $0x70] sm:$0xff] %vm7187_vm11, %v6360_v6  ;;  %v2837_v13 = vpop.permute.xlu0 %2836 }
 0x25f   : > { %2852 = vrot.lane.b32.xlu0 %v2809_v9, %s5408_s25  ;;  %v2680_v15 = vpack.c.bf16 %v2660_v12, %v2659_v11  ;;  %v2579_v25 = vpop.permute.xlu1 %2578  ;;  %v2662_v32 = vld [vmem:[#allocation2 + $0x159] sm:$0xff] }
 0x260   : > { %1859 = vst.msk [vmem:[#allocation4 + $0x68] sm:$0xff] %vm7187_vm11, %v2551_v10  ;;  %2594 = vrot.lane.b32.xlu1 %v2551_v10, %s5406_s24  ;;  %v2681_v42 = vpack.c.bf16 %v2662_v32, %v2661_v38  ;;  %v2791_v44 = vld [vmem:[#allocation2 + $0x15a] sm:$0xff] }
 0x261   : > { %2624 = vst.msk [vmem:[#allocation4 + $0x18] sm:$0xff] %vm2620_vm9, %v2579_v25  ;;  %v2810_v49 = vpack.c.bf16 %v2791_v44, %v2790_v43 }
 0x262   : > { %v2193_v16 = vpop.permute.xlu0 %2192 }
 0x263   : > { %2079 = vrot.lane.b32.xlu0 %v2808_v63, %s5400_s29  ;;  %2237 = vst.msk [vmem:[#allocation4 + $0x20] sm:$0xff] %vm2232_vm13, %v2193_v16  ;;  %v2708_v17 = vpop.permute.xlu1 %2707 }
 0x264   : > { %2723 = vrot.lane.b32.xlu1 %v2680_v15, %s5407_s16  ;;  %2753 = vst.msk [vmem:[#allocation4 + $0x18] sm:$0xff] %vm2749_vm8, %v2708_v17 }
 0x265   : > { %2882 = vst.msk [vmem:[#allocation4 + $0x18] sm:$0xff] %vm2878_vm7, %v2837_v13 }
 0x266   : > { %v2322_v53 = vpop.permute.xlu0 %2321 }
 0x267   : > { %2208 = vrot.lane.b32.xlu0 %v2551_v10, %s5402_s23  ;;  %2366 = vst.msk [vmem:[#allocation4 + $0x20] sm:$0xff] %vm2361_vm12, %v2322_v53  ;;  %v1937_v18 = vpop.permute.xlu1 %1936 }
 0x268   : > { %1950 = vrot.lane.b32.xlu1 %v2679_v56, %s5398_s27  ;;  %1980 = vst.msk [vmem:[#allocation4 + $0x28] sm:$0xff] %vm1974_vm14, %v1937_v18  ;;  %v5170_v19 = vpop.f32.mrb[8].mxu1 }
 0x269   : > { %v1681_v20 = vadd.f32 %v5170_v19, %v6099_v3  ;;  %v1672_v21 = vpop.f32.mrb[9].mxu1  ;;  %v2538_v19 = vld [vmem:[#allocation2 + $0x198] sm:$0xff] }
 0x26a   : > { %v2451_v22 = vpop.permute.xlu0 %2450  ;;  %v1673_v23 = vadd.f32 %v6099_v3, %v1672_v21  ;;  %v5171_v24 = vpop.f32.mrb[10].mxu1 }
 0x26b   : > { %2337 = vrot.lane.b32.xlu0 %v2680_v15, %s5404_s21  ;;  %2495 = vst.msk [vmem:[#allocation4 + $0x20] sm:$0xff] %vm2490_vm10, %v2451_v22  ;;  %v2066_v26 = vpop.permute.xlu1 %2065  ;;  %v1717_v27 = vmax.f32 %v1681_v20, 0.0  ;;  %v1684_v28 = vadd.f32 %v5171_v24, %v6099_v3  ;;  %v1675_v29 = vpop.f32.mrb[11].mxu1  ;;  %v2539_v20 = vld [vmem:[#allocation2 + $0x1a0] sm:$0xff] }
 0x26c   : > { %1952 = vrot.lane.b32.xlu1 %v2680_v15, %s5398_s27  ;;  %2625 = vst.msk [vmem:[#allocation4 + $0x20] sm:$0xff] %vm2620_vm9, %v6333_v46  ;;  %v1715_v30 = vmax.f32 %v1673_v23, 0.0  ;;  %v2898_v31 = vld [vmem:[#allocation4 + $0x18] sm:$0xff]  ;;  %v1676_v33 = vadd.f32 %v6099_v3, %v1675_v29  ;;  %v2555_v22 = vpack.c.bf16 %v2539_v20, %v2538_v19 }
 0x26d   : > { %2109 = vst.msk [vmem:[#allocation4 + $0x28] sm:$0xff] %vm2103_vm15, %v2066_v26  ;;  %5187 = vmatmul.mubr.msk.bf16.gmra.mrb[16].mxu1 %vm2954_vm6, %v2898_v31  ;;  %v1718_v34 = vmax.f32 %v1684_v28, 0.0  ;;  %v2667_v24 = vld [vmem:[#allocation2 + $0x199] sm:$0xff]  ;;  %v2668_v26 = vld [vmem:[#allocation2 + $0x1a1] sm:$0xff] }
 0x26e   : > { %2754 = vst.msk [vmem:[#allocation4 + $0x20] sm:$0xff] %vm2749_vm8, %v6346_v54  ;;  %v1716_v3 = vmax.f32 %v1676_v33, 0.0  ;;  %v2585_v35 = vpop.permute.xlu0 %2584  ;;  %v2684_v28 = vpack.c.bf16 %v2668_v26, %v2667_v24  ;;  %v2797_v31 = vld [vmem:[#allocation2 + $0x1a2] sm:$0xff] }
 0x26f   : > { %2238 = vst.msk [vmem:[#allocation4 + $0x28] sm:$0xff] %vm2232_vm13, %v6337_v7  ;;  %2466 = vrot.lane.b32.xlu0 %v2809_v9, %s5409_s22  ;;  %v6405_v36 = vpop.permute.xlu1 %2198 }
 0x270   : > { %1751 = vst.msk [vmem:[#allocation2 + $0x181] sm:$0xff] %vm7187_vm11, %v1717_v27  ;;  %1749 = vst.msk [vmem:[#allocation2 + $0x169] sm:$0xff] %vm7187_vm11, %v1715_v30  ;;  %2081 = vrot.lane.b32.xlu1 %v2809_v9, %s5400_s29  ;;  %v2796_v30 = vld [vmem:[#allocation2 + $0x19a] sm:$0xff] }
 0x271   : > { %2883 = vst.msk [vmem:[#allocation4 + $0x20] sm:$0xff] %vm2878_vm7, %v6353_v61 }
 0x272   : > { %2367 = vst.msk [vmem:[#allocation4 + $0x28] sm:$0xff] %vm2361_vm12, %v6349_v55  ;;  %v2714_v39 = vpop.permute.xlu0 %2713 }
 0x273   : > { %2496 = vst.msk [vmem:[#allocation4 + $0x28] sm:$0xff] %vm2490_vm10, %v6356_v62  ;;  %2596 = vrot.lane.b32.xlu0 %v6360_v6, %s5406_s24  ;;  %v2328_v40 = vpop.permute.xlu1 %2327 }
 0x274   : > { %1752 = vst.msk [vmem:[#allocation2 + $0x189] sm:$0xff] %vm7187_vm11, %v1718_v34  ;;  %1750 = vst.msk [vmem:[#allocation2 + $0x171] sm:$0xff] %vm7187_vm11, %v1716_v3  ;;  %2210 = vrot.lane.b32.xlu1 %v6360_v6, %s5402_s23  ;;  %v2813_v34 = vpack.c.bf16 %v2797_v31, %v2796_v30 }
 0x276   : > { %v2843_v46 = vpop.permute.xlu0 %2842 }
 0x277   : > { %2725 = vrot.lane.b32.xlu0 %v2681_v42, %s5407_s16  ;;  %v2534_v45 = vld [vmem:[#allocation2 + $0x168] sm:$0xff]  ;;  %v2457_v48 = vpop.permute.xlu1 %2456  ;;  %v2536_v5 = vld [vmem:[#allocation2 + $0x180] sm:$0xff] }
 0x278   : > { %v2899_v37 = vld [vmem:[#allocation4 + $0x20] sm:$0xff]  ;;  %2339 = vrot.lane.b32.xlu1 %v2681_v42, %s5404_s21  ;;  %v2663_v56 = vld [vmem:[#allocation2 + $0x169] sm:$0xff] }
 0x279   : > { %5190 = vmatprep.mubr.msk.bf16.mxu1 %vm2954_vm6, %v2899_v37  ;;  %v2665_v10 = vld [vmem:[#allocation2 + $0x181] sm:$0xff] }
 0x27a   : > { %v2072_v54 = vpop.permute.xlu0 %2071 }
 0x27b   : > { %v2792_v7 = vld [vmem:[#allocation2 + $0x16a] sm:$0xff]  ;;  %v2793_v50 = vld [vmem:[#allocation2 + $0x172] sm:$0xff]  ;;  %2854 = vrot.lane.b32.xlu0 %v2810_v49, %s5408_s25  ;;  %v1943_v55 = vpop.permute.xlu1 %1942  ;;  %v2794_v25 = vld [vmem:[#allocation2 + $0x182] sm:$0xff] }
 0x27c   : > { %v2535_v51 = vld [vmem:[#allocation2 + $0x170] sm:$0xff]  ;;  %v2811_v41 = vpack.c.bf16 %v2793_v50, %v2792_v7  ;;  %2468 = vrot.lane.b32.xlu1 %v2810_v49, %s5409_s22  ;;  %1983 = vst.msk [vmem:[#allocation4 + $0x40] sm:$0xff] %vm1974_vm14, %v1943_v55  ;;  %v2537_v47 = vld [vmem:[#allocation2 + $0x188] sm:$0xff] }
 0x27d   : > { %v2553_v52 = vpack.c.bf16 %v2535_v51, %v2534_v45  ;;  %v2664_v57 = vld [vmem:[#allocation2 + $0x171] sm:$0xff]  ;;  %2112 = vst.msk [vmem:[#allocation4 + $0x40] sm:$0xff] %vm2103_vm15, %v2072_v54  ;;  %v2554_v8 = vpack.c.bf16 %v2537_v47, %v2536_v5  ;;  %v2666_v11 = vld [vmem:[#allocation2 + $0x189] sm:$0xff] }
 0x27e   : > { %v2841_v58 = vpop.permute.xlu0 %2840  ;;  %v2682_v60 = vpack.c.bf16 %v2664_v57, %v2663_v56  ;;  %v2683_v13 = vpack.c.bf16 %v2666_v11, %v2665_v10  ;;  %v2795_v16 = vld [vmem:[#allocation2 + $0x18a] sm:$0xff] }
 0x27f   : > { %1861 = vst.msk [vmem:[#allocation4 + $0x78] sm:$0xff] %vm7187_vm11, %v2553_v52  ;;  %2856 = vrot.lane.b32.xlu0 %v2811_v41, %s5408_s25  ;;  %v2583_v61 = vpop.permute.xlu1 %2582  ;;  %v2812_v18 = vpack.c.bf16 %v2795_v16, %v2794_v25  ;;  %vm3203_vm11 = vcmask 25600   ;;  %v3981_v45 = vld [vmem:[#allocation3 + $0x198] sm:$0xff] }
 0x280   : > { %2598 = vrot.lane.b32.xlu1 %v2553_v52, %s5406_s24  ;;  %2626 = vst.msk [vmem:[#allocation4 + $0x28] sm:$0xff] %vm2620_vm9, %v2583_v61 }
 0x281   : > { %3204 = vst.msk [vmem:[#allocation3 + $0x10] sm:$0x3] %vm3203_vm11, %v5405_v59  ;;  %3208 = vst.msk [vmem:[#allocation3 + $0x1a8] sm:$0x3] %vm3203_vm11, %v5405_v59  ;;  %vm7202_vm11 = vcmask 293888  }
 0x282   : > { %v2197_v62 = vpop.permute.xlu0 %2196  ;;  %3228 = vst.msk [vmem:[#allocation3 + $0x11] sm:$0x1] %vm3209_vm5, %v5405_v59  ;;  %3245 = vst.msk [vmem:[#allocation3 + $0x1a9] sm:$0x1] %vm3209_vm5, %v5405_v59 }
 0x283   : > { %2083 = vrot.lane.b32.xlu0 %v2810_v49, %s5400_s29  ;;  %2239 = vst.msk [vmem:[#allocation4 + $0x30] sm:$0xff] %vm2232_vm13, %v2197_v62  ;;  %v2712_v63 = vpop.permute.xlu1 %2711 }
 0x284   : > { %2727 = vrot.lane.b32.xlu1 %v2682_v60, %s5407_s16  ;;  %2755 = vst.msk [vmem:[#allocation4 + $0x28] sm:$0xff] %vm2749_vm8, %v2712_v63 }
 0x285   : > { %2884 = vst.msk [vmem:[#allocation4 + $0x28] sm:$0xff] %vm2878_vm7, %v2841_v58 }
 0x286   : > { %v2326_v0 = vpop.permute.xlu0 %2325 }
 0x287   : > { %2212 = vrot.lane.b32.xlu0 %v2553_v52, %s5402_s23  ;;  %2368 = vst.msk [vmem:[#allocation4 + $0x30] sm:$0xff] %vm2361_vm12, %v2326_v0  ;;  %v1941_v1 = vpop.permute.xlu1 %1940 }
 0x288   : > { %1954 = vrot.lane.b32.xlu1 %v2681_v42, %s5398_s27  ;;  %1982 = vst.msk [vmem:[#allocation4 + $0x38] sm:$0xff] %vm1974_vm14, %v1941_v1  ;;  %v3311_v38 = vld [vmem:[#allocation3 + $0x9] sm:$0xff] }
 0x289   : > { %v3439_v37 = vld [vmem:[#allocation3 + $0xa] sm:$0xff] }
 0x28a   : > { %v2455_v2 = vpop.permute.xlu0 %2454 }
 0x28b   : > { %2341 = vrot.lane.b32.xlu0 %v2682_v60, %s5404_s21  ;;  %2497 = vst.msk [vmem:[#allocation4 + $0x30] sm:$0xff] %vm2490_vm10, %v2455_v2  ;;  %v2070_v4 = vpop.permute.xlu1 %2069 }
 0x28c   : > { %1956 = vrot.lane.b32.xlu1 %v2682_v60, %s5398_s27  ;;  %2627 = vst.msk [vmem:[#allocation4 + $0x30] sm:$0xff] %vm2620_vm9, %v2585_v35  ;;  %v2900_v14 = vld [vmem:[#allocation4 + $0x28] sm:$0xff] }
 0x28d   : > { %2111 = vst.msk [vmem:[#allocation4 + $0x38] sm:$0xff] %vm2103_vm15, %v2070_v4  ;;  %5191 = vmatmul.mubr.msk.bf16.gmra.mrb[20].mxu1 %vm2954_vm6, %v2900_v14 }
 0x28e   : > { %2756 = vst.msk [vmem:[#allocation4 + $0x30] sm:$0xff] %vm2749_vm8, %v2714_v39  ;;  %v3438_v39 = vld [vmem:[#allocation3 + $0x2] sm:$0xff] }
 0x28f   : > { %2240 = vst.msk [vmem:[#allocation4 + $0x38] sm:$0xff] %vm2232_vm13, %v6405_v36  ;;  %2470 = vrot.lane.b32.xlu0 %v2811_v41, %s5409_s22  ;;  %v6446_v6 = vpop.permute.xlu1 %2202  ;;  %v3310_v36 = vld [vmem:[#allocation3 + $0x1] sm:$0xff] }
 0x290   : > { %2885 = vst.msk [vmem:[#allocation4 + $0x30] sm:$0xff] %vm2878_vm7, %v2843_v46  ;;  %2085 = vrot.lane.b32.xlu1 %v2811_v41, %s5400_s29  ;;  %v3342_v32 = vpack.c.bf16 %v3311_v38, %v3310_v36  ;;  %v3470_v46 = vpack.c.bf16 %v3439_v37, %v3438_v39 }
 0x291   : > { %2369 = vst.msk [vmem:[#allocation4 + $0x38] sm:$0xff] %vm2361_vm12, %v2328_v40  ;;  %v2845_v9 = vpop.permute.xlu0 %2844  ;;  %v3982_v40 = vld [vmem:[#allocation3 + $0x1a0] sm:$0xff] }
 0x292   : > { %2498 = vst.msk [vmem:[#allocation4 + $0x38] sm:$0xff] %vm2490_vm10, %v2457_v48  ;;  %v3998_v48 = vpack.c.bf16 %v3982_v40, %v3981_v45 }
 0x293   : > { %2600 = vrot.lane.b32.xlu0 %v2554_v8, %s5406_s24  ;;  %v6450_v12 = vpop.permute.xlu1 %2331 }
 0x294   : > { %2214 = vrot.lane.b32.xlu1 %v2554_v8, %s5402_s23 }
 0x295   : > { %v2201_v15 = vpop.permute.xlu0 %2200 }
 0x296   : > { %2241 = vst.msk [vmem:[#allocation4 + $0x40] sm:$0xff] %vm2232_vm13, %v2201_v15 }
 0x297   : > { %2729 = vrot.lane.b32.xlu0 %v2683_v13, %s5407_s16  ;;  %v2901_v17 = vld [vmem:[#allocation4 + $0x30] sm:$0xff]  ;;  %v6456_v53 = vpop.permute.xlu1 %2460 }
 0x298   : > { %2343 = vrot.lane.b32.xlu1 %v2683_v13, %s5404_s21  ;;  %5194 = vmatprep.mubr.msk.bf16.mxu1 %vm2954_vm6, %v2901_v17 }
 0x299   : > { %v2330_v21 = vpop.permute.xlu0 %2329 }
 0x29a   : > { %2370 = vst.msk [vmem:[#allocation4 + $0x40] sm:$0xff] %vm2361_vm12, %v2330_v21 }
 0x29b   : > { %2858 = vrot.lane.b32.xlu0 %v2812_v18, %s5408_s25  ;;  %v2587_v23 = vpop.permute.xlu1 %2586 }
 0x29c   : > { %2472 = vrot.lane.b32.xlu1 %v2812_v18, %s5409_s22  ;;  %2628 = vst.msk [vmem:[#allocation4 + $0x38] sm:$0xff] %vm2620_vm9, %v2587_v23  ;;  %s7192_s22 = smov 12  }
 0x29d   : > { %v2459_v27 = vpop.permute.xlu0 %2458 }
 0x29e   : > { %2499 = vst.msk [vmem:[#allocation4 + $0x40] sm:$0xff] %vm2490_vm10, %v2459_v27 }
 0x29f   : > { %v2716_v29 = vpop.permute.xlu1 %2715 }
 0x2a0   : > { %2602 = vrot.lane.b32.xlu1 %v2555_v22, %s5406_s24  ;;  %2757 = vst.msk [vmem:[#allocation4 + $0x38] sm:$0xff] %vm2749_vm8, %v2716_v29  ;;  %s7191_s24 = smov 4  }
 0x2a1   : > { %v2589_v33 = vpop.permute.xlu0 %2588  ;;  %2886 = vst.msk [vmem:[#allocation4 + $0x38] sm:$0xff] %vm2878_vm7, %v2845_v9  ;;  %3374 = vrot.lane.b32.xlu0 %v3342_v32, %s7191_s24 }
 0x2a2   : > { %2629 = vst.msk [vmem:[#allocation4 + $0x40] sm:$0xff] %vm2620_vm9, %v2589_v33 }
 0x2a3   : > { %v1945_v3 = vpop.permute.xlu1 %1944 }
 0x2a4   : > { %2731 = vrot.lane.b32.xlu1 %v2684_v28, %s5407_s16  ;;  %1984 = vst.msk [vmem:[#allocation4 + $0x48] sm:$0xff] %vm1974_vm14, %v1945_v3 }
 0x2a5   : > { %v2718_v35 = vpop.permute.xlu0 %2717  ;;  %3502 = vrot.lane.b32.xlu0 %v3470_v46, %s5398_s27 }
 0x2a6   : > { %2758 = vst.msk [vmem:[#allocation4 + $0x40] sm:$0xff] %vm2749_vm8, %v2718_v35 }
 0x2a7   : > { %v2074_v42 = vpop.permute.xlu1 %2073 }
 0x2a8   : > { %2860 = vrot.lane.b32.xlu1 %v2813_v34, %s5408_s25  ;;  %2113 = vst.msk [vmem:[#allocation4 + $0x48] sm:$0xff] %vm2103_vm15, %v2074_v42  ;;  %v2902_v44 = vld [vmem:[#allocation4 + $0x38] sm:$0xff] }
 0x2a9   : > { %v2847_v43 = vpop.permute.xlu0 %2846  ;;  %2242 = vst.msk [vmem:[#allocation4 + $0x48] sm:$0xff] %vm2232_vm13, %v6446_v6  ;;  %5195 = vmatmul.mubr.msk.bf16.gmra.mrb[24].mxu1 %vm2954_vm6, %v2902_v44  ;;  %v3247_v44 = vld [vmem:[#allocation3 + $0x8] sm:$0xff] }
 0x2aa   : > { %2887 = vst.msk [vmem:[#allocation4 + $0x40] sm:$0xff] %vm2878_vm7, %v2847_v43  ;;  %v3246_v43 = vld [vmem:[#allocation3] sm:$0xff] }
 0x2ab   : > { %2371 = vst.msk [vmem:[#allocation4 + $0x48] sm:$0xff] %vm2361_vm12, %v6450_v12  ;;  %v3278_v45 = vpack.c.bf16 %v3247_v44, %v3246_v43 }
 0x2ac   : > { %2500 = vst.msk [vmem:[#allocation4 + $0x48] sm:$0xff] %vm2490_vm10, %v6456_v53  ;;  %4045 = vrot.lane.b32.xlu1 %v3998_v48, %s5402_s23 }
 0x2ad   : > { %3294 = vst.msk [vmem:[#allocation4] sm:$0xff] %vm379_vm0, %v3278_v45 }
 0x2b0   : > { %v2849_v49 = vpop.permute.xlu0 %2848 }
 0x2b1   : > { %v2591_v7 = vpop.permute.xlu1 %2590  ;;  %v2903_v50 = vld [vmem:[#allocation4 + $0x40] sm:$0xff] }
 0x2b2   : > { %2630 = vst.msk [vmem:[#allocation4 + $0x48] sm:$0xff] %vm2620_vm9, %v2591_v7  ;;  %5198 = vmatprep.mubr.msk.bf16.mxu1 %vm2954_vm6, %v2903_v50 }
 0x2b4   : > { %v2076_v51 = vpop.permute.xlu0 %2075 }
 0x2b5   : > { %v2720_v52 = vpop.permute.xlu1 %2719 }
 0x2b6   : > { %2759 = vst.msk [vmem:[#allocation4 + $0x48] sm:$0xff] %vm2749_vm8, %v2720_v52 }
 0x2b7   : > { %2888 = vst.msk [vmem:[#allocation4 + $0x48] sm:$0xff] %vm2878_vm7, %v2849_v49  ;;  %v6620_v49 = vld [vmem:[%s7167_s4] ss:$0 sm:$0xff] }
 0x2b8   : > { %v2205_v41 = vpop.permute.xlu0 %2204 }
 0x2b9   : > { %v1947_v54 = vpop.permute.xlu1 %1946 }
 0x2ba   : > { %1985 = vst.msk [vmem:[#allocation4 + $0x50] sm:$0xff] %vm1974_vm14, %v1947_v54 }
 0x2bb   : > { %2114 = vst.msk [vmem:[#allocation4 + $0x50] sm:$0xff] %vm2103_vm15, %v2076_v51 }
 0x2bc   : > { %2243 = vst.msk [vmem:[#allocation4 + $0x50] sm:$0xff] %vm2232_vm13, %v2205_v41  ;;  %v2334_v55 = vpop.permute.xlu0 %2333 }
 0x2bd   : > { %v1949_v56 = vpop.permute.xlu1 %1948  ;;  %2372 = vst.msk [vmem:[#allocation4 + $0x50] sm:$0xff] %vm2361_vm12, %v2334_v55 }
 0x2be   : > { %1986 = vst.msk [vmem:[#allocation4 + $0x58] sm:$0xff] %vm1974_vm14, %v1949_v56  ;;  %v2904_v57 = vld [vmem:[#allocation4 + $0x48] sm:$0xff] }
 0x2bf   : > { %5199 = vmatmul.mubr.msk.bf16.gmra.mrb[28].mxu1 %vm2954_vm6, %v2904_v57 }
 0x2c0   : > { %v2463_v58 = vpop.permute.xlu0 %2462 }
 0x2c1   : > { %2501 = vst.msk [vmem:[#allocation4 + $0x50] sm:$0xff] %vm2490_vm10, %v2463_v58  ;;  %v2078_v60 = vpop.permute.xlu1 %2077 }
 0x2c2   : > { %2115 = vst.msk [vmem:[#allocation4 + $0x58] sm:$0xff] %vm2103_vm15, %v2078_v60 }
 0x2c4   : > { %v2593_v61 = vpop.permute.xlu0 %2592 }
 0x2c5   : > { %2631 = vst.msk [vmem:[#allocation4 + $0x50] sm:$0xff] %vm2620_vm9, %v2593_v61  ;;  %v2207_v62 = vpop.permute.xlu1 %2206 }
 0x2c6   : > { %2244 = vst.msk [vmem:[#allocation4 + $0x58] sm:$0xff] %vm2232_vm13, %v2207_v62 }
 0x2c8   : > { %v2722_v63 = vpop.permute.xlu0 %2721 }
 0x2c9   : > { %2760 = vst.msk [vmem:[#allocation4 + $0x50] sm:$0xff] %vm2749_vm8, %v2722_v63  ;;  %v2336_v0 = vpop.permute.xlu1 %2335 }
 0x2ca   : > { %2373 = vst.msk [vmem:[#allocation4 + $0x58] sm:$0xff] %vm2361_vm12, %v2336_v0 }
 0x2cc   : > { %v2851_v1 = vpop.permute.xlu0 %2850 }
 0x2cd   : > { %2889 = vst.msk [vmem:[#allocation4 + $0x50] sm:$0xff] %vm2878_vm7, %v2851_v1  ;;  %v2465_v2 = vpop.permute.xlu1 %2464 }
 0x2ce   : > { %2502 = vst.msk [vmem:[#allocation4 + $0x58] sm:$0xff] %vm2490_vm10, %v2465_v2 }
 0x2d1   : > { %v2853_v4 = vpop.permute.xlu0 %2852 }
 0x2d2   : > { %v2595_v14 = vpop.permute.xlu1 %2594 }
 0x2d3   : > { %2632 = vst.msk [vmem:[#allocation4 + $0x58] sm:$0xff] %vm2620_vm9, %v2595_v14 }
 0x2d4   : > { %v2905_v47 = vld [vmem:[#allocation4 + $0x50] sm:$0xff] }
 0x2d5   : > { %v2080_v5 = vpop.permute.xlu0 %2079  ;;  %5202 = vmatprep.mubr.msk.bf16.mxu1 %vm2954_vm6, %v2905_v47 }
 0x2d6   : > { %v2724_v6 = vpop.permute.xlu1 %2723 }
 0x2d7   : > { %2761 = vst.msk [vmem:[#allocation4 + $0x58] sm:$0xff] %vm2749_vm8, %v2724_v6 }
 0x2d8   : > { %2890 = vst.msk [vmem:[#allocation4 + $0x58] sm:$0xff] %vm2878_vm7, %v2853_v4 }
 0x2d9   : > { %v2209_v8 = vpop.permute.xlu0 %2208 }
 0x2da   : > { %v1951_v9 = vpop.permute.xlu1 %1950 }
 0x2db   : > { %1987 = vst.msk [vmem:[#allocation4 + $0x60] sm:$0xff] %vm1974_vm14, %v1951_v9 }
 0x2dc   : > { %2116 = vst.msk [vmem:[#allocation4 + $0x60] sm:$0xff] %vm2103_vm15, %v2080_v5 }
 0x2dd   : > { %2245 = vst.msk [vmem:[#allocation4 + $0x60] sm:$0xff] %vm2232_vm13, %v2209_v8  ;;  %v2338_v10 = vpop.permute.xlu0 %2337 }
 0x2de   : > { %2374 = vst.msk [vmem:[#allocation4 + $0x60] sm:$0xff] %vm2361_vm12, %v2338_v10  ;;  %v1953_v11 = vpop.permute.xlu1 %1952 }
 0x2df   : > { %1988 = vst.msk [vmem:[#allocation4 + $0x68] sm:$0xff] %vm1974_vm14, %v1953_v11  ;;  %v2906_v12 = vld [vmem:[#allocation4 + $0x58] sm:$0xff] }
 0x2e0   : > { %5203 = vmatmul.mubr.msk.bf16.gmra.mrb[32].mxu1 %vm2954_vm6, %v2906_v12 }
 0x2e1   : > { %v2467_v13 = vpop.permute.xlu0 %2466 }
 0x2e2   : > { %2503 = vst.msk [vmem:[#allocation4 + $0x60] sm:$0xff] %vm2490_vm10, %v2467_v13  ;;  %v2082_v15 = vpop.permute.xlu1 %2081 }
 0x2e3   : > { %2117 = vst.msk [vmem:[#allocation4 + $0x68] sm:$0xff] %vm2103_vm15, %v2082_v15 }
 0x2e5   : > { %v2597_v25 = vpop.permute.xlu0 %2596 }
 0x2e6   : > { %2633 = vst.msk [vmem:[#allocation4 + $0x60] sm:$0xff] %vm2620_vm9, %v2597_v25  ;;  %v2211_v16 = vpop.permute.xlu1 %2210 }
 0x2e7   : > { %2246 = vst.msk [vmem:[#allocation4 + $0x68] sm:$0xff] %vm2232_vm13, %v2211_v16 }
 0x2e9   : > { %v2726_v17 = vpop.permute.xlu0 %2725 }
 0x2ea   : > { %2762 = vst.msk [vmem:[#allocation4 + $0x60] sm:$0xff] %vm2749_vm8, %v2726_v17  ;;  %v2340_v53 = vpop.permute.xlu1 %2339 }
 0x2eb   : > { %2375 = vst.msk [vmem:[#allocation4 + $0x68] sm:$0xff] %vm2361_vm12, %v2340_v53 }
 0x2ed   : > { %v2855_v18 = vpop.permute.xlu0 %2854 }
 0x2ee   : > { %2891 = vst.msk [vmem:[#allocation4 + $0x60] sm:$0xff] %vm2878_vm7, %v2855_v18  ;;  %v2469_v19 = vpop.permute.xlu1 %2468 }
 0x2ef   : > { %2504 = vst.msk [vmem:[#allocation4 + $0x68] sm:$0xff] %vm2490_vm10, %v2469_v19 }
 0x2f1   : > { %v2857_v20 = vpop.permute.xlu0 %2856 }
 0x2f2   : > { %v2599_v21 = vpop.permute.xlu1 %2598 }
 0x2f3   : > { %2634 = vst.msk [vmem:[#allocation4 + $0x68] sm:$0xff] %vm2620_vm9, %v2599_v21 }
 0x2f5   : > { %v2084_v22 = vpop.permute.xlu0 %2083  ;;  %v2907_v23 = vld [vmem:[#allocation4 + $0x60] sm:$0xff] }
 0x2f6   : > { %v2728_v24 = vpop.permute.xlu1 %2727  ;;  %5206 = vmatprep.mubr.msk.bf16.mxu1 %vm2954_vm6, %v2907_v23 }
 0x2f7   : > { %2763 = vst.msk [vmem:[#allocation4 + $0x68] sm:$0xff] %vm2749_vm8, %v2728_v24 }
 0x2f8   : > { %2892 = vst.msk [vmem:[#allocation4 + $0x68] sm:$0xff] %vm2878_vm7, %v2857_v20 }
 0x2f9   : > { %v2213_v26 = vpop.permute.xlu0 %2212 }
 0x2fa   : > { %v1955_v27 = vpop.permute.xlu1 %1954 }
 0x2fb   : > { %1989 = vst.msk [vmem:[#allocation4 + $0x70] sm:$0xff] %vm1974_vm14, %v1955_v27 }
 0x2fc   : > { %2118 = vst.msk [vmem:[#allocation4 + $0x70] sm:$0xff] %vm2103_vm15, %v2084_v22 }
 0x2fd   : > { %2247 = vst.msk [vmem:[#allocation4 + $0x70] sm:$0xff] %vm2232_vm13, %v2213_v26  ;;  %v2342_v28 = vpop.permute.xlu0 %2341 }
 0x2fe   : > { %2376 = vst.msk [vmem:[#allocation4 + $0x70] sm:$0xff] %vm2361_vm12, %v2342_v28  ;;  %v1957_v29 = vpop.permute.xlu1 %1956 }
 0x2ff   : > { %1990 = vst.msk [vmem:[#allocation4 + $0x78] sm:$0xff] %vm1974_vm14, %v1957_v29  ;;  %v2908_v30 = vld [vmem:[#allocation4 + $0x68] sm:$0xff] }
 0x300   : > { %5207 = vmatmul.mubr.msk.bf16.gmra.mrb[36].mxu1 %vm2954_vm6, %v2908_v30 }
 0x301   : > { %v2471_v31 = vpop.permute.xlu0 %2470 }
 0x302   : > { %2505 = vst.msk [vmem:[#allocation4 + $0x70] sm:$0xff] %vm2490_vm10, %v2471_v31  ;;  %v2086_v33 = vpop.permute.xlu1 %2085 }
 0x303   : > { %2119 = vst.msk [vmem:[#allocation4 + $0x78] sm:$0xff] %vm2103_vm15, %v2086_v33  ;;  %v5330_v33 = vld [vmem:[%s7168_s5] sm:$0xff]  }
 0x304   : > { %5214 = vmatprep.subr.bf16.mxu0 %v5330_v33 }
 0x305   : > { %v2601_v34 = vpop.permute.xlu0 %2600  ;;  %5215 = vmatpush3.bf16.msra.mxu0 %v5330_v33 }
 0x306   : > { %2635 = vst.msk [vmem:[#allocation4 + $0x70] sm:$0xff] %vm2620_vm9, %v2601_v34  ;;  %v2215_v3 = vpop.permute.xlu1 %2214 }
 0x307   : > { %2248 = vst.msk [vmem:[#allocation4 + $0x78] sm:$0xff] %vm2232_vm13, %v2215_v3  ;;  %v5331_v3 = vld [vmem:[%s7168_s5 + $0x8] sm:$0xff]  }
 0x308   : > { %5216 = vmatprep.subr.bf16.mxu0 %v5331_v3 }
 0x309   : > { %v2730_v35 = vpop.permute.xlu0 %2729  ;;  %5217 = vmatpush3.bf16.msra.mxu0 %v5331_v3 }
 0x30a   : > { %2764 = vst.msk [vmem:[#allocation4 + $0x70] sm:$0xff] %vm2749_vm8, %v2730_v35  ;;  %v2344_v36 = vpop.permute.xlu1 %2343 }
 0x30b   : > { %2377 = vst.msk [vmem:[#allocation4 + $0x78] sm:$0xff] %vm2361_vm12, %v2344_v36 }
 0x30d   : > { %v2859_v38 = vpop.permute.xlu0 %2858 }
 0x30e   : > { %2893 = vst.msk [vmem:[#allocation4 + $0x70] sm:$0xff] %vm2878_vm7, %v2859_v38  ;;  %v2473_v32 = vpop.permute.xlu1 %2472  ;;  %v5332_v38 = vld [vmem:[%s7168_s5 + $0x10] ss:$0 sps:$4 sm:$0x33]  }
 0x30f   : > { %2506 = vst.msk [vmem:[#allocation4 + $0x78] sm:$0xff] %vm2490_vm10, %v2473_v32  ;;  %5267 = vmatprep.subr.msk.bf16.mxu0 %vm1522_vm1, %v5332_v38  ;;  %v4427_v32 = vsel %vm1522_vm1, %v5332_v38, 0  ;;  %vm7195_vm1 = vcmask 162944   ;;  %vm7201_vm10 = vcmask 294144  }
 0x310   : > { %5219 = vmatpush3.bf16.msra.mxu0 %v4427_v32  ;;  %vm7196_vm5 = vmmov %vm7195_vm1 }
 0x311   : > { %vm7205_vm12 = vmmov %vm7201_vm10 }
 0x312   : > { %v2603_v39 = vpop.permute.xlu1 %2602  ;;  %vm7206_vm13 = vmmov %vm7195_vm1 }
 0x313   : > { %2636 = vst.msk [vmem:[#allocation4 + $0x78] sm:$0xff] %vm2620_vm9, %v2603_v39  ;;  %v3375_v46 = vpop.permute.xlu0 %3374  ;;  %vm7200_vm9 = vcmask 261344  }
 0x314   : > { %3422 = vst.msk [vmem:[#allocation4] sm:$0xff] %vm508_vm2, %v3375_v46  ;;  %vm7204_vm15 = vmmov %vm7200_vm9 }
 0x315   : > { %v2909_v40 = vld [vmem:[#allocation4 + $0x70] sm:$0xff] }
 0x316   : > { %5210 = vmatprep.mubr.msk.bf16.mxu1 %vm2954_vm6, %v2909_v40  ;;  %v2732_v42 = vpop.permute.xlu1 %2731 }
 0x317   : > { %2765 = vst.msk [vmem:[#allocation4 + $0x78] sm:$0xff] %vm2749_vm8, %v2732_v42  ;;  %v3503_v48 = vpop.permute.xlu0 %3502  ;;  %vm7199_vm8 = vcmask 228544  }
 0x318   : > { %3550 = vst.msk [vmem:[#allocation4] sm:$0xff] %vm637_vm3, %v3503_v48  ;;  %vm7203_vm14 = vmmov %vm7199_vm8 }
 0x31a   : > { %v2861_v37 = vpop.permute.xlu1 %2860 }
 0x31b   : > { %2894 = vst.msk [vmem:[#allocation4 + $0x78] sm:$0xff] %vm2878_vm7, %v2861_v37 }
 0x31e   : > { %v6736_v32 = vpop.permute.xlu1 %4045 }
 0x320   : > { %v5184_v7 = vpop.f32.mrb[12].mxu1 }
 0x321   : > { %v3050_v51 = vadd.f32 %v5184_v7, %v6620_v49  ;;  %v3041_v52 = vpop.f32.mrb[13].mxu1 }
 0x322   : > { %v2910_v50 = vld [vmem:[#allocation4 + $0x78] sm:$0xff]  ;;  %v3042_v41 = vadd.f32 %v6620_v49, %v3041_v52  ;;  %v5185_v54 = vpop.f32.mrb[14].mxu1 }
 0x323   : > { %5211 = vmatmul.mubr.msk.bf16.gmra.mrb[40].mxu1 %vm2954_vm6, %v2910_v50  ;;  %3171 = vst.msk [vmem:[#allocation3 + $0x31] sm:$0xff] %vm379_vm0, %v3050_v51  ;;  %v3053_v55 = vadd.f32 %v5185_v54, %v6620_v49  ;;  %v3044_v56 = vpop.f32.mrb[15].mxu1  ;;  %vm7197_vm6 = vcmask 195744  }
 0x324   : > { %3169 = vst.msk [vmem:[#allocation3 + $0x19] sm:$0xff] %vm379_vm0, %v3042_v41  ;;  %v3045_v57 = vadd.f32 %v6620_v49, %v3044_v56  ;;  %vm7198_vm7 = vmmov %vm7197_vm6 }
 0x325   : > { %3172 = vst.msk [vmem:[#allocation3 + $0x39] sm:$0xff] %vm379_vm0, %v3053_v55 }
 0x326   : > { %3170 = vst.msk [vmem:[#allocation3 + $0x21] sm:$0xff] %vm379_vm0, %v3045_v57 }
 0x32a   : > { %v3951_v58 = vld [vmem:[#allocation3 + $0x30] sm:$0xff] }
 0x32b   : > { %v3566_v62 = vld [vmem:[#allocation3 + $0x18] sm:$0xff] }
 0x32c   : > { %v3952_v60 = vld [vmem:[#allocation3 + $0x38] sm:$0xff] }
 0x32d   : > { %v3983_v61 = vpack.c.bf16 %v3952_v60, %v3951_v58  ;;  %v3567_v63 = vld [vmem:[#allocation3 + $0x20] sm:$0xff]  ;;  %v4079_v2 = vld [vmem:[#allocation3 + $0x31] sm:$0xff] }
 0x32e   : > { %v4080_v0 = vld [vmem:[#allocation3 + $0x39] sm:$0xff]  ;;  %v3598_v1 = vpack.c.bf16 %v3567_v63, %v3566_v62  ;;  %v3313_v6 = vld [vmem:[#allocation3 + $0x21] sm:$0xff] }
 0x32f   : > { %4015 = vrot.lane.b32.xlu0 %v3983_v61, %s5402_s23  ;;  %3632 = vrot.lane.b32.xlu1 %v3983_v61, %s7192_s22  ;;  %3296 = vst.msk [vmem:[#allocation4 + $0x10] sm:$0xff] %vm379_vm0, %v3983_v61  ;;  %v4111_v4 = vpack.c.bf16 %v4080_v0, %v4079_v2  ;;  %v4207_v14 = vld [vmem:[#allocation3 + $0x32] sm:$0xff]  ;;  %v4208_v5 = vld [vmem:[#allocation3 + $0x3a] sm:$0xff]  ;;  %v3441_v11 = vld [vmem:[#allocation3 + $0x22] sm:$0xff] }
 0x330   : > { %3295 = vst.msk [vmem:[#allocation4 + $0x8] sm:$0xff] %vm379_vm0, %v3598_v1  ;;  %v4239_v47 = vpack.c.bf16 %v4208_v5, %v4207_v14  ;;  %v3312_v8 = vld [vmem:[#allocation3 + $0x19] sm:$0xff] }
 0x331   : > { %v3343_v9 = vpack.c.bf16 %v3313_v6, %v3312_v8  ;;  %v3440_v10 = vld [vmem:[#allocation3 + $0x1a] sm:$0xff] }
 0x332   : > { %v3471_v25 = vpack.c.bf16 %v3441_v11, %v3440_v10 }
 0x333   : > { %4143 = vrot.lane.b32.xlu0 %v4111_v4, %s7193_s26  ;;  %3760 = vrot.lane.b32.xlu1 %v4111_v4, %s5400_s29 }
 0x337   : > { %4271 = vrot.lane.b32.xlu0 %v4239_v47, %s5404_s21  ;;  %3888 = vrot.lane.b32.xlu1 %v4239_v47, %s7194_s28 }
 0x33b   : > { %3506 = vrot.lane.b32.xlu0 %v4239_v47, %s5398_s27  ;;  %3378 = vrot.lane.b32.xlu1 %v4111_v4, %s7191_s24 }
 0x33f   : > { %3630 = vrot.lane.b32.xlu0 %v3598_v1, %s7192_s22  ;;  %3376 = vrot.lane.b32.xlu1 %v3343_v9, %s7191_s24 }
 0x340   : > { %v5188_v12 = vpop.f32.mrb[16].mxu1 }
 0x341   : > { %v3066_v13 = vadd.f32 %v5188_v12, %v6620_v49  ;;  %v3057_v15 = vpop.f32.mrb[17].mxu1 }
 0x342   : > { %v3058_v16 = vadd.f32 %v6620_v49, %v3057_v15  ;;  %v5189_v17 = vpop.f32.mrb[18].mxu1 }
 0x343   : > { %3175 = vst.msk [vmem:[#allocation3 + $0x61] sm:$0xff] %vm379_vm0, %v3066_v13  ;;  %v3069_v53 = vadd.f32 %v5189_v17, %v6620_v49  ;;  %v3060_v18 = vpop.f32.mrb[19].mxu1  ;;  %3758 = vrot.lane.b32.xlu0 %v3343_v9, %s5400_s29  ;;  %3504 = vrot.lane.b32.xlu1 %v3471_v25, %s5398_s27 }
 0x344   : > { %3173 = vst.msk [vmem:[#allocation3 + $0x49] sm:$0xff] %vm379_vm0, %v3058_v16  ;;  %v3061_v19 = vadd.f32 %v6620_v49, %v3060_v18 }
 0x345   : > { %3176 = vst.msk [vmem:[#allocation3 + $0x69] sm:$0xff] %vm379_vm0, %v3069_v53 }
 0x346   : > { %3174 = vst.msk [vmem:[#allocation3 + $0x51] sm:$0xff] %vm379_vm0, %v3061_v19 }
 0x347   : > { %3886 = vrot.lane.b32.xlu0 %v3471_v25, %s7194_s28 }
 0x34a   : > { %v3955_v20 = vld [vmem:[#allocation3 + $0x60] sm:$0xff] }
 0x34b   : > { %v3953_v24 = vld [vmem:[#allocation3 + $0x48] sm:$0xff] }
 0x34c   : > { %v3956_v21 = vld [vmem:[#allocation3 + $0x68] sm:$0xff] }
 0x34d   : > { %v3985_v22 = vpack.c.bf16 %v3956_v21, %v3955_v20  ;;  %v4084_v23 = vld [vmem:[#allocation3 + $0x69] sm:$0xff]  ;;  %v4083_v28 = vld [vmem:[#allocation3 + $0x61] sm:$0xff]  ;;  %v4210_v36 = vld [vmem:[#allocation3 + $0x52] sm:$0xff] }
 0x34e   : > { %v3954_v26 = vld [vmem:[#allocation3 + $0x50] sm:$0xff]  ;;  %v4113_v29 = vpack.c.bf16 %v4084_v23, %v4083_v28  ;;  %v4211_v30 = vld [vmem:[#allocation3 + $0x62] sm:$0xff] }
 0x34f   : > { %4019 = vrot.lane.b32.xlu0 %v3985_v22, %s5402_s23  ;;  %3636 = vrot.lane.b32.xlu1 %v3985_v22, %s7192_s22  ;;  %v3984_v27 = vpack.c.bf16 %v3954_v26, %v3953_v24  ;;  %3298 = vst.msk [vmem:[#allocation4 + $0x20] sm:$0xff] %vm379_vm0, %v3985_v22  ;;  %v4212_v31 = vld [vmem:[#allocation3 + $0x6a] sm:$0xff] }
 0x350   : > { %v4241_v34 = vpack.c.bf16 %v4212_v31, %v4211_v30  ;;  %v4209_v35 = vld [vmem:[#allocation3 + $0x4a] sm:$0xff] }
 0x351   : > { %3297 = vst.msk [vmem:[#allocation4 + $0x18] sm:$0xff] %vm379_vm0, %v3984_v27  ;;  %v4240_v39 = vpack.c.bf16 %v4210_v36, %v4209_v35  ;;  %v4082_v40 = vld [vmem:[#allocation3 + $0x51] sm:$0xff]  ;;  %v4081_v43 = vld [vmem:[#allocation3 + $0x49] sm:$0xff] }
 0x352   : > { %v4112_v45 = vpack.c.bf16 %v4082_v40, %v4081_v43 }
 0x353   : > { %4147 = vrot.lane.b32.xlu0 %v4113_v29, %s7193_s26  ;;  %3764 = vrot.lane.b32.xlu1 %v4113_v29, %s5400_s29 }
 0x357   : > { %4275 = vrot.lane.b32.xlu0 %v4241_v34, %s5404_s21  ;;  %3892 = vrot.lane.b32.xlu1 %v4241_v34, %s7194_s28 }
 0x35b   : > { %3510 = vrot.lane.b32.xlu0 %v4241_v34, %s5398_s27  ;;  %3382 = vrot.lane.b32.xlu1 %v4113_v29, %s7191_s24 }
 0x35f   : > { %4273 = vrot.lane.b32.xlu0 %v4240_v39, %s5404_s21  ;;  %4017 = vrot.lane.b32.xlu1 %v3984_v27, %s5402_s23 }
 0x360   : > { %v5192_v42 = vpop.f32.mrb[20].mxu1 }
 0x361   : > { %v3082_v44 = vadd.f32 %v5192_v42, %v6620_v49  ;;  %v3073_v37 = vpop.f32.mrb[21].mxu1 }
 0x362   : > { %v3074_v46 = vadd.f32 %v6620_v49, %v3073_v37  ;;  %v5193_v48 = vpop.f32.mrb[22].mxu1 }
 0x363   : > { %3179 = vst.msk [vmem:[#allocation3 + $0x91] sm:$0xff] %vm379_vm0, %v3082_v44  ;;  %v3085_v7 = vadd.f32 %v5193_v48, %v6620_v49  ;;  %v3076_v50 = vpop.f32.mrb[23].mxu1  ;;  %3634 = vrot.lane.b32.xlu0 %v3984_v27, %s7192_s22  ;;  %4145 = vrot.lane.b32.xlu1 %v4112_v45, %s7193_s26 }
 0x364   : > { %3177 = vst.msk [vmem:[#allocation3 + $0x79] sm:$0xff] %vm379_vm0, %v3074_v46  ;;  %v3077_v51 = vadd.f32 %v6620_v49, %v3076_v50 }
 0x365   : > { %3180 = vst.msk [vmem:[#allocation3 + $0x99] sm:$0xff] %vm379_vm0, %v3085_v7 }
 0x366   : > { %3178 = vst.msk [vmem:[#allocation3 + $0x81] sm:$0xff] %vm379_vm0, %v3077_v51 }
 0x367   : > { %3762 = vrot.lane.b32.xlu0 %v4112_v45, %s5400_s29  ;;  %3380 = vrot.lane.b32.xlu1 %v4112_v45, %s7191_s24 }
 0x36a   : > { %v3959_v52 = vld [vmem:[#allocation3 + $0x90] sm:$0xff] }
 0x36b   : > { %3890 = vrot.lane.b32.xlu0 %v4240_v39, %s7194_s28  ;;  %3508 = vrot.lane.b32.xlu1 %v4240_v39, %s5398_s27  ;;  %v3957_v56 = vld [vmem:[#allocation3 + $0x78] sm:$0xff] }
 0x36c   : > { %v3960_v41 = vld [vmem:[#allocation3 + $0x98] sm:$0xff] }
 0x36d   : > { %v3987_v54 = vpack.c.bf16 %v3960_v41, %v3959_v52  ;;  %v4088_v55 = vld [vmem:[#allocation3 + $0x99] sm:$0xff]  ;;  %v4087_v60 = vld [vmem:[#allocation3 + $0x91] sm:$0xff]  ;;  %v4214_v2 = vld [vmem:[#allocation3 + $0x82] sm:$0xff] }
 0x36e   : > { %v3958_v57 = vld [vmem:[#allocation3 + $0x80] sm:$0xff]  ;;  %v4115_v61 = vpack.c.bf16 %v4088_v55, %v4087_v60  ;;  %v4215_v62 = vld [vmem:[#allocation3 + $0x92] sm:$0xff] }
 0x36f   : > { %4023 = vrot.lane.b32.xlu0 %v3987_v54, %s5402_s23  ;;  %3640 = vrot.lane.b32.xlu1 %v3987_v54, %s7192_s22  ;;  %v3986_v58 = vpack.c.bf16 %v3958_v57, %v3957_v56  ;;  %3300 = vst.msk [vmem:[#allocation4 + $0x30] sm:$0xff] %vm379_vm0, %v3987_v54  ;;  %v4216_v63 = vld [vmem:[#allocation3 + $0x9a] sm:$0xff] }
 0x370   : > { %v4243_v0 = vpack.c.bf16 %v4216_v63, %v4215_v62  ;;  %v4213_v1 = vld [vmem:[#allocation3 + $0x7a] sm:$0xff] }
 0x371   : > { %3299 = vst.msk [vmem:[#allocation4 + $0x28] sm:$0xff] %vm379_vm0, %v3986_v58  ;;  %v4242_v47 = vpack.c.bf16 %v4214_v2, %v4213_v1  ;;  %v4086_v9 = vld [vmem:[#allocation3 + $0x81] sm:$0xff]  ;;  %v4085_v13 = vld [vmem:[#allocation3 + $0x79] sm:$0xff] }
 0x372   : > { %v4114_v15 = vpack.c.bf16 %v4086_v9, %v4085_v13 }
 0x373   : > { %4151 = vrot.lane.b32.xlu0 %v4115_v61, %s7193_s26  ;;  %3768 = vrot.lane.b32.xlu1 %v4115_v61, %s5400_s29 }
 0x377   : > { %4279 = vrot.lane.b32.xlu0 %v4243_v0, %s5404_s21  ;;  %3896 = vrot.lane.b32.xlu1 %v4243_v0, %s7194_s28 }
 0x37b   : > { %3514 = vrot.lane.b32.xlu0 %v4243_v0, %s5398_s27  ;;  %3386 = vrot.lane.b32.xlu1 %v4115_v61, %s7191_s24 }
 0x37c   : > { %v5196_v4 = vpop.f32.mrb[24].mxu1 }
 0x37d   : > { %v3098_v14 = vadd.f32 %v5196_v4, %v6620_v49  ;;  %v3089_v5 = vpop.f32.mrb[25].mxu1 }
 0x37e   : > { %v3090_v6 = vadd.f32 %v6620_v49, %v3089_v5  ;;  %v5197_v8 = vpop.f32.mrb[26].mxu1 }
 0x37f   : > { %3183 = vst.msk [vmem:[#allocation3 + $0xc1] sm:$0xff] %vm379_vm0, %v3098_v14  ;;  %v3101_v10 = vadd.f32 %v5197_v8, %v6620_v49  ;;  %v3092_v11 = vpop.f32.mrb[27].mxu1  ;;  %4277 = vrot.lane.b32.xlu0 %v4242_v47, %s5404_s21  ;;  %4021 = vrot.lane.b32.xlu1 %v3986_v58, %s5402_s23 }
 0x380   : > { %3181 = vst.msk [vmem:[#allocation3 + $0xa9] sm:$0xff] %vm379_vm0, %v3090_v6  ;;  %v3093_v12 = vadd.f32 %v6620_v49, %v3092_v11 }
 0x381   : > { %3184 = vst.msk [vmem:[#allocation3 + $0xc9] sm:$0xff] %vm379_vm0, %v3101_v10 }
 0x382   : > { %3182 = vst.msk [vmem:[#allocation3 + $0xb1] sm:$0xff] %vm379_vm0, %v3093_v12 }
 0x383   : > { %3638 = vrot.lane.b32.xlu0 %v3986_v58, %s7192_s22  ;;  %4149 = vrot.lane.b32.xlu1 %v4114_v15, %s7193_s26 }
 0x386   : > { %v3963_v25 = vld [vmem:[#allocation3 + $0xc0] sm:$0xff] }
 0x387   : > { %3766 = vrot.lane.b32.xlu0 %v4114_v15, %s5400_s29  ;;  %3384 = vrot.lane.b32.xlu1 %v4114_v15, %s7191_s24  ;;  %v3961_v53 = vld [vmem:[#allocation3 + $0xa8] sm:$0xff] }
 0x388   : > { %v3964_v16 = vld [vmem:[#allocation3 + $0xc8] sm:$0xff] }
 0x389   : > { %v3989_v17 = vpack.c.bf16 %v3964_v16, %v3963_v25  ;;  %v3962_v18 = vld [vmem:[#allocation3 + $0xb0] sm:$0xff]  ;;  %v4091_v22 = vld [vmem:[#allocation3 + $0xc1] sm:$0xff] }
 0x38a   : > { %v3988_v19 = vpack.c.bf16 %v3962_v18, %v3961_v53  ;;  %v4092_v20 = vld [vmem:[#allocation3 + $0xc9] sm:$0xff]  ;;  %v4218_v36 = vld [vmem:[#allocation3 + $0xb2] sm:$0xff] }
 0x38b   : > { %3894 = vrot.lane.b32.xlu0 %v4242_v47, %s7194_s28  ;;  %3512 = vrot.lane.b32.xlu1 %v4242_v47, %s5398_s27  ;;  %3302 = vst.msk [vmem:[#allocation4 + $0x40] sm:$0xff] %vm379_vm0, %v3989_v17  ;;  %v4117_v26 = vpack.c.bf16 %v4092_v20, %v4091_v22  ;;  %v4219_v29 = vld [vmem:[#allocation3 + $0xc2] sm:$0xff]  ;;  %v4220_v30 = vld [vmem:[#allocation3 + $0xca] sm:$0xff] }
 0x38c   : > { %3301 = vst.msk [vmem:[#allocation4 + $0x38] sm:$0xff] %vm379_vm0, %v3988_v19  ;;  %v4245_v3 = vpack.c.bf16 %v4220_v30, %v4219_v29  ;;  %v4217_v35 = vld [vmem:[#allocation3 + $0xaa] sm:$0xff] }
 0x38d   : > { %v4244_v42 = vpack.c.bf16 %v4218_v36, %v4217_v35  ;;  %v4090_v44 = vld [vmem:[#allocation3 + $0xb1] sm:$0xff]  ;;  %v4089_v46 = vld [vmem:[#allocation3 + $0xa9] sm:$0xff] }
 0x38e   : > { %v4116_v50 = vpack.c.bf16 %v4090_v44, %v4089_v46 }
 0x38f   : > { %4027 = vrot.lane.b32.xlu0 %v3989_v17, %s5402_s23  ;;  %3644 = vrot.lane.b32.xlu1 %v3989_v17, %s7192_s22 }
 0x392   : > { %v5200_v21 = vpop.f32.mrb[28].mxu1 }
 0x393   : > { %v3114_v23 = vadd.f32 %v5200_v21, %v6620_v49  ;;  %v3105_v24 = vpop.f32.mrb[29].mxu1  ;;  %4155 = vrot.lane.b32.xlu0 %v4117_v26, %s7193_s26  ;;  %3772 = vrot.lane.b32.xlu1 %v4117_v26, %s5400_s29 }
 0x394   : > { %v3106_v27 = vadd.f32 %v6620_v49, %v3105_v24  ;;  %v5201_v28 = vpop.f32.mrb[30].mxu1 }
 0x395   : > { %3187 = vst.msk [vmem:[#allocation3 + $0xf1] sm:$0xff] %vm379_vm0, %v3114_v23  ;;  %v3117_v31 = vadd.f32 %v5201_v28, %v6620_v49  ;;  %v3108_v33 = vpop.f32.mrb[31].mxu1 }
 0x396   : > { %3185 = vst.msk [vmem:[#allocation3 + $0xd9] sm:$0xff] %vm379_vm0, %v3106_v27  ;;  %v3109_v34 = vadd.f32 %v6620_v49, %v3108_v33 }
 0x397   : > { %3188 = vst.msk [vmem:[#allocation3 + $0xf9] sm:$0xff] %vm379_vm0, %v3117_v31  ;;  %4283 = vrot.lane.b32.xlu0 %v4245_v3, %s5404_s21  ;;  %3900 = vrot.lane.b32.xlu1 %v4245_v3, %s7194_s28 }
 0x398   : > { %3186 = vst.msk [vmem:[#allocation3 + $0xe1] sm:$0xff] %vm379_vm0, %v3109_v34 }
 0x39b   : > { %3518 = vrot.lane.b32.xlu0 %v4245_v3, %s5398_s27  ;;  %3390 = vrot.lane.b32.xlu1 %v4117_v26, %s7191_s24 }
 0x39c   : > { %v3967_v38 = vld [vmem:[#allocation3 + $0xf0] sm:$0xff] }
 0x39d   : > { %v3965_v40 = vld [vmem:[#allocation3 + $0xd8] sm:$0xff] }
 0x39e   : > { %v3968_v39 = vld [vmem:[#allocation3 + $0xf8] sm:$0xff] }
 0x39f   : > { %v3991_v43 = vpack.c.bf16 %v3968_v39, %v3967_v38  ;;  %v3966_v37 = vld [vmem:[#allocation3 + $0xe0] sm:$0xff]  ;;  %4281 = vrot.lane.b32.xlu0 %v4244_v42, %s5404_s21  ;;  %4025 = vrot.lane.b32.xlu1 %v3988_v19, %s5402_s23  ;;  %v4095_v57 = vld [vmem:[#allocation3 + $0xf1] sm:$0xff] }
 0x3a0   : > { %v6740_v45 = vpack.c.bf16 %v3966_v37, %v3965_v40  ;;  %v4096_v58 = vld [vmem:[#allocation3 + $0xf9] sm:$0xff]  ;;  %v4222_v15 = vld [vmem:[#allocation3 + $0xe2] sm:$0xff] }
 0x3a1   : > { %3304 = vst.msk [vmem:[#allocation4 + $0x50] sm:$0xff] %vm379_vm0, %v3991_v43  ;;  %v4016_v48 = vpop.permute.xlu0 %4015  ;;  %v3633_v7 = vpop.permute.xlu1 %3632  ;;  %v4119_v62 = vpack.c.bf16 %v4096_v58, %v4095_v57  ;;  %v4223_v0 = vld [vmem:[#allocation3 + $0xf2] sm:$0xff]  ;;  %v4224_v1 = vld [vmem:[#allocation3 + $0xfa] sm:$0xff] }
 0x3a2   : > { %3303 = vst.msk [vmem:[#allocation4 + $0x48] sm:$0xff] %vm379_vm0, %v6740_v45  ;;  %v4247_v9 = vpack.c.bf16 %v4224_v1, %v4223_v0  ;;  %v4221_v13 = vld [vmem:[#allocation3 + $0xda] sm:$0xff] }
 0x3a3   : > { %3642 = vrot.lane.b32.xlu0 %v3988_v19, %s7192_s22  ;;  %4153 = vrot.lane.b32.xlu1 %v4116_v50, %s7193_s26  ;;  %v4246_v16 = vpack.c.bf16 %v4222_v15, %v4221_v13  ;;  %v4093_v17 = vld [vmem:[#allocation3 + $0xd9] sm:$0xff]  ;;  %v4094_v53 = vld [vmem:[#allocation3 + $0xe1] sm:$0xff] }
 0x3a4   : > { %v4118_v24 = vpack.c.bf16 %v4094_v53, %v4093_v17 }
 0x3a5   : > { %v4144_v51 = vpop.permute.xlu0 %4143  ;;  %v3761_v52 = vpop.permute.xlu1 %3760 }
 0x3a7   : > { %3770 = vrot.lane.b32.xlu0 %v4116_v50, %s5400_s29  ;;  %3388 = vrot.lane.b32.xlu1 %v4116_v50, %s7191_s24 }
 0x3a9   : > { %v4272_v41 = vpop.permute.xlu0 %4271  ;;  %v3889_v54 = vpop.permute.xlu1 %3888 }
 0x3ab   : > { %3898 = vrot.lane.b32.xlu0 %v4244_v42, %s7194_s28  ;;  %3516 = vrot.lane.b32.xlu1 %v4244_v42, %s5398_s27 }
 0x3ad   : > { %v3507_v55 = vpop.permute.xlu0 %3506  ;;  %v3379_v56 = vpop.permute.xlu1 %3378 }
 0x3ae   : > { %3424 = vst.msk [vmem:[#allocation4 + $0x10] sm:$0xff] %vm508_vm2, %v3379_v56 }
 0x3af   : > { %3552 = vst.msk [vmem:[#allocation4 + $0x10] sm:$0xff] %vm637_vm3, %v3507_v55  ;;  %4031 = vrot.lane.b32.xlu0 %v3991_v43, %s5402_s23  ;;  %3648 = vrot.lane.b32.xlu1 %v3991_v43, %s7192_s22 }
 0x3b1   : > { %v3631_v60 = vpop.permute.xlu0 %3630  ;;  %v3377_v61 = vpop.permute.xlu1 %3376 }
 0x3b2   : > { %3678 = vst.msk [vmem:[#allocation4] sm:$0xff] %vm767_vm4, %v3631_v60 }
 0x3b3   : > { %3423 = vst.msk [vmem:[#allocation4 + $0x8] sm:$0xff] %vm508_vm2, %v3377_v61  ;;  %v5204_v63 = vpop.f32.mrb[32].mxu1  ;;  %4159 = vrot.lane.b32.xlu0 %v4119_v62, %s7193_s26  ;;  %3776 = vrot.lane.b32.xlu1 %v4119_v62, %s5400_s29 }
 0x3b4   : > { %v3130_v2 = vadd.f32 %v5204_v63, %v6620_v49  ;;  %v3121_v4 = vpop.f32.mrb[33].mxu1 }
 0x3b5   : > { %v3122_v14 = vadd.f32 %v6620_v49, %v3121_v4  ;;  %v5205_v5 = vpop.f32.mrb[34].mxu1  ;;  %v3759_v8 = vpop.permute.xlu0 %3758 }
 0x3b6   : > { %3191 = vst.msk [vmem:[#allocation3 + $0x121] sm:$0xff] %vm379_vm0, %v3130_v2  ;;  %v3133_v47 = vadd.f32 %v5205_v5, %v6620_v49  ;;  %v3124_v6 = vpop.f32.mrb[35].mxu1  ;;  %v3505_v11 = vpop.permute.xlu1 %3504 }
 0x3b7   : > { %3189 = vst.msk [vmem:[#allocation3 + $0x109] sm:$0xff] %vm379_vm0, %v3122_v14  ;;  %v3125_v10 = vadd.f32 %v6620_v49, %v3124_v6  ;;  %4287 = vrot.lane.b32.xlu0 %v4247_v9, %s5404_s21  ;;  %3904 = vrot.lane.b32.xlu1 %v4247_v9, %s7194_s28 }
 0x3b8   : > { %3806 = vst.msk [vmem:[#allocation4] sm:$0xff] %vm7195_vm1, %v3759_v8  ;;  %vm7207_vm1 = vmmov %vm7197_vm6 }
 0x3b9   : > { %3192 = vst.msk [vmem:[#allocation3 + $0x129] sm:$0xff] %vm379_vm0, %v3133_v47  ;;  %3190 = vst.msk [vmem:[#allocation3 + $0x111] sm:$0xff] %vm379_vm0, %v3125_v10  ;;  %v3887_v12 = vpop.permute.xlu0 %3886 }
 0x3ba   : > { %3551 = vst.msk [vmem:[#allocation4 + $0x8] sm:$0xff] %vm637_vm3, %v3505_v11 }
 0x3bb   : > { %3679 = vst.msk [vmem:[#allocation4 + $0x8] sm:$0xff] %vm767_vm4, %v3633_v7  ;;  %3522 = vrot.lane.b32.xlu0 %v4247_v9, %s5398_s27  ;;  %3394 = vrot.lane.b32.xlu1 %v4119_v62, %s7191_s24 }
 0x3bc   : > { %3807 = vst.msk [vmem:[#allocation4 + $0x8] sm:$0xff] %vm7196_vm5, %v3761_v52  ;;  %vm7208_vm5 = vmmov %vm7199_vm8 }
 0x3bd   : > { %3935 = vst.msk [vmem:[#allocation4 + $0x8] sm:$0xff] %vm7197_vm6, %v3889_v54  ;;  %v3971_v25 = vld [vmem:[#allocation3 + $0x120] sm:$0xff]  ;;  %vm7209_vm6 = vmmov %vm7200_vm9 }
 0x3be   : > { %3934 = vst.msk [vmem:[#allocation4] sm:$0xff] %vm7198_vm7, %v3887_v12  ;;  %v3969_v19 = vld [vmem:[#allocation3 + $0x108] sm:$0xff]  ;;  %vm7210_vm7 = vmmov %vm7202_vm11 }
 0x3bf   : > { %4063 = vst.msk [vmem:[#allocation4] sm:$0xff] %vm7199_vm8, %v4016_v48  ;;  %4285 = vrot.lane.b32.xlu0 %v4246_v16, %s5404_s21  ;;  %4029 = vrot.lane.b32.xlu1 %v6740_v45, %s5402_s23  ;;  %v4099_v3 = vld [vmem:[#allocation3 + $0x121] sm:$0xff]  ;;  %v4097_v62 = vld [vmem:[#allocation3 + $0x109] sm:$0xff]  ;;  %vm7211_vm8 = vmmov %vm7201_vm10 }
 0x3c0   : > { %4191 = vst.msk [vmem:[#allocation4] sm:$0xff] %vm7200_vm9, %v4144_v51  ;;  %v3972_v18 = vld [vmem:[#allocation3 + $0x128] sm:$0xff]  ;;  %v3970_v21 = vld [vmem:[#allocation3 + $0x110] sm:$0xff]  ;;  %vm7212_vm9 = vmmov %vm7206_vm13 }
 0x3c1   : > { %4319 = vst.msk [vmem:[#allocation4] sm:$0xff] %vm7201_vm10, %v4272_v41  ;;  %v3993_v20 = vpack.c.bf16 %v3972_v18, %v3971_v25  ;;  %v6783_v22 = vpop.permute.xlu0 %4019  ;;  %v6785_v23 = vpop.permute.xlu1 %3636  ;;  %v6787_v26 = vpack.c.bf16 %v3970_v21, %v3969_v19  ;;  %v4100_v35 = vld [vmem:[#allocation3 + $0x129] sm:$0xff]  ;;  %v4226_v57 = vld [vmem:[#allocation3 + $0x112] sm:$0xff]  ;;  %vm7213_vm10 = vmmov %vm7207_vm1 }
 0x3c2   : > { %v4121_v39 = vpack.c.bf16 %v4100_v35, %v4099_v3  ;;  %v4227_v42 = vld [vmem:[#allocation3 + $0x122] sm:$0xff]  ;;  %v4228_v43 = vld [vmem:[#allocation3 + $0x12a] sm:$0xff] }
 0x3c3   : > { %3306 = vst.msk [vmem:[#allocation4 + $0x60] sm:$0xff] %vm379_vm0, %v3993_v20  ;;  %3646 = vrot.lane.b32.xlu0 %v6740_v45, %s7192_s22  ;;  %4157 = vrot.lane.b32.xlu1 %v4118_v24, %s7193_s26  ;;  %3305 = vst.msk [vmem:[#allocation4 + $0x58] sm:$0xff] %vm379_vm0, %v6787_v26  ;;  %v4249_v51 = vpack.c.bf16 %v4228_v43, %v4227_v42  ;;  %v4225_v56 = vld [vmem:[#allocation3 + $0x10a] sm:$0xff] }
 0x3c4   : > { %v4248_v61 = vpack.c.bf16 %v4226_v57, %v4225_v56  ;;  %v4098_v0 = vld [vmem:[#allocation3 + $0x111] sm:$0xff] }
 0x3c5   : > { %v6796_v28 = vpop.permute.xlu0 %4147  ;;  %v6798_v29 = vpop.permute.xlu1 %3764  ;;  %v4120_v6 = vpack.c.bf16 %v4098_v0, %v4097_v62 }
 0x3c7   : > { %3774 = vrot.lane.b32.xlu0 %v4118_v24, %s5400_s29  ;;  %3392 = vrot.lane.b32.xlu1 %v4118_v24, %s7191_s24 }
 0x3c8   : > { %v4335_v27 = vld [vmem:[#allocation4] sm:$0xff] }
 0x3c9   : > { %5220 = vmatprep.mubr.msk.bf16.mxu0 %vm7202_vm11, %v4335_v27  ;;  %v6802_v30 = vpop.permute.xlu0 %4275  ;;  %v6804_v31 = vpop.permute.xlu1 %3892  ;;  %vm7214_vm11 = vmmov %vm7210_vm7 }
 0x3cb   : > { %3902 = vrot.lane.b32.xlu0 %v4246_v16, %s7194_s28  ;;  %3520 = vrot.lane.b32.xlu1 %v4246_v16, %s5398_s27 }
 0x3cd   : > { %v3511_v33 = vpop.permute.xlu0 %3510  ;;  %v3383_v34 = vpop.permute.xlu1 %3382 }
 0x3ce   : > { %3426 = vst.msk [vmem:[#allocation4 + $0x20] sm:$0xff] %vm508_vm2, %v3383_v34 }
 0x3cf   : > { %3554 = vst.msk [vmem:[#allocation4 + $0x20] sm:$0xff] %vm637_vm3, %v3511_v33  ;;  %4035 = vrot.lane.b32.xlu0 %v3993_v20, %s5402_s23  ;;  %3652 = vrot.lane.b32.xlu1 %v3993_v20, %s7192_s22 }
 0x3d1   : > { %v4274_v36 = vpop.permute.xlu0 %4273  ;;  %v4018_v38 = vpop.permute.xlu1 %4017 }
 0x3d2   : > { %4064 = vst.msk [vmem:[#allocation4 + $0x8] sm:$0xff] %vm7203_vm14, %v4018_v38  ;;  %vm7215_vm14 = vmmov %vm7208_vm5 }
 0x3d3   : > { %v5208_v40 = vpop.f32.mrb[36].mxu1  ;;  %4163 = vrot.lane.b32.xlu0 %v4121_v39, %s7193_s26  ;;  %3780 = vrot.lane.b32.xlu1 %v4121_v39, %s5400_s29 }
 0x3d4   : > { %v3146_v44 = vadd.f32 %v5208_v40, %v6620_v49  ;;  %v3137_v37 = vpop.f32.mrb[37].mxu1 }
 0x3d5   : > { %v3138_v45 = vadd.f32 %v6620_v49, %v3137_v37  ;;  %v5209_v46 = vpop.f32.mrb[38].mxu1  ;;  %v3635_v50 = vpop.permute.xlu0 %3634 }
 0x3d6   : > { %3195 = vst.msk [vmem:[#allocation3 + $0x151] sm:$0xff] %vm379_vm0, %v3146_v44  ;;  %v3149_v48 = vadd.f32 %v5209_v46, %v6620_v49  ;;  %v3140_v7 = vpop.f32.mrb[39].mxu1  ;;  %v4146_v41 = vpop.permute.xlu1 %4145 }
 0x3d7   : > { %3193 = vst.msk [vmem:[#allocation3 + $0x139] sm:$0xff] %vm379_vm0, %v3138_v45  ;;  %v3141_v52 = vadd.f32 %v6620_v49, %v3140_v7  ;;  %4291 = vrot.lane.b32.xlu0 %v4249_v51, %s5404_s21  ;;  %3908 = vrot.lane.b32.xlu1 %v4249_v51, %s7194_s28 }
 0x3d8   : > { %3680 = vst.msk [vmem:[#allocation4 + $0x10] sm:$0xff] %vm767_vm4, %v3635_v50 }
 0x3d9   : > { %3196 = vst.msk [vmem:[#allocation3 + $0x159] sm:$0xff] %vm379_vm0, %v3149_v48  ;;  %3194 = vst.msk [vmem:[#allocation3 + $0x141] sm:$0xff] %vm379_vm0, %v3141_v52  ;;  %v3763_v54 = vpop.permute.xlu0 %3762 }
 0x3da   : > { %4192 = vst.msk [vmem:[#allocation4 + $0x8] sm:$0xff] %vm7204_vm15, %v4146_v41  ;;  %v3381_v55 = vpop.permute.xlu1 %3380  ;;  %vm7216_vm15 = vmmov %vm7209_vm6 }
 0x3db   : > { %4320 = vst.msk [vmem:[#allocation4 + $0x8] sm:$0xff] %vm7205_vm12, %v4274_v36  ;;  %3526 = vrot.lane.b32.xlu0 %v4249_v51, %s5398_s27  ;;  %3398 = vrot.lane.b32.xlu1 %v4121_v39, %s7191_s24  ;;  %vm7217_vm12 = vmmov %vm7211_vm8 }
 0x3dc   : > { %3808 = vst.msk [vmem:[#allocation4 + $0x10] sm:$0xff] %vm7206_vm13, %v3763_v54  ;;  %vm7218_vm13 = vmmov %vm7212_vm9 }
 0x3dd   : > { %3425 = vst.msk [vmem:[#allocation4 + $0x18] sm:$0xff] %vm508_vm2, %v3381_v55  ;;  %v3975_v58 = vld [vmem:[#allocation3 + $0x150] sm:$0xff]  ;;  %v3891_v60 = vpop.permute.xlu0 %3890 }
 0x3de   : > { %3936 = vst.msk [vmem:[#allocation4 + $0x10] sm:$0xff] %vm7207_vm1, %v3891_v60  ;;  %v3509_v63 = vpop.permute.xlu1 %3508  ;;  %v3973_v2 = vld [vmem:[#allocation3 + $0x138] sm:$0xff] }
 0x3df   : > { %4065 = vst.msk [vmem:[#allocation4 + $0x10] sm:$0xff] %vm7208_vm5, %v6783_v22  ;;  %4289 = vrot.lane.b32.xlu0 %v4248_v61, %s5404_s21  ;;  %4033 = vrot.lane.b32.xlu1 %v6787_v26, %s5402_s23  ;;  %v4103_v17 = vld [vmem:[#allocation3 + $0x151] sm:$0xff]  ;;  %v4101_v43 = vld [vmem:[#allocation3 + $0x139] sm:$0xff] }
 0x3e0   : > { %v3976_v1 = vld [vmem:[#allocation3 + $0x158] sm:$0xff]  ;;  %3553 = vst.msk [vmem:[#allocation4 + $0x18] sm:$0xff] %vm637_vm3, %v3509_v63  ;;  %v3974_v5 = vld [vmem:[#allocation3 + $0x140] sm:$0xff] }
 0x3e1   : > { %v3995_v14 = vpack.c.bf16 %v3976_v1, %v3975_v58  ;;  %4193 = vst.msk [vmem:[#allocation4 + $0x10] sm:$0xff] %vm7209_vm6, %v6796_v28  ;;  %v6848_v47 = vpop.permute.xlu0 %4023  ;;  %v6850_v8 = vpack.c.bf16 %v3974_v5, %v3973_v2  ;;  %v4104_v53 = vld [vmem:[#allocation3 + $0x159] sm:$0xff]  ;;  %v4230_v39 = vld [vmem:[#allocation3 + $0x142] sm:$0xff] }
 0x3e2   : > { %v4336_v4 = vld [vmem:[#allocation4 + $0x8] sm:$0xff]  ;;  %3681 = vst.msk [vmem:[#allocation4 + $0x18] sm:$0xff] %vm767_vm4, %v6785_v23  ;;  %v6855_v9 = vpop.permute.xlu1 %3640  ;;  %v4123_v19 = vpack.c.bf16 %v4104_v53, %v4103_v17  ;;  %v4102_v44 = vld [vmem:[#allocation3 + $0x141] sm:$0xff] }
 0x3e3   : > { %5221 = vmatmul.mubr.msk.bf16.vlgmr.msra.gmra.mrb[20].mxu0 %vm7210_vm7, %v4336_v4  ;;  %4321 = vst.msk [vmem:[#allocation4 + $0x10] sm:$0xff] %vm7211_vm8, %v6802_v30  ;;  %3650 = vrot.lane.b32.xlu0 %v6787_v26, %s7192_s22  ;;  %v4231_v21 = vld [vmem:[#allocation3 + $0x152] sm:$0xff]  ;;  %v4232_v22 = vld [vmem:[#allocation3 + $0x15a] sm:$0xff]  ;;  %v4122_v48 = vpack.c.bf16 %v4102_v44, %v4101_v43 }
 0x3e4   : > { %3809 = vst.msk [vmem:[#allocation4 + $0x18] sm:$0xff] %vm7212_vm9, %v6798_v29  ;;  %4161 = vrot.lane.b32.xlu1 %v4120_v6, %s7193_s26  ;;  %v4251_v26 = vpack.c.bf16 %v4232_v22, %v4231_v21  ;;  %v4229_v38 = vld [vmem:[#allocation3 + $0x13a] sm:$0xff] }
 0x3e5   : > { %3308 = vst.msk [vmem:[#allocation4 + $0x70] sm:$0xff] %vm379_vm0, %v3995_v14  ;;  %3307 = vst.msk [vmem:[#allocation4 + $0x68] sm:$0xff] %vm379_vm0, %v6850_v8  ;;  %v6862_v10 = vpop.permute.xlu0 %4151  ;;  %v4250_v42 = vpack.c.bf16 %v4230_v39, %v4229_v38  ;;  %v4109_v21 = vld [vmem:[#allocation3 + $0x199] sm:$0xff]  ;;  %v4110_v22 = vld [vmem:[#allocation3 + $0x1a1] sm:$0xff] }
 0x3e6   : > { %3937 = vst.msk [vmem:[#allocation4 + $0x18] sm:$0xff] %vm7213_vm10, %v6804_v31  ;;  %v6864_v11 = vpop.permute.xlu1 %3768  ;;  %vm7219_vm10 = vmmov %vm7207_vm1 }
 0x3e7   : > { %3778 = vrot.lane.b32.xlu0 %v4120_v6, %s5400_s29 }
 0x3e8   : > { %3396 = vrot.lane.b32.xlu1 %v4120_v6, %s7191_s24 }
 0x3e9   : > { %v6868_v13 = vpop.permute.xlu0 %4279 }
 0x3ea   : > { %v4337_v12 = vld [vmem:[#allocation4 + $0x10] sm:$0xff]  ;;  %v6871_v15 = vpop.permute.xlu1 %3896 }
 0x3eb   : > { %5224 = vmatprep.mubr.msk.bf16.mxu0 %vm7214_vm11, %v4337_v12  ;;  %3906 = vrot.lane.b32.xlu0 %v4248_v61, %s7194_s28  ;;  %vm7220_vm11 = vmmov %vm7210_vm7 }
 0x3ec   : > { %3524 = vrot.lane.b32.xlu1 %v4248_v61, %s5398_s27 }
 0x3ed   : > { %v3515_v25 = vpop.permute.xlu0 %3514 }
 0x3ee   : > { %v3387_v16 = vpop.permute.xlu1 %3386 }
 0x3ef   : > { %3428 = vst.msk [vmem:[#allocation4 + $0x30] sm:$0xff] %vm508_vm2, %v3387_v16  ;;  %4039 = vrot.lane.b32.xlu0 %v3995_v14, %s5402_s23 }
 0x3f0   : > { %3656 = vrot.lane.b32.xlu1 %v3995_v14, %s7192_s22  ;;  %3556 = vst.msk [vmem:[#allocation4 + $0x30] sm:$0xff] %vm637_vm3, %v3515_v25 }
 0x3f1   : > { %v4278_v18 = vpop.permute.xlu0 %4277 }
 0x3f2   : > { %v4022_v20 = vpop.permute.xlu1 %4021 }
 0x3f3   : > { %4066 = vst.msk [vmem:[#allocation4 + $0x18] sm:$0xff] %vm7215_vm14, %v4022_v20  ;;  %4167 = vrot.lane.b32.xlu0 %v4123_v19, %s7193_s26  ;;  %vm7222_vm14 = vmmov %vm7209_vm6 }
 0x3f4   : > { %3784 = vrot.lane.b32.xlu1 %v4123_v19, %s5400_s29 }
 0x3f5   : > { %v3639_v24 = vpop.permute.xlu0 %3638 }
 0x3f6   : > { %v5212_v23 = vpop.f32.mrb[40].mxu1  ;;  %3682 = vst.msk [vmem:[#allocation4 + $0x20] sm:$0xff] %vm767_vm4, %v3639_v24  ;;  %v4150_v29 = vpop.permute.xlu1 %4149 }
 0x3f7   : > { %v3162_v27 = vadd.f32 %v5212_v23, %v6620_v49  ;;  %v3153_v28 = vpop.f32.mrb[41].mxu1  ;;  %4194 = vst.msk [vmem:[#allocation4 + $0x18] sm:$0xff] %vm7216_vm15, %v4150_v29  ;;  %4295 = vrot.lane.b32.xlu0 %v4251_v26, %s5404_s21  ;;  %vm7223_vm15 = vmmov %vm7211_vm8  ;;  %v4238_v29 = vld [vmem:[#allocation3 + $0x1a2] sm:$0xff] }
 0x3f8   : > { %v3154_v30 = vadd.f32 %v6620_v49, %v3153_v28  ;;  %v5213_v31 = vpop.f32.mrb[42].mxu1  ;;  %3912 = vrot.lane.b32.xlu1 %v4251_v26, %s7194_s28  ;;  %4322 = vst.msk [vmem:[#allocation4 + $0x18] sm:$0xff] %vm7217_vm12, %v4278_v18  ;;  %vm7224_vm12 = vmmov %vm7212_vm9  ;;  %v4237_v28 = vld [vmem:[#allocation3 + $0x19a] sm:$0xff] }
 0x3f9   : > { %3199 = vst.msk [vmem:[#allocation3 + $0x181] sm:$0xff] %vm379_vm0, %v3162_v27  ;;  %v3165_v33 = vadd.f32 %v5213_v31, %v6620_v49  ;;  %v3156_v34 = vpop.f32.mrb[43].mxu1  ;;  %v3767_v35 = vpop.permute.xlu0 %3766 }
 0x3fa   : > { %3197 = vst.msk [vmem:[#allocation3 + $0x169] sm:$0xff] %vm379_vm0, %v3154_v30  ;;  %v3157_v3 = vadd.f32 %v6620_v49, %v3156_v34  ;;  %v3385_v36 = vpop.permute.xlu1 %3384 }
 0x3fb   : > { %3200 = vst.msk [vmem:[#allocation3 + $0x189] sm:$0xff] %vm379_vm0, %v3165_v33  ;;  %3530 = vrot.lane.b32.xlu0 %v4251_v26, %s5398_s27  ;;  %v4126_v26 = vpack.c.bf16 %v4110_v22, %v4109_v21  ;;  %v4254_v33 = vpack.c.bf16 %v4238_v29, %v4237_v28 }
 0x3fc   : > { %3810 = vst.msk [vmem:[#allocation4 + $0x20] sm:$0xff] %vm7218_vm13, %v3767_v35  ;;  %3402 = vrot.lane.b32.xlu1 %v4123_v19, %s7191_s24  ;;  %vm7225_vm13 = vmmov %vm7207_vm1 }
 0x3fd   : > { %3198 = vst.msk [vmem:[#allocation3 + $0x171] sm:$0xff] %vm379_vm0, %v3157_v3  ;;  %v3895_v40 = vpop.permute.xlu0 %3894 }
 0x3fe   : > { %3427 = vst.msk [vmem:[#allocation4 + $0x28] sm:$0xff] %vm508_vm2, %v3385_v36  ;;  %v3513_v49 = vpop.permute.xlu1 %3512 }
 0x3ff   : > { %3938 = vst.msk [vmem:[#allocation4 + $0x20] sm:$0xff] %vm7207_vm1, %v3895_v40  ;;  %4293 = vrot.lane.b32.xlu0 %v4250_v42, %s5404_s21  ;;  %v4338_v37 = vld [vmem:[#allocation4 + $0x18] sm:$0xff] }
 0x400   : > { %4067 = vst.msk [vmem:[#allocation4 + $0x20] sm:$0xff] %vm7208_vm5, %v6848_v47  ;;  %4037 = vrot.lane.b32.xlu1 %v6850_v8, %s5402_s23  ;;  %5225 = vmatmul.mubr.msk.bf16.gmra.mrb[24].mxu0 %vm7210_vm7, %v4338_v37  ;;  %v3979_v57 = vld [vmem:[#allocation3 + $0x180] sm:$0xff] }
 0x401   : > { %3555 = vst.msk [vmem:[#allocation4 + $0x28] sm:$0xff] %vm637_vm3, %v3513_v49  ;;  %v3594_v45 = vld [vmem:[#allocation3 + $0x168] sm:$0xff]  ;;  %v4028_v46 = vpop.permute.xlu0 %4027 }
 0x402   : > { %4195 = vst.msk [vmem:[#allocation4 + $0x20] sm:$0xff] %vm7209_vm6, %v6862_v10  ;;  %v6917_v7 = vpop.permute.xlu1 %3644  ;;  %v3980_v58 = vld [vmem:[#allocation3 + $0x188] sm:$0xff] }
 0x403   : > { %3683 = vst.msk [vmem:[#allocation4 + $0x28] sm:$0xff] %vm767_vm4, %v6855_v9  ;;  %3654 = vrot.lane.b32.xlu0 %v6850_v8, %s7192_s22  ;;  %v3997_v61 = vpack.c.bf16 %v3980_v58, %v3979_v57  ;;  %v4107_v63 = vld [vmem:[#allocation3 + $0x181] sm:$0xff]  ;;  %v4108_v0 = vld [vmem:[#allocation3 + $0x189] sm:$0xff] }
 0x404   : > { %4323 = vst.msk [vmem:[#allocation4 + $0x20] sm:$0xff] %vm7211_vm8, %v6868_v13  ;;  %v3595_v50 = vld [vmem:[#allocation3 + $0x170] sm:$0xff]  ;;  %4165 = vrot.lane.b32.xlu1 %v4122_v48, %s7193_s26  ;;  %v4125_v2 = vpack.c.bf16 %v4108_v0, %v4107_v63  ;;  %v3852_v4 = vld [vmem:[#allocation3 + $0x182] sm:$0xff] }
 0x405   : > { %3811 = vst.msk [vmem:[#allocation4 + $0x28] sm:$0xff] %vm7212_vm9, %v6864_v11  ;;  %v3612_v51 = vpack.c.bf16 %v3595_v50, %v3594_v45  ;;  %v4156_v52 = vpop.permute.xlu0 %4155  ;;  %v4233_v5 = vld [vmem:[#allocation3 + $0x16a] sm:$0xff]  ;;  %v4234_v47 = vld [vmem:[#allocation3 + $0x172] sm:$0xff] }
 0x406   : > { %3939 = vst.msk [vmem:[#allocation4 + $0x28] sm:$0xff] %vm7219_vm10, %v6871_v15  ;;  %v3773_v41 = vpop.permute.xlu1 %3772  ;;  %v3853_v6 = vld [vmem:[#allocation3 + $0x18a] sm:$0xff]  ;;  %v4252_v9 = vpack.c.bf16 %v4234_v47, %v4233_v5 }
 0x407   : > { %3309 = vst.msk [vmem:[#allocation4 + $0x78] sm:$0xff] %vm379_vm0, %v3612_v51  ;;  %3782 = vrot.lane.b32.xlu0 %v4122_v48, %s5400_s29  ;;  %vm7221_vm0 = vmmov %vm7208_vm5  ;;  %v3869_v10 = vpack.c.bf16 %v3853_v6, %v3852_v4  ;;  %v3722_v15 = vld [vmem:[#allocation3 + $0x169] sm:$0xff]  ;;  %v3723_v25 = vld [vmem:[#allocation3 + $0x171] sm:$0xff] }
 0x408   : > { %3400 = vrot.lane.b32.xlu1 %v4122_v48, %s7191_s24  ;;  %v3740_v17 = vpack.c.bf16 %v3723_v25, %v3722_v15  ;;  %vm7226_vm1 = vmmov %vm7221_vm0 }
 0x409   : > { %v4284_v55 = vpop.permute.xlu0 %4283  ;;  %vm7227_vm5 = vmmov %vm7209_vm6 }
 0x40a   : > { %v3901_v56 = vpop.permute.xlu1 %3900  ;;  %vm7228_vm6 = vmmov %vm7210_vm7 }
 0x40b   : > { %v4339_v54 = vld [vmem:[#allocation4 + $0x20] sm:$0xff]  ;;  %3910 = vrot.lane.b32.xlu0 %v4250_v42, %s7194_s28  ;;  %vm7229_vm7 = vmmov %vm7211_vm8 }
 0x40c   : > { %5228 = vmatprep.mubr.msk.bf16.mxu0 %vm7220_vm11, %v4339_v54  ;;  %3528 = vrot.lane.b32.xlu1 %v4250_v42, %s5398_s27  ;;  %vm7230_vm8 = vmmov %vm7212_vm9 }
 0x40d   : > { %v3519_v60 = vpop.permute.xlu0 %3518  ;;  %vm7231_vm9 = vmmov %vm7219_vm10 }
 0x40e   : > { %v3391_v62 = vpop.permute.xlu1 %3390  ;;  %vm7232_vm10 = vmmov %vm7228_vm6 }
 0x40f   : > { %3430 = vst.msk [vmem:[#allocation4 + $0x40] sm:$0xff] %vm508_vm2, %v3391_v62  ;;  %4043 = vrot.lane.b32.xlu0 %v3997_v61, %s5402_s23  ;;  %vm7233_vm11 = vmmov %vm7221_vm0 }
 0x410   : > { %3660 = vrot.lane.b32.xlu1 %v3997_v61, %s7192_s22  ;;  %3558 = vst.msk [vmem:[#allocation4 + $0x40] sm:$0xff] %vm637_vm3, %v3519_v60 }
 0x411   : > { %v4282_v1 = vpop.permute.xlu0 %4281 }
 0x412   : > { %v4026_v14 = vpop.permute.xlu1 %4025 }
 0x413   : > { %4068 = vst.msk [vmem:[#allocation4 + $0x28] sm:$0xff] %vm7221_vm0, %v4026_v14  ;;  %4171 = vrot.lane.b32.xlu0 %v4125_v2, %s7193_s26  ;;  %vm7234_vm0 = vmmov %vm7227_vm5 }
 0x414   : > { %3788 = vrot.lane.b32.xlu1 %v4125_v2, %s5400_s29 }
 0x415   : > { %v3643_v8 = vpop.permute.xlu0 %3642 }
 0x416   : > { %3684 = vst.msk [vmem:[#allocation4 + $0x30] sm:$0xff] %vm767_vm4, %v3643_v8  ;;  %v4154_v11 = vpop.permute.xlu1 %4153 }
 0x417   : > { %4196 = vst.msk [vmem:[#allocation4 + $0x28] sm:$0xff] %vm7222_vm14, %v4154_v11  ;;  %4297 = vrot.lane.b32.xlu0 %v4252_v9, %s5404_s21  ;;  %vm7235_vm14 = vmmov %vm7229_vm7 }
 0x418   : > { %3916 = vrot.lane.b32.xlu1 %v3869_v10, %s7194_s28  ;;  %4324 = vst.msk [vmem:[#allocation4 + $0x28] sm:$0xff] %vm7223_vm15, %v4282_v1  ;;  %vm7236_vm15 = vmmov %vm7230_vm8 }
 0x419   : > { %v3771_v12 = vpop.permute.xlu0 %3770 }
 0x41a   : > { %3812 = vst.msk [vmem:[#allocation4 + $0x30] sm:$0xff] %vm7224_vm12, %v3771_v12  ;;  %v3389_v13 = vpop.permute.xlu1 %3388  ;;  %vm7237_vm12 = vmmov %vm7231_vm9 }
 0x41b   : > { %3429 = vst.msk [vmem:[#allocation4 + $0x38] sm:$0xff] %vm508_vm2, %v3389_v13  ;;  %3658 = vrot.lane.b32.xlu0 %v3612_v51, %s7192_s22 }
 0x41c   : > { %4041 = vrot.lane.b32.xlu1 %v3612_v51, %s5402_s23  ;;  %s5411_s23 = smov [#allocation5]  }
 0x41d   : > { %v3899_v16 = vpop.permute.xlu0 %3898 }
 0x41e   : > { %3940 = vst.msk [vmem:[#allocation4 + $0x30] sm:$0xff] %vm7225_vm13, %v3899_v16  ;;  %v3517_v53 = vpop.permute.xlu1 %3516  ;;  %vm7238_vm13 = vmmov %vm7226_vm1 }
 0x41f   : > { %4069 = vst.msk [vmem:[#allocation4 + $0x30] sm:$0xff] %vm7226_vm1, %v4028_v46  ;;  %3786 = vrot.lane.b32.xlu0 %v3740_v17, %s5400_s29  ;;  %v4340_v18 = vld [vmem:[#allocation4 + $0x28] sm:$0xff]  ;;  %vm7239_vm1 = vmmov %vm7234_vm0 }
 0x420   : > { %3557 = vst.msk [vmem:[#allocation4 + $0x38] sm:$0xff] %vm637_vm3, %v3517_v53  ;;  %4169 = vrot.lane.b32.xlu1 %v3740_v17, %s7193_s26  ;;  %5229 = vmatmul.mubr.msk.bf16.gmra.mrb[28].mxu0 %vm7228_vm6, %v4340_v18 }
 0x421   : > { %4197 = vst.msk [vmem:[#allocation4 + $0x30] sm:$0xff] %vm7227_vm5, %v4156_v52  ;;  %v4032_v19 = vpop.permute.xlu0 %4031  ;;  %vm7240_vm5 = vmmov %vm7228_vm6 }
 0x422   : > { %3685 = vst.msk [vmem:[#allocation4 + $0x38] sm:$0xff] %vm767_vm4, %v6917_v7  ;;  %v3649_v20 = vpop.permute.xlu1 %3648  ;;  %vm7241_vm6 = vmmov %vm7229_vm7 }
 0x423   : > { %4325 = vst.msk [vmem:[#allocation4 + $0x30] sm:$0xff] %vm7229_vm7, %v4284_v55  ;;  %3914 = vrot.lane.b32.xlu0 %v4252_v9, %s7194_s28  ;;  %vm7242_vm7 = vmmov %vm7230_vm8  ;;  %s5070_s28 = sshll.u32 %s5483_s13, 4 }
 0x424   : > { %3813 = vst.msk [vmem:[#allocation4 + $0x38] sm:$0xff] %vm7230_vm8, %v3773_v41  ;;  %3404 = vrot.lane.b32.xlu1 %v3740_v17, %s7191_s24  ;;  %vm7243_vm8 = vmmov %vm7231_vm9  ;;  %s323_s24 = sand.u32 1, %s5387_s10  }
 0x425   : > { %3941 = vst.msk [vmem:[#allocation4 + $0x38] sm:$0xff] %vm7231_vm9, %v3901_v56  ;;  %v4160_v23 = vpop.permute.xlu0 %4159  ;;  %vm7244_vm9 = vmmov %vm7240_vm5  ;;  %s324_s16 = scalar_lea.vmem [#allocation5], %s323_s24  ;;  %s4743_s13 = scalar_lea.sflag [#allocation6], %s323_s24 }
 0x426   : > { %v3777_v24 = vpop.permute.xlu1 %3776  ;;  %s4755_s25 = sshll.u32 %s324_s16, 4  ;;  %s7123_s25 = int_to_ptr.vmem [resolvable:$true] %s4755_s25 }
 0x427   : > { %4299 = vrot.lane.b32.xlu0 %v3869_v10, %s5404_s21  ;;  %s5333_s29 = scalar_lea.vmem %s7123_s25, 16 }
 0x428   : > { %3532 = vrot.lane.b32.xlu1 %v4252_v9, %s5398_s27  ;;  %s7121_s27 = scalar_lea.hbm %s7172_s9, %s5070_s28  ;;  %p5334_p11 = scmp.ne.s32.totalorder %s7123_s25, %s5333_s29 }
 0x429   : > { %v4288_v30 = vpop.permute.xlu0 %4287 }
 0x42a   : > { %v4341_v27 = vld [vmem:[#allocation4 + $0x30] sm:$0xff]  ;;  %v3905_v31 = vpop.permute.xlu1 %3904  ;;  %p5335_p12 = pnand %p5334_p11, %p5500_p5 }
 0x42b   : > { %5232 = vmatprep.mubr.msk.bf16.mxu0 %vm7232_vm10, %v4341_v27  ;;  %vm7245_vm10 = vmmov %vm7233_vm11 }
 0x42c   : > { %4173 = vrot.lane.b32.xlu1 %v4126_v26, %s7193_s26  ;;  %p5336_p13 = pneg %p5335_p12 }
 0x42d   : > { %v3523_v34 = vpop.permute.xlu0 %3522 }
 0x42e   : > { %v3395_v3 = vpop.permute.xlu1 %3394 }
 0x42f   : > { %3432 = vst.msk [vmem:[#allocation4 + $0x50] sm:$0xff] %vm508_vm2, %v3395_v3 }
 0x430   : > { %4301 = vrot.lane.b32.xlu1 %v4254_v33, %s5404_s21  ;;  %3560 = vst.msk [vmem:[#allocation4 + $0x50] sm:$0xff] %vm637_vm3, %v3523_v34  ;;  %s5337_s21 = sshll.u32 %s5411_s23, 4  ;;  %s5338_s21 = int_to_ptr.vmem [resolvable:$false] %s5337_s21 }
 0x431   : > { %v4286_v35 = vpop.permute.xlu0 %4285  ;;  %s5339_s22 = scalar_lea.vmem %s5338_s21, 32  ;;  %p5340_p0 = scmp.lt.s32.totalorder %s7123_s25, %s5338_s21 }
 0x432   : > { %v4030_v36 = vpop.permute.xlu1 %4029  ;;  %p5341_p1 = scmp.lt.s32.totalorder %s5339_s22, %s5333_s29 }
 0x433   : > { %4070 = vst.msk [vmem:[#allocation4 + $0x38] sm:$0xff] %vm7233_vm11, %v4030_v36  ;;  %vm7246_vm11 = vmmov %vm7234_vm0 }
 0x434   : > { %p5342_p2 = por %p5341_p1, %p5340_p0 }
 0x435   : > { %v3647_v38 = vpop.permute.xlu0 %3646 }
 0x436   : > { %3686 = vst.msk [vmem:[#allocation4 + $0x40] sm:$0xff] %vm767_vm4, %v3647_v38  ;;  %v4158_v39 = vpop.permute.xlu1 %4157  ;;  %p5343_p3 = pnand %p5342_p2, %p5336_p13 }
 0x437   : > { %4198 = vst.msk [vmem:[#allocation4 + $0x38] sm:$0xff] %vm7234_vm0, %v4158_v39  ;;  %vm7247_vm0 = vmmov %vm7241_vm6  ;;  %v7041_v39 = vld [vmem:[%s7169_s6] ss:$0 sm:$0xff] }
 0x438   : > { %4326 = vst.msk [vmem:[#allocation4 + $0x38] sm:$0xff] %vm7235_vm14, %v4286_v35  ;;  %vm7248_vm14 = vmmov %vm7242_vm7 }
 0x439   : > { %v3775_v40 = vpop.permute.xlu0 %3774 }
 0x43a   : > { %3814 = vst.msk [vmem:[#allocation4 + $0x40] sm:$0xff] %vm7236_vm15, %v3775_v40  ;;  %v3393_v42 = vpop.permute.xlu1 %3392  ;;  %vm7249_vm15 = vmmov %vm7243_vm8 }
 0x43b   : > { %3431 = vst.msk [vmem:[#allocation4 + $0x48] sm:$0xff] %vm508_vm2, %v3393_v42 }
 0x43d   : > { %v3903_v49 = vpop.permute.xlu0 %3902 }
 0x43e   : > { %3942 = vst.msk [vmem:[#allocation4 + $0x40] sm:$0xff] %vm7237_vm12, %v3903_v49  ;;  %v3521_v43 = vpop.permute.xlu1 %3520  ;;  %vm7250_vm12 = vmmov %vm7245_vm10 }
 0x43f   : > { %4071 = vst.msk [vmem:[#allocation4 + $0x40] sm:$0xff] %vm7238_vm13, %v4032_v19  ;;  %v4342_v44 = vld [vmem:[#allocation4 + $0x38] sm:$0xff]  ;;  %vm7251_vm13 = vmmov %vm7239_vm1 }
 0x440   : > { %3559 = vst.msk [vmem:[#allocation4 + $0x48] sm:$0xff] %vm637_vm3, %v3521_v43  ;;  %5233 = vmatmul.mubr.msk.bf16.gmra.mrb[32].mxu0 %vm7240_vm5, %v4342_v44 }
 0x441   : > { %4199 = vst.msk [vmem:[#allocation4 + $0x40] sm:$0xff] %vm7239_vm1, %v4160_v23  ;;  %v4036_v37 = vpop.permute.xlu0 %4035  ;;  %vm7252_vm1 = vmmov %vm7240_vm5 }
 0x442   : > { %3687 = vst.msk [vmem:[#allocation4 + $0x48] sm:$0xff] %vm767_vm4, %v3649_v20  ;;  %v3653_v45 = vpop.permute.xlu1 %3652  ;;  %vm7253_vm5 = vmmov %vm7247_vm0 }
 0x443   : > { %4327 = vst.msk [vmem:[#allocation4 + $0x40] sm:$0xff] %vm7241_vm6, %v4288_v30  ;;  %vm7254_vm6 = vmmov %vm7242_vm7 }
 0x444   : > { %3815 = vst.msk [vmem:[#allocation4 + $0x48] sm:$0xff] %vm7242_vm7, %v3777_v24  ;;  %vm7255_vm7 = vmmov %vm7243_vm8 }
 0x445   : > { %3943 = vst.msk [vmem:[#allocation4 + $0x48] sm:$0xff] %vm7243_vm8, %v3905_v31  ;;  %v4164_v46 = vpop.permute.xlu0 %4163  ;;  %vm7256_vm8 = vmmov %vm7252_vm1 }
 0x446   : > { %v3781_v48 = vpop.permute.xlu1 %3780 }
 0x449   : > { %v4292_v50 = vpop.permute.xlu0 %4291 }
 0x44a   : > { %v4343_v7 = vld [vmem:[#allocation4 + $0x40] sm:$0xff]  ;;  %v3909_v51 = vpop.permute.xlu1 %3908 }
 0x44b   : > { %5236 = vmatprep.mubr.msk.bf16.mxu0 %vm7244_vm9, %v4343_v7  ;;  %vm7257_vm9 = vmmov %vm7245_vm10 }
 0x44d   : > { %v3527_v52 = vpop.permute.xlu0 %3526 }
 0x44e   : > { %v3399_v41 = vpop.permute.xlu1 %3398 }
 0x44f   : > { %3434 = vst.msk [vmem:[#allocation4 + $0x60] sm:$0xff] %vm508_vm2, %v3399_v41 }
 0x450   : > { %3562 = vst.msk [vmem:[#allocation4 + $0x60] sm:$0xff] %vm637_vm3, %v3527_v52 }
 0x451   : > { %v4290_v54 = vpop.permute.xlu0 %4289 }
 0x452   : > { %v4034_v55 = vpop.permute.xlu1 %4033 }
 0x453   : > { %4072 = vst.msk [vmem:[#allocation4 + $0x48] sm:$0xff] %vm7245_vm10, %v4034_v55  ;;  %vm7258_vm10 = vmmov %vm7246_vm11 }
 0x455   : > { %v3651_v56 = vpop.permute.xlu0 %3650 }
 0x456   : > { %3688 = vst.msk [vmem:[#allocation4 + $0x50] sm:$0xff] %vm767_vm4, %v3651_v56  ;;  %v4162_v57 = vpop.permute.xlu1 %4161 }
 0x457   : > { %4200 = vst.msk [vmem:[#allocation4 + $0x48] sm:$0xff] %vm7246_vm11, %v4162_v57  ;;  %vm7259_vm11 = vmmov %vm7247_vm0 }
 0x458   : > { %4328 = vst.msk [vmem:[#allocation4 + $0x48] sm:$0xff] %vm7247_vm0, %v4290_v54  ;;  %vm7260_vm0 = vmmov %vm7254_vm6 }
 0x459   : > { %v3779_v58 = vpop.permute.xlu0 %3778 }
 0x45a   : > { %3816 = vst.msk [vmem:[#allocation4 + $0x50] sm:$0xff] %vm7248_vm14, %v3779_v58  ;;  %v3397_v60 = vpop.permute.xlu1 %3396  ;;  %vm7261_vm14 = vmmov %vm7255_vm7 }
 0x45b   : > { %3433 = vst.msk [vmem:[#allocation4 + $0x58] sm:$0xff] %vm508_vm2, %v3397_v60 }
 0x45d   : > { %v3907_v61 = vpop.permute.xlu0 %3906 }
 0x45e   : > { %3944 = vst.msk [vmem:[#allocation4 + $0x50] sm:$0xff] %vm7249_vm15, %v3907_v61  ;;  %v3525_v62 = vpop.permute.xlu1 %3524  ;;  %vm7262_vm15 = vmmov %vm7257_vm9 }
 0x45f   : > { %4073 = vst.msk [vmem:[#allocation4 + $0x50] sm:$0xff] %vm7250_vm12, %v4036_v37  ;;  %v4344_v63 = vld [vmem:[#allocation4 + $0x48] sm:$0xff]  ;;  %vm7263_vm12 = vmmov %vm7258_vm10 }
 0x460   : > { %3561 = vst.msk [vmem:[#allocation4 + $0x58] sm:$0xff] %vm637_vm3, %v3525_v62  ;;  %5237 = vmatmul.mubr.msk.bf16.gmra.mrb[36].mxu0 %vm7252_vm1, %v4344_v63 }
 0x461   : > { %4201 = vst.msk [vmem:[#allocation4 + $0x50] sm:$0xff] %vm7251_vm13, %v4164_v46  ;;  %v4040_v0 = vpop.permute.xlu0 %4039  ;;  %vm7264_vm13 = vmmov %vm7252_vm1 }
 0x462   : > { %3689 = vst.msk [vmem:[#allocation4 + $0x58] sm:$0xff] %vm767_vm4, %v3653_v45  ;;  %v3657_v1 = vpop.permute.xlu1 %3656  ;;  %vm7265_vm1 = vmmov %vm7253_vm5 }
 0x463   : > { %4329 = vst.msk [vmem:[#allocation4 + $0x50] sm:$0xff] %vm7253_vm5, %v4292_v50  ;;  %vm7266_vm5 = vmmov %vm7260_vm0 }
 0x464   : > { %3817 = vst.msk [vmem:[#allocation4 + $0x58] sm:$0xff] %vm7254_vm6, %v3781_v48  ;;  %vm7267_vm6 = vmmov %vm7255_vm7 }
 0x465   : > { %3945 = vst.msk [vmem:[#allocation4 + $0x58] sm:$0xff] %vm7255_vm7, %v3909_v51  ;;  %v4168_v2 = vpop.permute.xlu0 %4167  ;;  %vm7268_vm7 = vmmov %vm7256_vm8 }
 0x466   : > { %v3785_v4 = vpop.permute.xlu1 %3784 }
 0x469   : > { %v4296_v5 = vpop.permute.xlu0 %4295 }
 0x46a   : > { %v4345_v14 = vld [vmem:[#allocation4 + $0x50] sm:$0xff]  ;;  %v3913_v47 = vpop.permute.xlu1 %3912 }
 0x46b   : > { %5240 = vmatprep.mubr.msk.bf16.mxu0 %vm7256_vm8, %v4345_v14  ;;  %vm7269_vm8 = vmmov %vm7257_vm9 }
 0x46d   : > { %v3531_v6 = vpop.permute.xlu0 %3530 }
 0x46e   : > { %v3403_v8 = vpop.permute.xlu1 %3402 }
 0x46f   : > { %3436 = vst.msk [vmem:[#allocation4 + $0x70] sm:$0xff] %vm508_vm2, %v3403_v8 }
 0x470   : > { %3564 = vst.msk [vmem:[#allocation4 + $0x70] sm:$0xff] %vm637_vm3, %v3531_v6 }
 0x471   : > { %v4294_v9 = vpop.permute.xlu0 %4293 }
 0x472   : > { %v4038_v10 = vpop.permute.xlu1 %4037 }
 0x473   : > { %4074 = vst.msk [vmem:[#allocation4 + $0x58] sm:$0xff] %vm7257_vm9, %v4038_v10  ;;  %vm7270_vm9 = vmmov %vm7260_vm0 }
 0x475   : > { %v3655_v11 = vpop.permute.xlu0 %3654 }
 0x476   : > { %3690 = vst.msk [vmem:[#allocation4 + $0x60] sm:$0xff] %vm767_vm4, %v3655_v11  ;;  %v4166_v12 = vpop.permute.xlu1 %4165 }
 0x477   : > { %4202 = vst.msk [vmem:[#allocation4 + $0x58] sm:$0xff] %vm7258_vm10, %v4166_v12 }
 0x478   : > { %4330 = vst.msk [vmem:[#allocation4 + $0x58] sm:$0xff] %vm7259_vm11, %v4294_v9  ;;  %vm7271_vm11 = vmmov %vm7265_vm1 }
 0x479   : > { %v3783_v13 = vpop.permute.xlu0 %3782 }
 0x47a   : > { %3818 = vst.msk [vmem:[#allocation4 + $0x60] sm:$0xff] %vm7260_vm0, %v3783_v13  ;;  %v3401_v15 = vpop.permute.xlu1 %3400  ;;  %vm7272_vm0 = vmmov %vm7267_vm6  ;;  %v4692_v13 = vld [vmem:[%s7170_s7] sm:$0xf] }
 0x47b   : > { %3435 = vst.msk [vmem:[#allocation4 + $0x68] sm:$0xff] %vm508_vm2, %v3401_v15 }
 0x47d   : > { %v3911_v25 = vpop.permute.xlu0 %3910 }
 0x47e   : > { %3946 = vst.msk [vmem:[#allocation4 + $0x60] sm:$0xff] %vm7261_vm14, %v3911_v25  ;;  %v3529_v16 = vpop.permute.xlu1 %3528  ;;  %vm7273_vm14 = vmmov %vm7269_vm8 }
 0x47f   : > { %4075 = vst.msk [vmem:[#allocation4 + $0x60] sm:$0xff] %vm7262_vm15, %v4040_v0  ;;  %v4346_v17 = vld [vmem:[#allocation4 + $0x58] sm:$0xff]  ;;  %vm7274_vm15 = vmmov %vm7258_vm10 }
 0x480   : > { %3563 = vst.msk [vmem:[#allocation4 + $0x68] sm:$0xff] %vm637_vm3, %v3529_v16  ;;  %5241 = vmatmul.mubr.msk.bf16.gmra.mrb[40].mxu0 %vm7264_vm13, %v4346_v17  ;;  %vm7276_vm13 = vmmov %vm7268_vm7 }
 0x481   : > { %4203 = vst.msk [vmem:[#allocation4 + $0x60] sm:$0xff] %vm7263_vm12, %v4168_v2  ;;  %v4044_v53 = vpop.permute.xlu0 %4043  ;;  %vm7275_vm12 = vmmov %vm7265_vm1 }
 0x482   : > { %3691 = vst.msk [vmem:[#allocation4 + $0x68] sm:$0xff] %vm767_vm4, %v3657_v1  ;;  %v3661_v18 = vpop.permute.xlu1 %3660 }
 0x483   : > { %4331 = vst.msk [vmem:[#allocation4 + $0x60] sm:$0xff] %vm7265_vm1, %v4296_v5  ;;  %vm7277_vm1 = vmmov %vm7266_vm5 }
 0x484   : > { %3819 = vst.msk [vmem:[#allocation4 + $0x68] sm:$0xff] %vm7266_vm5, %v3785_v4  ;;  %vm7278_vm5 = vmmov %vm7272_vm0 }
 0x485   : > { %3947 = vst.msk [vmem:[#allocation4 + $0x68] sm:$0xff] %vm7267_vm6, %v3913_v47  ;;  %v4172_v19 = vpop.permute.xlu0 %4171  ;;  %vm7280_vm6 = vmmov %vm7258_vm10 }
 0x486   : > { %v3789_v20 = vpop.permute.xlu1 %3788 }
 0x489   : > { %v4298_v22 = vpop.permute.xlu0 %4297 }
 0x48a   : > { %v4347_v21 = vld [vmem:[#allocation4 + $0x60] sm:$0xff]  ;;  %v3917_v23 = vpop.permute.xlu1 %3916 }
 0x48b   : > { %5244 = vmatprep.mubr.msk.bf16.mxu0 %vm7268_vm7, %v4347_v21 }
 0x48d   : > { %v3659_v24 = vpop.permute.xlu0 %3658 }
 0x48e   : > { %3692 = vst.msk [vmem:[#allocation4 + $0x70] sm:$0xff] %vm767_vm4, %v3659_v24  ;;  %v4042_v26 = vpop.permute.xlu1 %4041 }
 0x48f   : > { %4076 = vst.msk [vmem:[#allocation4 + $0x68] sm:$0xff] %vm7269_vm8, %v4042_v26 }
 0x491   : > { %v3787_v27 = vpop.permute.xlu0 %3786 }
 0x492   : > { %3820 = vst.msk [vmem:[#allocation4 + $0x70] sm:$0xff] %vm7270_vm9, %v3787_v27  ;;  %v4170_v28 = vpop.permute.xlu1 %4169 }
 0x493   : > { %4204 = vst.msk [vmem:[#allocation4 + $0x68] sm:$0xff] %vm7258_vm10, %v4170_v28 }
 0x494   : > { %4332 = vst.msk [vmem:[#allocation4 + $0x68] sm:$0xff] %vm7271_vm11, %v4298_v22 }
 0x495   : > { %v3915_v29 = vpop.permute.xlu0 %3914 }
 0x496   : > { %3948 = vst.msk [vmem:[#allocation4 + $0x70] sm:$0xff] %vm7272_vm0, %v3915_v29  ;;  %v3405_v30 = vpop.permute.xlu1 %3404 }
 0x497   : > { %4077 = vst.msk [vmem:[#allocation4 + $0x70] sm:$0xff] %vm7273_vm14, %v4044_v53 }
 0x498   : > { %3437 = vst.msk [vmem:[#allocation4 + $0x78] sm:$0xff] %vm508_vm2, %v3405_v30  ;;  %vm7279_vm2 = vmmov %vm7269_vm8  ;;  %vm7283_vm8 = vcmask 64512  }
 0x499   : > { %4205 = vst.msk [vmem:[#allocation4 + $0x70] sm:$0xff] %vm7274_vm15, %v4172_v19  ;;  %v4300_v31 = vpop.permute.xlu0 %4299  ;;  %vm7284_vm9 = vmmov %vm7283_vm8 }
 0x49a   : > { %4333 = vst.msk [vmem:[#allocation4 + $0x70] sm:$0xff] %vm7275_vm12, %v4300_v31  ;;  %v3533_v33 = vpop.permute.xlu1 %3532  ;;  %vm7285_vm10 = vmmov %vm7283_vm8 }
 0x49b   : > { %3565 = vst.msk [vmem:[#allocation4 + $0x78] sm:$0xff] %vm637_vm3, %v3533_v33  ;;  %v4348_v34 = vld [vmem:[#allocation4 + $0x68] sm:$0xff]  ;;  %vm7281_vm3 = vmmov %vm7271_vm11 }
 0x49c   : > { %3693 = vst.msk [vmem:[#allocation4 + $0x78] sm:$0xff] %vm767_vm4, %v3661_v18  ;;  %5245 = vmatmul.mubr.msk.bf16.gmra.mrb[44].mxu0 %vm7276_vm13, %v4348_v34  ;;  %vm7282_vm4 = vmmov %vm7268_vm7  ;;  %vm7291_vm13 = vcmask 1043456  }
 0x49d   : > { %3821 = vst.msk [vmem:[#allocation4 + $0x78] sm:$0xff] %vm7277_vm1, %v3789_v20  ;;  %vm7286_vm11 = vmmov %vm7283_vm8  ;;  %v4698_v25 = vsel %vm7291_vm13, %v4692_v13, 0 }
 0x49e   : > { %3949 = vst.msk [vmem:[#allocation4 + $0x78] sm:$0xff] %vm7278_vm5, %v3917_v23  ;;  %v4174_v3 = vpop.permute.xlu1 %4173  ;;  %vm7287_vm0 = vmmov %vm7283_vm8  ;;  %5253 = vmatpush3.bf16.msra.mxu1 %v4698_v25 }
 0x49f   : > { %4078 = vst.msk [vmem:[#allocation4 + $0x78] sm:$0xff] %vm7279_vm2, %v6736_v32  ;;  %vm7288_vm14 = vmmov %vm7287_vm0 }
 0x4a0   : > { %4206 = vst.msk [vmem:[#allocation4 + $0x78] sm:$0xff] %vm7280_vm6, %v4174_v3  ;;  %vm7289_vm15 = vmmov %vm7287_vm0 }
 0x4a1   : > { %v4349_v35 = vld [vmem:[#allocation4 + $0x70] sm:$0xff]  ;;  %vm7290_vm12 = vmmov %vm7287_vm0 }
 0x4a2   : > { %v4302_v36 = vpop.permute.xlu1 %4301  ;;  %5248 = vmatprep.mubr.msk.bf16.mxu0 %vm7268_vm7, %v4349_v35  ;;  %vm7292_vm1 = vmmov %vm7287_vm0 }
 0x4a3   : > { %4334 = vst.msk [vmem:[#allocation4 + $0x78] sm:$0xff] %vm7281_vm3, %v4302_v36  ;;  %vm7293_vm5 = vmmov %vm7287_vm0  ;;  %vm5410_vm3 = vmmov 0  }
 0x4a4   : > { %vm7294_vm2 = vmmov %vm7287_vm0  ;;  %5254 = vmatprep.mubr.msk.bf16.mxu1 %vm5410_vm3, %v5405_v59 }
 0x4a5   : > { %vm7295_vm6 = vmmov %vm7287_vm0 }
 0x4a6   : > { %vm7296_vm7 = vmmov %vm7287_vm0 }
 0x4a7   : > { %vm7305_vm13 = vmmov %vm7287_vm0 }
 0x4a8   : > { %vm7311_vm3 = vmmov %vm7287_vm0 }
 0x4aa   : > { %v4350_v38 = vld [vmem:[#allocation4 + $0x78] sm:$0xff] }
 0x4ab   : > { %5249 = vmatmul.mubr.msk.bf16.gmra.mrb[48].mxu0 %vm7282_vm4, %v4350_v38  ;;  %vm7297_vm4 = vmmov %vm7287_vm0 }
 0x4b6   : > { %v5222_v40 = vpop.f32.mrb[20].mxu0 }
 0x4b7   : > { %v4463_v42 = vpop.f32.mrb[21].mxu0  ;;  %v4472_v32 = vadd.f32 %v5222_v40, %v7041_v39 }
 0x4b8   : > { %v4464_v49 = vadd.f32 %v7041_v39, %v4463_v42  ;;  %v5223_v43 = vpop.f32.mrb[22].mxu0 }
 0x4b9   : > { %v4466_v44 = vpop.f32.mrb[23].mxu0  ;;  %v4475_v45 = vadd.f32 %v5223_v43, %v7041_v39  ;;  %v4592_v48 = vmax.f32 %v4472_v32, 0.0 }
 0x4ba   : > { %v4590_v37 = vmax.f32 %v4464_v49, 0.0  ;;  %v4467_v46 = vadd.f32 %v7041_v39, %v4466_v44 }
 0x4bb   : > { %v4593_v51 = vmax.f32 %v4475_v45, 0.0  ;;  %v4625_v54 = vsel %vm7285_vm10, %v4592_v48, 0.0  ;;  %vm7300_vm10 = vmmov %vm7287_vm0 }
 0x4bc   : > { %v4591_v7 = vmax.f32 %v4467_v46, 0.0  ;;  %v4622_v50 = vsel %vm7283_vm8, %v4590_v37, 0.0  ;;  %vm7298_vm8 = vmmov %vm7287_vm0 }
 0x4bd   : > { %v4627_v56 = vsel %vm7286_vm11, %v4593_v51, 0.0  ;;  %vm7301_vm11 = vmmov %vm7287_vm0 }
 0x4be   : > { %v4623_v52 = vsel %vm7284_vm9, %v4591_v7, 0.0  ;;  %vm7299_vm9 = vmmov %vm7287_vm0 }
 0x4bf   : > { %v4624_v41 = vadd.f32 %v4623_v52, %v4622_v50 }
 0x4c1   : > { %v4626_v55 = vadd.f32 %v4625_v54, %v4624_v41 }
 0x4c3   : > { %v4628_v57 = vadd.f32 %v4627_v56, %v4626_v55 }
 0x4d3   : > { %v5226_v58 = vpop.f32.mrb[24].mxu0 }
 0x4d4   : > { %v4479_v60 = vpop.f32.mrb[25].mxu0  ;;  %v4488_v61 = vadd.f32 %v5226_v58, %v7041_v39 }
 0x4d5   : > { %v4480_v62 = vadd.f32 %v7041_v39, %v4479_v60  ;;  %v5227_v63 = vpop.f32.mrb[26].mxu0 }
 0x4d6   : > { %v4482_v0 = vpop.f32.mrb[27].mxu0  ;;  %v4491_v2 = vadd.f32 %v5227_v63, %v7041_v39  ;;  %v4596_v14 = vmax.f32 %v4488_v61, 0.0 }
 0x4d7   : > { %v4594_v1 = vmax.f32 %v4480_v62, 0.0  ;;  %v4483_v4 = vadd.f32 %v7041_v39, %v4482_v0 }
 0x4d8   : > { %v4597_v8 = vmax.f32 %v4491_v2, 0.0  ;;  %v4633_v11 = vsel %vm7289_vm15, %v4596_v14, 0.0  ;;  %vm7303_vm15 = vmmov %vm7287_vm0 }
 0x4d9   : > { %v4629_v5 = vsel %vm7287_vm0, %v4594_v1, 0.0  ;;  %v4595_v47 = vmax.f32 %v4483_v4, 0.0 }
 0x4da   : > { %v4630_v6 = vadd.f32 %v4629_v5, %v4628_v57  ;;  %v4635_v15 = vsel %vm7290_vm12, %v4597_v8, 0.0  ;;  %vm7304_vm12 = vmmov %vm7287_vm0 }
 0x4db   : > { %v4631_v9 = vsel %vm7288_vm14, %v4595_v47, 0.0  ;;  %vm7302_vm14 = vmmov %vm7287_vm0 }
 0x4dc   : > { %v4632_v10 = vadd.f32 %v4631_v9, %v4630_v6 }
 0x4de   : > { %v4634_v12 = vadd.f32 %v4633_v11, %v4632_v10 }
 0x4e0   : > { %v4636_v16 = vadd.f32 %v4635_v15, %v4634_v12 }
 0x4f3   : > { %v5230_v17 = vpop.f32.mrb[28].mxu0 }
 0x4f4   : > { %v4495_v53 = vpop.f32.mrb[29].mxu0  ;;  %v4504_v18 = vadd.f32 %v5230_v17, %v7041_v39 }
 0x4f5   : > { %v4496_v19 = vadd.f32 %v7041_v39, %v4495_v53  ;;  %v5231_v20 = vpop.f32.mrb[30].mxu0 }
 0x4f6   : > { %v4498_v21 = vpop.f32.mrb[31].mxu0  ;;  %v4507_v23 = vadd.f32 %v5231_v20, %v7041_v39  ;;  %v4600_v26 = vmax.f32 %v4504_v18, 0.0 }
 0x4f7   : > { %v4598_v22 = vmax.f32 %v4496_v19, 0.0  ;;  %v4499_v24 = vadd.f32 %v7041_v39, %v4498_v21 }
 0x4f8   : > { %v4601_v30 = vmax.f32 %v4507_v23, 0.0  ;;  %v4641_v34 = vsel %vm7294_vm2, %v4600_v26, 0.0  ;;  %vm7308_vm2 = vmmov %vm7287_vm0 }
 0x4f9   : > { %v4637_v27 = vsel %vm7292_vm1, %v4598_v22, 0.0  ;;  %v4599_v28 = vmax.f32 %v4499_v24, 0.0  ;;  %vm7306_vm1 = vmmov %vm7287_vm0 }
 0x4fa   : > { %v4638_v29 = vadd.f32 %v4637_v27, %v4636_v16  ;;  %v4643_v35 = vsel %vm7295_vm6, %v4601_v30, 0.0  ;;  %vm7309_vm6 = vmmov %vm7287_vm0 }
 0x4fb   : > { %v4639_v31 = vsel %vm7293_vm5, %v4599_v28, 0.0  ;;  %vm7307_vm5 = vmmov %vm7287_vm0 }
 0x4fc   : > { %v4640_v33 = vadd.f32 %v4639_v31, %v4638_v29 }
 0x4fe   : > { %v4642_v3 = vadd.f32 %v4641_v34, %v4640_v33 }
 0x500   : > { %v4644_v36 = vadd.f32 %v4643_v35, %v4642_v3 }
 0x513   : > { %v5234_v38 = vpop.f32.mrb[32].mxu0 }
 0x514   : > { %v4511_v40 = vpop.f32.mrb[33].mxu0  ;;  %v4520_v42 = vadd.f32 %v5234_v38, %v7041_v39 }
 0x515   : > { %v4512_v32 = vadd.f32 %v7041_v39, %v4511_v40  ;;  %v5235_v49 = vpop.f32.mrb[34].mxu0 }
 0x516   : > { %v4514_v43 = vpop.f32.mrb[35].mxu0  ;;  %v4523_v37 = vadd.f32 %v5235_v49, %v7041_v39  ;;  %v4604_v46 = vmax.f32 %v4520_v42, 0.0 }
 0x517   : > { %v4602_v44 = vmax.f32 %v4512_v32, 0.0  ;;  %v4515_v45 = vadd.f32 %v7041_v39, %v4514_v43 }
 0x518   : > { %v4605_v51 = vmax.f32 %v4523_v37, 0.0  ;;  %v4649_v54 = vsel %vm7298_vm8, %v4604_v46, 0.0  ;;  %vm7313_vm8 = vmmov %vm7287_vm0 }
 0x519   : > { %v4645_v48 = vsel %vm7296_vm7, %v4602_v44, 0.0  ;;  %v4603_v7 = vmax.f32 %v4515_v45, 0.0  ;;  %vm7310_vm7 = vmmov %vm7287_vm0 }
 0x51a   : > { %v4646_v50 = vadd.f32 %v4645_v48, %v4644_v36  ;;  %v4651_v56 = vsel %vm7299_vm9, %v4605_v51, 0.0  ;;  %vm7314_vm9 = vmmov %vm7287_vm0 }
 0x51b   : > { %v4647_v52 = vsel %vm7297_vm4, %v4603_v7, 0.0  ;;  %vm7312_vm4 = vmmov %vm7287_vm0 }
 0x51c   : > { %v4648_v41 = vadd.f32 %v4647_v52, %v4646_v50 }
 0x51e   : > { %v4650_v55 = vadd.f32 %v4649_v54, %v4648_v41 }
 0x520   : > { %v4652_v57 = vadd.f32 %v4651_v56, %v4650_v55 }
 0x533   : > { %v5238_v58 = vpop.f32.mrb[36].mxu0 }
 0x534   : > { %v4527_v60 = vpop.f32.mrb[37].mxu0  ;;  %v4536_v61 = vadd.f32 %v5238_v58, %v7041_v39 }
 0x535   : > { %v4528_v62 = vadd.f32 %v7041_v39, %v4527_v60  ;;  %v5239_v63 = vpop.f32.mrb[38].mxu0 }
 0x536   : > { %v4530_v0 = vpop.f32.mrb[39].mxu0  ;;  %v4539_v59 = vadd.f32 %v5239_v63, %v7041_v39  ;;  %v4608_v4 = vmax.f32 %v4536_v61, 0.0 }
 0x537   : > { %v4606_v1 = vmax.f32 %v4528_v62, 0.0  ;;  %v4531_v2 = vadd.f32 %v7041_v39, %v4530_v0 }
 0x538   : > { %v4609_v6 = vmax.f32 %v4539_v59, 0.0  ;;  %v4657_v10 = vsel %vm7287_vm0, %v4608_v4, 0.0 }
 0x539   : > { %v4653_v14 = vsel %vm7300_vm10, %v4606_v1, 0.0  ;;  %v4607_v5 = vmax.f32 %v4531_v2, 0.0  ;;  %vm7315_vm10 = vmmov %vm7287_vm0 }
 0x53a   : > { %v4654_v47 = vadd.f32 %v4653_v14, %v4652_v57  ;;  %v4659_v12 = vsel %vm7302_vm14, %v4609_v6, 0.0 }
 0x53b   : > { %v4655_v8 = vsel %vm7301_vm11, %v4607_v5, 0.0  ;;  %vm4740_vm11 = vcmask 73728  }
 0x53c   : > { %v4656_v9 = vadd.f32 %v4655_v8, %v4654_v47 }
 0x53e   : > { %v4658_v11 = vadd.f32 %v4657_v10, %v4656_v9 }
 0x540   : > { %v4660_v13 = vadd.f32 %v4659_v12, %v4658_v11 }
 0x553   : > { %v5242_v15 = vpop.f32.mrb[40].mxu0 }
 0x554   : > { %v4543_v25 = vpop.f32.mrb[41].mxu0  ;;  %v4552_v16 = vadd.f32 %v5242_v15, %v7041_v39 }
 0x555   : > { %v4544_v17 = vadd.f32 %v7041_v39, %v4543_v25  ;;  %v5243_v53 = vpop.f32.mrb[42].mxu0 }
 0x556   : > { %v4546_v18 = vpop.f32.mrb[43].mxu0  ;;  %v4555_v20 = vadd.f32 %v5243_v53, %v7041_v39  ;;  %v4612_v22 = vmax.f32 %v4552_v16, 0.0 }
 0x557   : > { %v4610_v19 = vmax.f32 %v4544_v17, 0.0  ;;  %v4547_v21 = vadd.f32 %v7041_v39, %v4546_v18  ;;  %v4693_v17 = vld [vmem:[%s7171_s8] sm:$0x1] }
 0x558   : > { %v4613_v27 = vmax.f32 %v4555_v20, 0.0  ;;  %v4665_v30 = vsel %vm7305_vm13, %v4612_v22, 0.0 }
 0x559   : > { %v4661_v23 = vsel %vm7303_vm15, %v4610_v19, 0.0  ;;  %v4611_v24 = vmax.f32 %v4547_v21, 0.0 }
 0x55a   : > { %v4662_v26 = vadd.f32 %v4661_v23, %v4660_v13  ;;  %v4667_v33 = vsel %vm7306_vm1, %v4613_v27, 0.0 }
 0x55b   : > { %v4663_v28 = vsel %vm7304_vm12, %v4611_v24, 0.0 }
 0x55c   : > { %v4664_v29 = vadd.f32 %v4663_v28, %v4662_v26 }
 0x55e   : > { %v4666_v31 = vadd.f32 %v4665_v30, %v4664_v29 }
 0x560   : > { %v4668_v34 = vadd.f32 %v4667_v33, %v4666_v31 }
 0x56f   : > { %v5246_v3 = vpop.f32.mrb[44].mxu0 }
 0x570   : > { %v4559_v35 = vpop.f32.mrb[45].mxu0  ;;  %v4568_v36 = vadd.f32 %v5246_v3, %v7041_v39 }
 0x571   : > { %v4560_v38 = vadd.f32 %v7041_v39, %v4559_v35  ;;  %v5247_v40 = vpop.f32.mrb[46].mxu0 }
 0x572   : > { %v4562_v42 = vpop.f32.mrb[47].mxu0  ;;  %v4571_v49 = vadd.f32 %v5247_v40, %v7041_v39  ;;  %v4616_v44 = vmax.f32 %v4568_v36, 0.0 }
 0x573   : > { %v4614_v32 = vmax.f32 %v4560_v38, 0.0  ;;  %v4563_v43 = vadd.f32 %v7041_v39, %v4562_v42 }
 0x574   : > { %v4617_v48 = vmax.f32 %v4571_v49, 0.0  ;;  %v4673_v51 = vsel %vm7309_vm6, %v4616_v44, 0.0 }
 0x575   : > { %v4669_v37 = vsel %vm7307_vm5, %v4614_v32, 0.0  ;;  %v4615_v45 = vmax.f32 %v4563_v43, 0.0 }
 0x576   : > { %v4670_v46 = vadd.f32 %v4669_v37, %v4668_v34  ;;  %v4675_v41 = vsel %vm7310_vm7, %v4617_v48, 0.0 }
 0x577   : > { %v4671_v7 = vsel %vm7308_vm2, %v4615_v45, 0.0 }
 0x578   : > { %v4672_v50 = vadd.f32 %v4671_v7, %v4670_v46 }
 0x57a   : > { %v4674_v52 = vadd.f32 %v4673_v51, %v4672_v50 }
 0x57c   : > { %v4676_v54 = vadd.f32 %v4675_v41, %v4674_v52 }
 0x57e   : > { %v5250_v55 = vpop.f32.mrb[48].mxu0 }
 0x57f   : > { %v4575_v56 = vpop.f32.mrb[49].mxu0  ;;  %v4584_v57 = vadd.f32 %v5250_v55, %v7041_v39 }
 0x580   : > { %v4576_v58 = vadd.f32 %v7041_v39, %v4575_v56  ;;  %v5251_v60 = vpop.f32.mrb[50].mxu0 }
 0x581   : > { %v4578_v61 = vpop.f32.mrb[51].mxu0  ;;  %v4587_v63 = vadd.f32 %v5251_v60, %v7041_v39  ;;  %v4620_v1 = vmax.f32 %v4584_v57, 0.0 }
 0x582   : > { %v4618_v62 = vmax.f32 %v4576_v58, 0.0  ;;  %v4579_v0 = vadd.f32 %v7041_v39, %v4578_v61 }
 0x583   : > { %v4621_v14 = vmax.f32 %v4587_v63, 0.0  ;;  %v4681_v6 = vsel %vm7313_vm8, %v4620_v1, 0.0 }
 0x584   : > { %v4677_v59 = vsel %vm7311_vm3, %v4618_v62, 0.0  ;;  %v4619_v2 = vmax.f32 %v4579_v0, 0.0 }
 0x585   : > { %v4678_v4 = vadd.f32 %v4677_v59, %v4676_v54  ;;  %v4683_v9 = vsel %vm7314_vm9, %v4621_v14, 0.0 }
 0x586   : > { %v4679_v5 = vsel %vm7312_vm4, %v4619_v2, 0.0 }
 0x587   : > { %v4680_v47 = vadd.f32 %v4679_v5, %v4678_v4 }
 0x589   : > { %v4682_v8 = vadd.f32 %v4681_v6, %v4680_v47 }
 0x58b   : > { %v4684_v10 = vadd.f32 %v4683_v9, %v4682_v8 }
 0x58d   : > { %v4685_v11 = vrot.slane %v4684_v10, 4 }
 0x58f   : > { %v4686_v12 = vadd.f32 %v4685_v11, %v4684_v10 }
 0x591   : > { %v4687_v39 = vrot.slane %v4686_v12, 2 }
 0x593   : > { %v4688_v13 = vadd.f32 %v4687_v39, %v4686_v12 }
 0x595   : > { %v4689_v15 = vrot.slane %v4688_v13, 1 }
 0x597   : > { %v4690_v25 = vadd.f32 %v4689_v15, %v4688_v13 }
 0x599   : > { %v4691_v16 = vpack.c.bf16 %v4690_v25, %v4690_v25 }
 0x59b   : > { %5255 = vmatmul.mubr.msk.bf16.vlgmr.msra.gmra.mrb[44].mxu1 %vm7315_vm10, %v4691_v16 }
 0x66e   : > { %v4734_v53 = vpop.f32.mrb[44].mxu1 }
 0x66f   : > { %v4735_v18 = vadd.f32 %v4734_v53, %v4693_v17  ;;  %v5256_v19 = vpop.f32.mrb[45].mxu1 }
 0x670   : > { %v4737_v20 = vpop.f32.mrb[46].mxu1 }
 0x671   : > { %v5257_v21 = vpop.f32.mrb[47].mxu1  ;;  %4741 = vst.msk [vmem:[%s324_s16] sm:$0x1] %vm4740_vm11, %v4735_v18 }
 0x672   : > { %5346 = shalt.err (!%p5343_p3)
}
 0x673   : > { %s5347_s24 = scalar_lea.hbm %s7121_s27, 16  ;;  %s5351_s16 = scalar_lea.hbm %s7172_s9, 32 }
 0x674   : > { %p5348_p4 = scmp.ne.s32.totalorder %s7121_s27, %s5347_s24  ;;  %p5352_p9 = scmp.lt.u32.totalorder %s7121_s27, %s7172_s9 }
 0x675   : > { %p5353_p10 = scmp.lt.u32.totalorder %s5351_s16, %s5347_s24  ;;  %p5355_p12 = scmp.lt.u32.totalorder %s5347_s24, %s7121_s27 }
 0x676   : > { %p5349_p7 = pnand %p5348_p4, %p5500_p5 }
 0x677   : > { %p5354_p11 = por %p5353_p10, %p5352_p9 }
 0x678   : > { %p5350_p8 = pneg %p5349_p7 }
 0x679   : > { %p5356_p13 = por %p5355_p12, %p5354_p11 }
 0x67b   : > { %p5357_p0 = pnand %p5356_p13, %p5350_p8 }
 0x67d   : > { %5360 = shalt.err (!%p5357_p0)
}
 0x67e   : > { %5269 = dma.vmem_to_hbm [thread:$0]  (%p5500_p5), %s7123_s25, 16, %s7121_s27, %s4743_s13  }
 0x67f PF: > { %p5275_p1 = scmp.ge.s32.totalorder %s5395_s12, 2  ;;  %s4767_s29 = sand.u32 1, %s5383_s30  }
 0x680   : > { %s4768_s23 = scalar_lea.sflag [#allocation6], %s4767_s29 }
 0x681   : > { %p5272_p2 = pnand %p5275_p1, %p5504_p6 }
 0x683   : > { %5378 = dma.done.wait (!%p5272_p2), %s4768_s23, 16  }
 0x684   : > { %5380 = vsyncadd (!%p5272_p2), %s4768_s23, 4294967280  ;;  %p19_p3 = scmp.ge.s32.totalorder %s5487_s15, 4   ;;  %s7316_s30 = smov %s5387_s10 }
 0x685   : > { %s7317_s10 = smov %s5391_s11  ;;  %s7318_s11 = smov %s5498_s18 }
 0x686   : > { %s7319_s12 = smov %s5487_s15  ;;  %21 = sbr.rel (!%p19_p3) target bundleno = 3 (0x3), region = 99 }
 0x68d   :  { %4772 = vsyncpa [#allocation6], 1 }
 0x68e   :  { %4774 = vsyncpa [#allocation6 + $0x1], 1 }

</bundles_post_ra>
